<compile_context>
chip_gen: v6e
topology: v6e:2x2x1
jax: 0.10.0
libtpu: 0.0.40
codegen_flags: <defaults>
</compile_context>

<pallas_src>
import math

import jax
import jax.numpy as jnp
from jax import lax
from jax.experimental import pallas as pl
from jax.experimental.pallas import tpu as pltpu

VMEM = pltpu.MemorySpace.VMEM
EPS = 1e-5          # custom LayerNorm and nn.LayerNorm both use eps=1e-5
MIN_SCALE = 0.001   # TemperalGRUDecoder.min_scale
MLP_NAMES = ("mlp1", "enc_mlp", "dec_mlp", "loc1", "scale1")

# TODO(synk): switch to jnp.bfloat16 (single-pass MXU) once numerical parity
# vs the f32 PyTorch reference has been validated; kept f32 to preserve exact
# forward-pass semantics.
COMPUTE_DTYPE = jnp.float32


# --------------------------------------------------------------------------
# Static layout of the packed (N, H) vector slab (biases / gammas / betas).
# --------------------------------------------------------------------------
def _vec_names(nlayers):
    names = ["conv_b", "mlp1_b", "mlp1_g", "mlp1_beta"]
    for l in range(nlayers):
        names += [f"t{l}_bo", f"t{l}_g1", f"t{l}_b1",
                  f"t{l}_bff1", f"t{l}_bff2", f"t{l}_g2", f"t{l}_b2"]
    for m in ("enc_mlp", "dec_mlp", "loc1", "scale1"):
        names += [f"{m}_b", f"{m}_g", f"{m}_beta"]
    return names


# --------------------------------------------------------------------------
# In-kernel helpers
# --------------------------------------------------------------------------
def _layer_norm(x, g, b):
    u = jnp.mean(x, axis=-1, keepdims=True)
    d = x - u
    var = jnp.mean(d * d, axis=-1, keepdims=True)
    return g * (d * lax.rsqrt(var + EPS)) + b


def _mm(a, w):
    return jnp.dot(a.astype(COMPUTE_DTYPE), w.astype(COMPUTE_DTYPE),
                   preferred_element_type=jnp.float32)


def _bmm(spec, a, b):
    return jnp.einsum(spec, a.astype(COMPUTE_DTYPE), b.astype(COMPUTE_DTYPE),
                      preferred_element_type=jnp.float32)


# --------------------------------------------------------------------------
# Fully fused kernel: Temperal_Encoder + TemperalGRUDecoder
# --------------------------------------------------------------------------
def _make_kernel(B, L, H, nhead, pred_len, nlayers, treedef, n_in):
    dh = H // nhead
    vidx = {n: i for i, n in enumerate(_vec_names(nlayers))}
    midx = {n: i for i, n in enumerate(MLP_NAMES)}

    def kernel(*refs):
        P = jax.tree_util.tree_unflatten(treedef, list(refs[:n_in]))
        hid_ref, ls_ref = refs[n_in:]

        V = P["vecs"][...]                                  # (NV, H), loaded once

        def vec(name):
            i = vidx[name]
            return V[i:i + 1, :]                            # (1, H)

        def mlp(x, name):
            # MLP module: relu(LayerNorm(x @ w + b)); residual handled by caller.
            h = _mm(x, P["mlp_w"][midx[name]]) + vec(name + "_b")
            return jnp.maximum(
                _layer_norm(h, vec(name + "_g"), vec(name + "_beta")), 0.0)

        def lstm_steps(n_steps, xg_at, whh, want_seq):
            # Single-layer LSTM, zero init state, PyTorch gate order (i,f,g,o).
            # One fused (B,H)@(H,4H) recurrent dot per step; gates split with
            # static lane slices of the lane-dense (B,4H) result.
            h = jnp.zeros((B, H), jnp.float32)
            c = jnp.zeros((B, H), jnp.float32)
            hs = []
            for t in range(n_steps):
                g = xg_at(t) + _mm(h, whh)                  # (B, 4H)
                i = jax.nn.sigmoid(g[:, 0:H])
                f = jax.nn.sigmoid(g[:, H:2 * H])
                gg = jnp.tanh(g[:, 2 * H:3 * H])
                o = jax.nn.sigmoid(g[:, 3 * H:4 * H])
                c = f * c + i * gg
                h = o * jnp.tanh(c)
                if want_seq:
                    hs.append(h)
            return h, c, hs

        # ------------------- Temperal_Encoder ----------------------------
        # Conv1d(2->H, k=3, pad=1) as one matmul on im2col columns; result is
        # already in (B*L, H) token layout (== conv1d(x).permute(0, 2, 1)).
        x = _mm(P["x_cols"][...], P["conv_w"][...]) + vec("conv_b")
        x = mlp(x, "mlp1") + x
        xd = x

        # TransformerEncoder layers (post-norm, relu FF).
        # TODO(synk): dropout layers are treated as eval-mode identity.
        t = x
        for l in range(nlayers):
            qkv = _mm(t, P["qkv_w"][l]) + P["qkv_b"][l]     # (B*L, 3H) fused QKV

            def heads(block):                               # (B*L, H) -> (nhead*B, L, dh)
                return jnp.concatenate(
                    [block[:, hh * dh:(hh + 1) * dh].reshape(B, L, dh)
                     for hh in range(nhead)], axis=0)

            q = heads(qkv[:, 0:H])                          # 1/sqrt(dh) pre-folded
            k = heads(qkv[:, H:2 * H])
            v = heads(qkv[:, 2 * H:3 * H])
            s = _bmm('bqd,bkd->bqk', q, k)                  # all heads in one einsum
            s = s - jnp.max(s, axis=-1, keepdims=True)
            p = jnp.exp(s)
            p = p / jnp.sum(p, axis=-1, keepdims=True)      # exact softmax denom
            o = _bmm('bqk,bkd->bqd', p, v)                  # (nhead*B, L, dh)
            o_cat = jnp.concatenate(
                [o[hh * B:(hh + 1) * B].reshape(B * L, dh) for hh in range(nhead)],
                axis=-1)                                    # (B*L, H) heads concat
            attn = _mm(o_cat, P["out_w"][l]) + vec(f"t{l}_bo")
            t = _layer_norm(t + attn, vec(f"t{l}_g1"), vec(f"t{l}_b1"))
            ff = jnp.maximum(_mm(t, P["ff1_w"][l]) + vec(f"t{l}_bff1"), 0.0)
            ff = _mm(ff, P["ff2_w"][l]) + vec(f"t{l}_bff2")
            t = _layer_norm(t + ff, vec(f"t{l}_g2"), vec(f"t{l}_b2"))

        x_in = t + xd                                       # transformer(x) + x

        # Encoder LSTM: input projection (all steps, all gates) hoisted out of
        # the recurrence; per-step read is one static (B,4H) select.
        xg_enc = (_mm(x_in, P["lstm_wih"][0]) + P["lstm_b"][0]).reshape(B, L, 4 * H)
        hn, cn, _ = lstm_steps(L, lambda tt: xg_enc[:, tt, :],
                               P["lstm_whh"][0], want_seq=False)
        x_enc = mlp(hn, "enc_mlp") + hn                     # trj_hidden_0

        # ------------------- TemperalGRUDecoder --------------------------
        # Broadcast input: x_t == x_enc every step -> project exactly once.
        xg_dec = _mm(x_enc, P["lstm_wih"][1]) + P["lstm_b"][1]       # (B, 4H)
        hn_d, _cn_d, hs = lstm_steps(pred_len, lambda tt: xg_dec,
                                     P["lstm_whh"][1], want_seq=True)
        thf = mlp(hn_d, "dec_mlp") + hn_d                   # traj_hidden_future

        out2d = jnp.concatenate(hs, axis=0)                 # (pred_len*B, H), rows (t, b)
        loc_h = mlp(out2d, "loc1")
        sc_h = mlp(out2d, "scale1")
        # Block-diagonal head weight -> one matmul for both loc2 and scale2.
        raw = _mm(jnp.concatenate([loc_h, sc_h], axis=-1),
                  P["head_w"][...]) + P["head_b"][...]      # (pred_len*B, 4)
        loc = raw[:, 0:2]
        sc = raw[:, 2:4]
        # F.elu_(sc) + 1 + min_scale  ==  (sc+1 if sc > 0 else exp(sc)) + min_scale
        scale = jnp.where(sc > 0.0, sc + 1.0, jnp.exp(sc)) + MIN_SCALE

        # Coalesced outputs (split in the wrapper).
        hid_ref[...] = jnp.concatenate([x_enc, hn, cn, thf], axis=-1)   # (B, 4H)
        ls_ref[...] = jnp.concatenate([loc, scale], axis=-1)            # (pred_len*B, 4)

    return kernel


# --------------------------------------------------------------------------
# One-time parameter prep / packing (pure layout plumbing, cached by caller)
# --------------------------------------------------------------------------
def prep_params(params, H, nhead):
    """NOTE for real PyTorch checkpoints: Linear/LSTM weights must be
    transposed to (in, out) layout, LSTM bias must be b_ih + b_hh, and the
    MHA in_proj must be laid out as columns [Q | K | V] with head-contiguous
    dh blocks (the convention used here and in init_params)."""
    dh = H // nhead
    nlayers = len(params["tlayers"])
    inv = 1.0 / math.sqrt(dh)

    vec_rows = {"conv_b": params["conv_b"]}
    for m in MLP_NAMES:
        p = params[m]
        vec_rows[f"{m}_b"] = p["b"]
        vec_rows[f"{m}_g"] = p["g"]
        vec_rows[f"{m}_beta"] = p["beta"]

    qscale = jnp.concatenate([jnp.full((H,), inv, jnp.float32),
                              jnp.ones((2 * H,), jnp.float32)])
    qkv_w, qkv_b, out_w, ff1_w, ff2_w = [], [], [], [], []
    for l, lp in enumerate(params["tlayers"]):
        qkv_w.append(lp["w_in"] * qscale[None, :])          # fold 1/sqrt(dh) into Q
        qkv_b.append(lp["b_in"] * qscale)
        out_w.append(lp["w_out"])
        ff1_w.append(lp["w_ff1"])
        ff2_w.append(lp["w_ff2"])
        vec_rows[f"t{l}_bo"] = lp["b_out"]
        vec_rows[f"t{l}_g1"] = lp["g1"]
        vec_rows[f"t{l}_b1"] = lp["b1"]
        vec_rows[f"t{l}_bff1"] = lp["b_ff1"]
        vec_rows[f"t{l}_bff2"] = lp["b_ff2"]
        vec_rows[f"t{l}_g2"] = lp["g2"]
        vec_rows[f"t{l}_b2"] = lp["b2"]

    vecs = jnp.stack([vec_rows[n] for n in _vec_names(nlayers)], axis=0)

    z2 = jnp.zeros((H, 2), jnp.float32)
    head_w = jnp.block([[params["loc2"]["w"], z2], [z2, params["scale2"]["w"]]])
    head_b = jnp.concatenate([params["loc2"]["b"],
                              params["scale2"]["b"]]).reshape(1, 4)

    return dict(
        conv_w=params["conv_w"].reshape(H, -1).T,                       # (C*3, H)
        mlp_w=jnp.stack([params[m]["w"] for m in MLP_NAMES]),           # (5, H, H)
        vecs=vecs,                                                      # (NV, H)
        qkv_w=jnp.stack(qkv_w),                                         # (nl, H, 3H)
        qkv_b=jnp.stack(qkv_b).reshape(nlayers, 1, 3 * H),              # (nl, 1, 3H)
        out_w=jnp.stack(out_w),                                         # (nl, H, H)
        ff1_w=jnp.stack(ff1_w),
        ff2_w=jnp.stack(ff2_w),
        lstm_wih=jnp.stack([params["enc_lstm"]["wih"], params["dec_lstm"]["wih"]]),
        lstm_whh=jnp.stack([params["enc_lstm"]["whh"], params["dec_lstm"]["whh"]]),
        lstm_b=jnp.stack([params["enc_lstm"]["b"],
                          params["dec_lstm"]["b"]]).reshape(2, 1, 4 * H),
        head_w=head_w,                                                  # (2H, 4)
        head_b=head_b,                                                  # (1, 4)
    )


def _im2col(x):
    """Conv1d(k=3, pad=1) columns: (B, 2, L) -> (B*L, 6), rows ordered (b, l)."""
    B, C, L = x.shape
    xp = jnp.pad(x, ((0, 0), (0, 0), (1, 1)))
    cols = jnp.stack([xp[:, :, k:k + L] for k in range(3)], axis=-1)    # (B,C,L,3)
    return cols.transpose(0, 2, 1, 3).reshape(B * L, C * 3)


# --------------------------------------------------------------------------
# Forward wrapper: ONE pallas_call for the whole EncoderTrainer.forward
# --------------------------------------------------------------------------
def encoder_trainer_forward(prepped, x, is_temper_test, nhead, pred_len):
    B, _C, L = x.shape
    H = prepped["mlp_w"].shape[-1]
    nlayers = prepped["qkv_w"].shape[0]

    args = dict(x_cols=_im2col(x), **prepped)
    flat, treedef = jax.tree_util.tree_flatten(args)
    n_in = len(flat)

    hid, ls = pl.pallas_call(
        _make_kernel(B, L, H, nhead, pred_len, nlayers, treedef, n_in),
        out_shape=(jax.ShapeDtypeStruct((B, 4 * H), jnp.float32),
                   jax.ShapeDtypeStruct((pred_len * B, 4), jnp.float32)),
        in_specs=[pl.BlockSpec(memory_space=VMEM)] * n_in,
        out_specs=(pl.BlockSpec(memory_space=VMEM),
                   pl.BlockSpec(memory_space=VMEM)),
    )(*flat)

    x_enc = hid[:, 0:H]            # trj_hidden_0 (x_encoded)
    x_state = hid[:, H:2 * H]      # hn
    cn = hid[:, 2 * H:3 * H]       # cn
    thf = hid[:, 3 * H:4 * H]      # traj_hidden_future
    loc = ls[:, 0:2].reshape(pred_len, B, 2).transpose(1, 0, 2)     # (B, T, 2)
    scale = ls[:, 2:4].reshape(pred_len, B, 2).transpose(1, 0, 2)

    if is_temper_test:
        full_hidden = jnp.concatenate([x_enc, thf], axis=-1)
        return None, full_hidden, x_enc, x_state, cn
    return (loc, scale), None, x_enc, x_state, cn


# --------------------------------------------------------------------------
# Deterministic parameter init (synthetic; mirrors module shapes, (in,out) layout)
# --------------------------------------------------------------------------
def init_params(key, H, nlayers, c_in=2):
    keys = iter(jax.random.split(key, 64))

    def rn(shape, scale=0.05):
        return scale * jax.random.normal(next(keys), shape, dtype=jnp.float32)

    def lstm_p(in_dim):
        return dict(wih=rn((in_dim, 4 * H)), whh=rn((H, 4 * H)),
                    b=jnp.zeros((4 * H,), jnp.float32))   # b_ih + b_hh (zero init)

    def mlp_p(in_dim, out_dim):
        return dict(w=rn((in_dim, out_dim)), b=jnp.zeros((out_dim,), jnp.float32),
                    g=jnp.ones((out_dim,), jnp.float32),
                    beta=jnp.zeros((out_dim,), jnp.float32))

    def tlayer():
        return dict(w_in=rn((H, 3 * H)), b_in=jnp.zeros((3 * H,), jnp.float32),
                    w_out=rn((H, H)), b_out=jnp.zeros((H,), jnp.float32),
                    g1=jnp.ones((H,), jnp.float32), b1=jnp.zeros((H,), jnp.float32),
                    w_ff1=rn((H, H)), b_ff1=jnp.zeros((H,), jnp.float32),
                    w_ff2=rn((H, H)), b_ff2=jnp.zeros((H,), jnp.float32),
                    g2=jnp.ones((H,), jnp.float32), b2=jnp.zeros((H,), jnp.float32))

    return dict(
        conv_w=rn((H, c_in, 3)), conv_b=jnp.zeros((H,), jnp.float32),
        tlayers=[tlayer() for _ in range(nlayers)],
        mlp1=mlp_p(H, H),
        enc_mlp=mlp_p(H, H),
        enc_lstm=lstm_p(H),
        dec_lstm=lstm_p(H),
        dec_mlp=mlp_p(H, H),
        loc1=mlp_p(H, H), loc2=dict(w=rn((H, 2)), b=jnp.zeros((2,), jnp.float32)),
        scale1=mlp_p(H, H), scale2=dict(w=rn((H, 2)), b=jnp.zeros((2,), jnp.float32)),
    )


# --------------------------------------------------------------------------
if __name__ == "__main__":
    H = 32            # args.hidden_size
    NHEAD = 4         # args.x_encoder_head
    NLAYERS = 2       # args.x_encoder_layers
    PRED_LEN = 12     # args.pred_length
    B = 2             # batch
    OBS_LEN = 8       # observed sequence length

    root = jax.random.PRNGKey(0)
    pkey, xkey = jax.random.split(root)
    params = init_params(pkey, H, NLAYERS)
    prepped = prep_params(params, H, NHEAD)        # one-time prep, cached
    train_x_0 = jax.random.normal(xkey, (B, 2, OBS_LEN), dtype=jnp.float32)

    fwd = jax.jit(encoder_trainer_forward, static_argnums=(2, 3, 4))

    # isTemperTest = False  ->  output = (loc, scale)
    output, full_hidden, trj0, hidden, cn = fwd(prepped, train_x_0, False,
                                                NHEAD, PRED_LEN)
    jax.block_until_ready((output, trj0, hidden, cn))
    assert output[0].shape == (B, PRED_LEN, 2)
    assert output[1].shape == (B, PRED_LEN, 2)
    assert trj0.shape == (B, H) and hidden.shape == (B, H) and cn.shape == (B, H)
    assert bool(jnp.all(jnp.isfinite(output[0])))
    assert bool(jnp.all(jnp.isfinite(output[1])))

    # isTemperTest = True  ->  full_hidden = cat(trj_hidden_0, traj_hidden_future)
    output_t, full_hidden_t, trj0_t, hidden_t, cn_t = fwd(prepped, train_x_0, True,
                                                          NHEAD, PRED_LEN)
    jax.block_until_ready((full_hidden_t, trj0_t, hidden_t, cn_t))
    assert output_t is None and full_hidden_t.shape == (B, 2 * H)
    assert bool(jnp.all(jnp.isfinite(full_hidden_t)))

    print("KERNEL_OK")
</pallas_src>

<mosaic_0001>
module attributes {stable_mosaic.version = 11 : i64} {
  func.func @kernel(%arg0: memref<6x32xf32, #tpu.memory_space<vmem>>, %arg1: memref<2x32x32xf32, #tpu.memory_space<vmem>>, %arg2: memref<2x32x32xf32, #tpu.memory_space<vmem>>, %arg3: memref<1x4xf32, #tpu.memory_space<vmem>>, %arg4: memref<64x4xf32, #tpu.memory_space<vmem>>, %arg5: memref<2x1x128xf32, #tpu.memory_space<vmem>>, %arg6: memref<2x32x128xf32, #tpu.memory_space<vmem>>, %arg7: memref<2x32x128xf32, #tpu.memory_space<vmem>>, %arg8: memref<5x32x32xf32, #tpu.memory_space<vmem>>, %arg9: memref<2x32x32xf32, #tpu.memory_space<vmem>>, %arg10: memref<2x1x96xf32, #tpu.memory_space<vmem>>, %arg11: memref<2x32x96xf32, #tpu.memory_space<vmem>>, %arg12: memref<30x32xf32, #tpu.memory_space<vmem>>, %arg13: memref<16x6xf32, #tpu.memory_space<vmem>>, %arg14: memref<2x128xf32, #tpu.memory_space<vmem>>, %arg15: memref<24x4xf32, #tpu.memory_space<vmem>>) attributes {dimension_semantics = [], scalar_prefetch = 0 : i64, scratch_operands = 0 : i64, tpu.core_type = #tpu.core_type<tc>} {
    %c0 = arith.constant 0 : index
    %c0_0 = arith.constant 0 : index
    %0 = vector.load %arg12[%c0, %c0_0] : memref<30x32xf32, #tpu.memory_space<vmem>>, vector<30x32xf32>
    %c0_1 = arith.constant 0 : index
    %c0_2 = arith.constant 0 : index
    %1 = vector.load %arg13[%c0_1, %c0_2] : memref<16x6xf32, #tpu.memory_space<vmem>>, vector<16x6xf32>
    %c0_3 = arith.constant 0 : index
    %c0_4 = arith.constant 0 : index
    %2 = vector.load %arg0[%c0_3, %c0_4] : memref<6x32xf32, #tpu.memory_space<vmem>>, vector<6x32xf32>
    %cst = arith.constant dense<0.000000e+00> : vector<16x32xf32>
    %3 = tpu.matmul %1, %2, %cst {dimension_numbers = #tpu.dot_dimension_numbers<[1], [0], [0], [1], [0, 0, 1, 1], [], []>} : vector<16x6xf32>, vector<6x32xf32>, vector<16x32xf32> -> vector<16x32xf32>
    %4 = vector.extract_strided_slice %0 {offsets = [0, 0], sizes = [1, 32], strides = [1, 1]} : vector<30x32xf32> to vector<1x32xf32>
    %5 = vector.broadcast %4 : vector<1x32xf32> to vector<16x32xf32>
    %6 = arith.addf %3, %5 : vector<16x32xf32>
    %c0_5 = arith.constant 0 : index
    %c0_6 = arith.constant 0 : index
    %c0_7 = arith.constant 0 : index
    %7 = vector.load %arg8[%c0_5, %c0_6, %c0_7] : memref<5x32x32xf32, #tpu.memory_space<vmem>>, vector<1x32x32xf32>
    %8 = vector.shape_cast %7 : vector<1x32x32xf32> to vector<32x32xf32>
    %cst_8 = arith.constant dense<0.000000e+00> : vector<16x32xf32>
    %9 = tpu.matmul %6, %8, %cst_8 {dimension_numbers = #tpu.dot_dimension_numbers<[1], [0], [0], [1], [0, 0, 1, 1], [], []>} : vector<16x32xf32>, vector<32x32xf32>, vector<16x32xf32> -> vector<16x32xf32>
    %10 = vector.extract_strided_slice %0 {offsets = [1, 0], sizes = [1, 32], strides = [1, 1]} : vector<30x32xf32> to vector<1x32xf32>
    %11 = vector.broadcast %10 : vector<1x32xf32> to vector<16x32xf32>
    %12 = arith.addf %9, %11 : vector<16x32xf32>
    %13 = vector.extract_strided_slice %0 {offsets = [2, 0], sizes = [1, 32], strides = [1, 1]} : vector<30x32xf32> to vector<1x32xf32>
    %14 = vector.extract_strided_slice %0 {offsets = [3, 0], sizes = [1, 32], strides = [1, 1]} : vector<30x32xf32> to vector<1x32xf32>
    %cst_9 = arith.constant dense<0.000000e+00> : vector<16xf32>
    %15 = vector.multi_reduction <add>, %12, %cst_9 [1] : vector<16x32xf32> to vector<16xf32>
    %16 = vector.shape_cast %15 : vector<16xf32> to vector<16x1xf32>
    %cst_10 = arith.constant 3.200000e+01 : f32
    %17 = vector.broadcast %cst_10 : f32 to vector<16x1xf32>
    %18 = arith.divf %16, %17 : vector<16x1xf32>
    %19 = vector.broadcast %18 : vector<16x1xf32> to vector<16x32xf32>
    %20 = arith.subf %12, %19 : vector<16x32xf32>
    %21 = arith.mulf %20, %20 : vector<16x32xf32>
    %cst_11 = arith.constant dense<0.000000e+00> : vector<16xf32>
    %22 = vector.multi_reduction <add>, %21, %cst_11 [1] : vector<16x32xf32> to vector<16xf32>
    %23 = vector.shape_cast %22 : vector<16xf32> to vector<16x1xf32>
    %cst_12 = arith.constant 3.200000e+01 : f32
    %24 = vector.broadcast %cst_12 : f32 to vector<16x1xf32>
    %25 = arith.divf %23, %24 : vector<16x1xf32>
    %cst_13 = arith.constant 9.99999974E-6 : f32
    %26 = vector.broadcast %cst_13 : f32 to vector<16x1xf32>
    %27 = arith.addf %25, %26 : vector<16x1xf32>
    %28 = math.rsqrt %27 : vector<16x1xf32>
    %29 = vector.broadcast %28 : vector<16x1xf32> to vector<16x32xf32>
    %30 = arith.mulf %20, %29 : vector<16x32xf32>
    %31 = vector.broadcast %13 : vector<1x32xf32> to vector<16x32xf32>
    %32 = arith.mulf %31, %30 : vector<16x32xf32>
    %33 = vector.broadcast %14 : vector<1x32xf32> to vector<16x32xf32>
    %34 = arith.addf %32, %33 : vector<16x32xf32>
    %cst_14 = arith.constant 0.000000e+00 : f32
    %35 = vector.broadcast %cst_14 : f32 to vector<16x32xf32>
    %36 = arith.maximumf %34, %35 : vector<16x32xf32>
    %37 = arith.addf %36, %6 : vector<16x32xf32>
    %c0_15 = arith.constant 0 : index
    %c0_16 = arith.constant 0 : index
    %c0_17 = arith.constant 0 : index
    %38 = vector.load %arg11[%c0_15, %c0_16, %c0_17] : memref<2x32x96xf32, #tpu.memory_space<vmem>>, vector<1x32x96xf32>
    %39 = vector.shape_cast %38 : vector<1x32x96xf32> to vector<32x96xf32>
    %cst_18 = arith.constant dense<0.000000e+00> : vector<16x96xf32>
    %40 = tpu.matmul %37, %39, %cst_18 {dimension_numbers = #tpu.dot_dimension_numbers<[1], [0], [0], [1], [0, 0, 1, 1], [], []>} : vector<16x32xf32>, vector<32x96xf32>, vector<16x96xf32> -> vector<16x96xf32>
    %c0_19 = arith.constant 0 : index
    %c0_20 = arith.constant 0 : index
    %c0_21 = arith.constant 0 : index
    %41 = vector.load %arg10[%c0_19, %c0_20, %c0_21] : memref<2x1x96xf32, #tpu.memory_space<vmem>>, vector<1x1x96xf32>
    %42 = vector.shape_cast %41 : vector<1x1x96xf32> to vector<1x96xf32>
    %43 = vector.broadcast %42 : vector<1x96xf32> to vector<16x96xf32>
    %44 = arith.addf %40, %43 : vector<16x96xf32>
    %45 = vector.extract_strided_slice %44 {offsets = [0, 0], sizes = [16, 32], strides = [1, 1]} : vector<16x96xf32> to vector<16x32xf32>
    %46 = vector.extract_strided_slice %45 {offsets = [0, 0], sizes = [16, 8], strides = [1, 1]} : vector<16x32xf32> to vector<16x8xf32>
    %47 = vector.shape_cast %46 : vector<16x8xf32> to vector<2x8x8xf32>
    %48 = vector.extract_strided_slice %45 {offsets = [0, 8], sizes = [16, 8], strides = [1, 1]} : vector<16x32xf32> to vector<16x8xf32>
    %49 = vector.shape_cast %48 : vector<16x8xf32> to vector<2x8x8xf32>
    %50 = vector.extract_strided_slice %45 {offsets = [0, 16], sizes = [16, 8], strides = [1, 1]} : vector<16x32xf32> to vector<16x8xf32>
    %51 = vector.shape_cast %50 : vector<16x8xf32> to vector<2x8x8xf32>
    %52 = vector.extract_strided_slice %45 {offsets = [0, 24], sizes = [16, 8], strides = [1, 1]} : vector<16x32xf32> to vector<16x8xf32>
    %53 = vector.shape_cast %52 : vector<16x8xf32> to vector<2x8x8xf32>
    %54 = tpu.concatenate %47, %49, %51, %53 in 0 : vector<2x8x8xf32>, vector<2x8x8xf32>, vector<2x8x8xf32>, vector<2x8x8xf32> -> vector<8x8x8xf32>
    %55 = vector.extract_strided_slice %44 {offsets = [0, 32], sizes = [16, 32], strides = [1, 1]} : vector<16x96xf32> to vector<16x32xf32>
    %56 = vector.extract_strided_slice %55 {offsets = [0, 0], sizes = [16, 8], strides = [1, 1]} : vector<16x32xf32> to vector<16x8xf32>
    %57 = vector.shape_cast %56 : vector<16x8xf32> to vector<2x8x8xf32>
    %58 = vector.extract_strided_slice %55 {offsets = [0, 8], sizes = [16, 8], strides = [1, 1]} : vector<16x32xf32> to vector<16x8xf32>
    %59 = vector.shape_cast %58 : vector<16x8xf32> to vector<2x8x8xf32>
    %60 = vector.extract_strided_slice %55 {offsets = [0, 16], sizes = [16, 8], strides = [1, 1]} : vector<16x32xf32> to vector<16x8xf32>
    %61 = vector.shape_cast %60 : vector<16x8xf32> to vector<2x8x8xf32>
    %62 = vector.extract_strided_slice %55 {offsets = [0, 24], sizes = [16, 8], strides = [1, 1]} : vector<16x32xf32> to vector<16x8xf32>
    %63 = vector.shape_cast %62 : vector<16x8xf32> to vector<2x8x8xf32>
    %64 = tpu.concatenate %57, %59, %61, %63 in 0 : vector<2x8x8xf32>, vector<2x8x8xf32>, vector<2x8x8xf32>, vector<2x8x8xf32> -> vector<8x8x8xf32>
    %65 = vector.extract_strided_slice %44 {offsets = [0, 64], sizes = [16, 32], strides = [1, 1]} : vector<16x96xf32> to vector<16x32xf32>
    %66 = vector.extract_strided_slice %65 {offsets = [0, 0], sizes = [16, 8], strides = [1, 1]} : vector<16x32xf32> to vector<16x8xf32>
    %67 = vector.shape_cast %66 : vector<16x8xf32> to vector<2x8x8xf32>
    %68 = vector.extract_strided_slice %65 {offsets = [0, 8], sizes = [16, 8], strides = [1, 1]} : vector<16x32xf32> to vector<16x8xf32>
    %69 = vector.shape_cast %68 : vector<16x8xf32> to vector<2x8x8xf32>
    %70 = vector.extract_strided_slice %65 {offsets = [0, 16], sizes = [16, 8], strides = [1, 1]} : vector<16x32xf32> to vector<16x8xf32>
    %71 = vector.shape_cast %70 : vector<16x8xf32> to vector<2x8x8xf32>
    %72 = vector.extract_strided_slice %65 {offsets = [0, 24], sizes = [16, 8], strides = [1, 1]} : vector<16x32xf32> to vector<16x8xf32>
    %73 = vector.shape_cast %72 : vector<16x8xf32> to vector<2x8x8xf32>
    %74 = tpu.concatenate %67, %69, %71, %73 in 0 : vector<2x8x8xf32>, vector<2x8x8xf32>, vector<2x8x8xf32>, vector<2x8x8xf32> -> vector<8x8x8xf32>
    "tpu.trace_start"() <{level = 10 : i32, message = "bqd,bkd->bqk"}> : () -> ()
    %cst_22 = arith.constant dense<0.000000e+00> : vector<8x8x8xf32>
    %75 = tpu.matmul %54, %64, %cst_22 {dimension_numbers = #tpu.dot_dimension_numbers<[2], [2], [1], [1], [0, 0, 0, 1, 1, 1], [0], [0]>} : vector<8x8x8xf32>, vector<8x8x8xf32>, vector<8x8x8xf32> -> vector<8x8x8xf32>
    "tpu.trace_stop"() : () -> ()
    %cst_23 = arith.constant dense<0xFF800000> : vector<8x8xf32>
    %76 = vector.multi_reduction <maximumf>, %75, %cst_23 [2] : vector<8x8x8xf32> to vector<8x8xf32>
    %77 = vector.shape_cast %76 : vector<8x8xf32> to vector<8x8x1xf32>
    %78 = vector.broadcast %77 : vector<8x8x1xf32> to vector<8x8x8xf32>
    %79 = arith.subf %75, %78 : vector<8x8x8xf32>
    %80 = math.exp %79 : vector<8x8x8xf32>
    %cst_24 = arith.constant dense<0.000000e+00> : vector<8x8xf32>
    %81 = vector.multi_reduction <add>, %80, %cst_24 [2] : vector<8x8x8xf32> to vector<8x8xf32>
    %82 = vector.shape_cast %81 : vector<8x8xf32> to vector<8x8x1xf32>
    %83 = vector.broadcast %82 : vector<8x8x1xf32> to vector<8x8x8xf32>
    %84 = arith.divf %80, %83 : vector<8x8x8xf32>
    "tpu.trace_start"() <{level = 10 : i32, message = "bqk,bkd->bqd"}> : () -> ()
    %cst_25 = arith.constant dense<0.000000e+00> : vector<8x8x8xf32>
    %85 = tpu.matmul %84, %74, %cst_25 {dimension_numbers = #tpu.dot_dimension_numbers<[2], [1], [1], [2], [0, 0, 0, 1, 1, 2], [0], [0]>} : vector<8x8x8xf32>, vector<8x8x8xf32>, vector<8x8x8xf32> -> vector<8x8x8xf32>
    "tpu.trace_stop"() : () -> ()
    %86 = vector.extract_strided_slice %85 {offsets = [0, 0, 0], sizes = [2, 8, 8], strides = [1, 1, 1]} : vector<8x8x8xf32> to vector<2x8x8xf32>
    %87 = vector.shape_cast %86 : vector<2x8x8xf32> to vector<16x8xf32>
    %88 = vector.extract_strided_slice %85 {offsets = [2, 0, 0], sizes = [2, 8, 8], strides = [1, 1, 1]} : vector<8x8x8xf32> to vector<2x8x8xf32>
    %89 = vector.shape_cast %88 : vector<2x8x8xf32> to vector<16x8xf32>
    %90 = vector.extract_strided_slice %85 {offsets = [4, 0, 0], sizes = [2, 8, 8], strides = [1, 1, 1]} : vector<8x8x8xf32> to vector<2x8x8xf32>
    %91 = vector.shape_cast %90 : vector<2x8x8xf32> to vector<16x8xf32>
    %92 = vector.extract_strided_slice %85 {offsets = [6, 0, 0], sizes = [2, 8, 8], strides = [1, 1, 1]} : vector<8x8x8xf32> to vector<2x8x8xf32>
    %93 = vector.shape_cast %92 : vector<2x8x8xf32> to vector<16x8xf32>
    %94 = tpu.concatenate %87, %89, %91, %93 in 1 : vector<16x8xf32>, vector<16x8xf32>, vector<16x8xf32>, vector<16x8xf32> -> vector<16x32xf32>
    %c0_26 = arith.constant 0 : index
    %c0_27 = arith.constant 0 : index
    %c0_28 = arith.constant 0 : index
    %95 = vector.load %arg9[%c0_26, %c0_27, %c0_28] : memref<2x32x32xf32, #tpu.memory_space<vmem>>, vector<1x32x32xf32>
    %96 = vector.shape_cast %95 : vector<1x32x32xf32> to vector<32x32xf32>
    %cst_29 = arith.constant dense<0.000000e+00> : vector<16x32xf32>
    %97 = tpu.matmul %94, %96, %cst_29 {dimension_numbers = #tpu.dot_dimension_numbers<[1], [0], [0], [1], [0, 0, 1, 1], [], []>} : vector<16x32xf32>, vector<32x32xf32>, vector<16x32xf32> -> vector<16x32xf32>
    %98 = vector.extract_strided_slice %0 {offsets = [4, 0], sizes = [1, 32], strides = [1, 1]} : vector<30x32xf32> to vector<1x32xf32>
    %99 = vector.broadcast %98 : vector<1x32xf32> to vector<16x32xf32>
    %100 = arith.addf %97, %99 : vector<16x32xf32>
    %101 = arith.addf %37, %100 : vector<16x32xf32>
    %102 = vector.extract_strided_slice %0 {offsets = [5, 0], sizes = [1, 32], strides = [1, 1]} : vector<30x32xf32> to vector<1x32xf32>
    %103 = vector.extract_strided_slice %0 {offsets = [6, 0], sizes = [1, 32], strides = [1, 1]} : vector<30x32xf32> to vector<1x32xf32>
    %cst_30 = arith.constant dense<0.000000e+00> : vector<16xf32>
    %104 = vector.multi_reduction <add>, %101, %cst_30 [1] : vector<16x32xf32> to vector<16xf32>
    %105 = vector.shape_cast %104 : vector<16xf32> to vector<16x1xf32>
    %cst_31 = arith.constant 3.200000e+01 : f32
    %106 = vector.broadcast %cst_31 : f32 to vector<16x1xf32>
    %107 = arith.divf %105, %106 : vector<16x1xf32>
    %108 = vector.broadcast %107 : vector<16x1xf32> to vector<16x32xf32>
    %109 = arith.subf %101, %108 : vector<16x32xf32>
    %110 = arith.mulf %109, %109 : vector<16x32xf32>
    %cst_32 = arith.constant dense<0.000000e+00> : vector<16xf32>
    %111 = vector.multi_reduction <add>, %110, %cst_32 [1] : vector<16x32xf32> to vector<16xf32>
    %112 = vector.shape_cast %111 : vector<16xf32> to vector<16x1xf32>
    %cst_33 = arith.constant 3.200000e+01 : f32
    %113 = vector.broadcast %cst_33 : f32 to vector<16x1xf32>
    %114 = arith.divf %112, %113 : vector<16x1xf32>
    %cst_34 = arith.constant 9.99999974E-6 : f32
    %115 = vector.broadcast %cst_34 : f32 to vector<16x1xf32>
    %116 = arith.addf %114, %115 : vector<16x1xf32>
    %117 = math.rsqrt %116 : vector<16x1xf32>
    %118 = vector.broadcast %117 : vector<16x1xf32> to vector<16x32xf32>
    %119 = arith.mulf %109, %118 : vector<16x32xf32>
    %120 = vector.broadcast %102 : vector<1x32xf32> to vector<16x32xf32>
    %121 = arith.mulf %120, %119 : vector<16x32xf32>
    %122 = vector.broadcast %103 : vector<1x32xf32> to vector<16x32xf32>
    %123 = arith.addf %121, %122 : vector<16x32xf32>
    %c0_35 = arith.constant 0 : index
    %c0_36 = arith.constant 0 : index
    %c0_37 = arith.constant 0 : index
    %124 = vector.load %arg1[%c0_35, %c0_36, %c0_37] : memref<2x32x32xf32, #tpu.memory_space<vmem>>, vector<1x32x32xf32>
    %125 = vector.shape_cast %124 : vector<1x32x32xf32> to vector<32x32xf32>
    %cst_38 = arith.constant dense<0.000000e+00> : vector<16x32xf32>
    %126 = tpu.matmul %123, %125, %cst_38 {dimension_numbers = #tpu.dot_dimension_numbers<[1], [0], [0], [1], [0, 0, 1, 1], [], []>} : vector<16x32xf32>, vector<32x32xf32>, vector<16x32xf32> -> vector<16x32xf32>
    %127 = vector.extract_strided_slice %0 {offsets = [7, 0], sizes = [1, 32], strides = [1, 1]} : vector<30x32xf32> to vector<1x32xf32>
    %128 = vector.broadcast %127 : vector<1x32xf32> to vector<16x32xf32>
    %129 = arith.addf %126, %128 : vector<16x32xf32>
    %cst_39 = arith.constant 0.000000e+00 : f32
    %130 = vector.broadcast %cst_39 : f32 to vector<16x32xf32>
    %131 = arith.maximumf %129, %130 : vector<16x32xf32>
    %c0_40 = arith.constant 0 : index
    %c0_41 = arith.constant 0 : index
    %c0_42 = arith.constant 0 : index
    %132 = vector.load %arg2[%c0_40, %c0_41, %c0_42] : memref<2x32x32xf32, #tpu.memory_space<vmem>>, vector<1x32x32xf32>
    %133 = vector.shape_cast %132 : vector<1x32x32xf32> to vector<32x32xf32>
    %cst_43 = arith.constant dense<0.000000e+00> : vector<16x32xf32>
    %134 = tpu.matmul %131, %133, %cst_43 {dimension_numbers = #tpu.dot_dimension_numbers<[1], [0], [0], [1], [0, 0, 1, 1], [], []>} : vector<16x32xf32>, vector<32x32xf32>, vector<16x32xf32> -> vector<16x32xf32>
    %135 = vector.extract_strided_slice %0 {offsets = [8, 0], sizes = [1, 32], strides = [1, 1]} : vector<30x32xf32> to vector<1x32xf32>
    %136 = vector.broadcast %135 : vector<1x32xf32> to vector<16x32xf32>
    %137 = arith.addf %134, %136 : vector<16x32xf32>
    %138 = arith.addf %123, %137 : vector<16x32xf32>
    %139 = vector.extract_strided_slice %0 {offsets = [9, 0], sizes = [1, 32], strides = [1, 1]} : vector<30x32xf32> to vector<1x32xf32>
    %140 = vector.extract_strided_slice %0 {offsets = [10, 0], sizes = [1, 32], strides = [1, 1]} : vector<30x32xf32> to vector<1x32xf32>
    %cst_44 = arith.constant dense<0.000000e+00> : vector<16xf32>
    %141 = vector.multi_reduction <add>, %138, %cst_44 [1] : vector<16x32xf32> to vector<16xf32>
    %142 = vector.shape_cast %141 : vector<16xf32> to vector<16x1xf32>
    %cst_45 = arith.constant 3.200000e+01 : f32
    %143 = vector.broadcast %cst_45 : f32 to vector<16x1xf32>
    %144 = arith.divf %142, %143 : vector<16x1xf32>
    %145 = vector.broadcast %144 : vector<16x1xf32> to vector<16x32xf32>
    %146 = arith.subf %138, %145 : vector<16x32xf32>
    %147 = arith.mulf %146, %146 : vector<16x32xf32>
    %cst_46 = arith.constant dense<0.000000e+00> : vector<16xf32>
    %148 = vector.multi_reduction <add>, %147, %cst_46 [1] : vector<16x32xf32> to vector<16xf32>
    %149 = vector.shape_cast %148 : vector<16xf32> to vector<16x1xf32>
    %cst_47 = arith.constant 3.200000e+01 : f32
    %150 = vector.broadcast %cst_47 : f32 to vector<16x1xf32>
    %151 = arith.divf %149, %150 : vector<16x1xf32>
    %cst_48 = arith.constant 9.99999974E-6 : f32
    %152 = vector.broadcast %cst_48 : f32 to vector<16x1xf32>
    %153 = arith.addf %151, %152 : vector<16x1xf32>
    %154 = math.rsqrt %153 : vector<16x1xf32>
    %155 = vector.broadcast %154 : vector<16x1xf32> to vector<16x32xf32>
    %156 = arith.mulf %146, %155 : vector<16x32xf32>
    %157 = vector.broadcast %139 : vector<1x32xf32> to vector<16x32xf32>
    %158 = arith.mulf %157, %156 : vector<16x32xf32>
    %159 = vector.broadcast %140 : vector<1x32xf32> to vector<16x32xf32>
    %160 = arith.addf %158, %159 : vector<16x32xf32>
    %c1 = arith.constant 1 : index
    %c0_49 = arith.constant 0 : index
    %c0_50 = arith.constant 0 : index
    %161 = vector.load %arg11[%c1, %c0_49, %c0_50] : memref<2x32x96xf32, #tpu.memory_space<vmem>>, vector<1x32x96xf32>
    %162 = vector.shape_cast %161 : vector<1x32x96xf32> to vector<32x96xf32>
    %cst_51 = arith.constant dense<0.000000e+00> : vector<16x96xf32>
    %163 = tpu.matmul %160, %162, %cst_51 {dimension_numbers = #tpu.dot_dimension_numbers<[1], [0], [0], [1], [0, 0, 1, 1], [], []>} : vector<16x32xf32>, vector<32x96xf32>, vector<16x96xf32> -> vector<16x96xf32>
    %c1_52 = arith.constant 1 : index
    %c0_53 = arith.constant 0 : index
    %c0_54 = arith.constant 0 : index
    %164 = vector.load %arg10[%c1_52, %c0_53, %c0_54] : memref<2x1x96xf32, #tpu.memory_space<vmem>>, vector<1x1x96xf32>
    %165 = vector.shape_cast %164 : vector<1x1x96xf32> to vector<1x96xf32>
    %166 = vector.broadcast %165 : vector<1x96xf32> to vector<16x96xf32>
    %167 = arith.addf %163, %166 : vector<16x96xf32>
    %168 = vector.extract_strided_slice %167 {offsets = [0, 0], sizes = [16, 32], strides = [1, 1]} : vector<16x96xf32> to vector<16x32xf32>
    %169 = vector.extract_strided_slice %168 {offsets = [0, 0], sizes = [16, 8], strides = [1, 1]} : vector<16x32xf32> to vector<16x8xf32>
    %170 = vector.shape_cast %169 : vector<16x8xf32> to vector<2x8x8xf32>
    %171 = vector.extract_strided_slice %168 {offsets = [0, 8], sizes = [16, 8], strides = [1, 1]} : vector<16x32xf32> to vector<16x8xf32>
    %172 = vector.shape_cast %171 : vector<16x8xf32> to vector<2x8x8xf32>
    %173 = vector.extract_strided_slice %168 {offsets = [0, 16], sizes = [16, 8], strides = [1, 1]} : vector<16x32xf32> to vector<16x8xf32>
    %174 = vector.shape_cast %173 : vector<16x8xf32> to vector<2x8x8xf32>
    %175 = vector.extract_strided_slice %168 {offsets = [0, 24], sizes = [16, 8], strides = [1, 1]} : vector<16x32xf32> to vector<16x8xf32>
    %176 = vector.shape_cast %175 : vector<16x8xf32> to vector<2x8x8xf32>
    %177 = tpu.concatenate %170, %172, %174, %176 in 0 : vector<2x8x8xf32>, vector<2x8x8xf32>, vector<2x8x8xf32>, vector<2x8x8xf32> -> vector<8x8x8xf32>
    %178 = vector.extract_strided_slice %167 {offsets = [0, 32], sizes = [16, 32], strides = [1, 1]} : vector<16x96xf32> to vector<16x32xf32>
    %179 = vector.extract_strided_slice %178 {offsets = [0, 0], sizes = [16, 8], strides = [1, 1]} : vector<16x32xf32> to vector<16x8xf32>
    %180 = vector.shape_cast %179 : vector<16x8xf32> to vector<2x8x8xf32>
    %181 = vector.extract_strided_slice %178 {offsets = [0, 8], sizes = [16, 8], strides = [1, 1]} : vector<16x32xf32> to vector<16x8xf32>
    %182 = vector.shape_cast %181 : vector<16x8xf32> to vector<2x8x8xf32>
    %183 = vector.extract_strided_slice %178 {offsets = [0, 16], sizes = [16, 8], strides = [1, 1]} : vector<16x32xf32> to vector<16x8xf32>
    %184 = vector.shape_cast %183 : vector<16x8xf32> to vector<2x8x8xf32>
    %185 = vector.extract_strided_slice %178 {offsets = [0, 24], sizes = [16, 8], strides = [1, 1]} : vector<16x32xf32> to vector<16x8xf32>
    %186 = vector.shape_cast %185 : vector<16x8xf32> to vector<2x8x8xf32>
    %187 = tpu.concatenate %180, %182, %184, %186 in 0 : vector<2x8x8xf32>, vector<2x8x8xf32>, vector<2x8x8xf32>, vector<2x8x8xf32> -> vector<8x8x8xf32>
    %188 = vector.extract_strided_slice %167 {offsets = [0, 64], sizes = [16, 32], strides = [1, 1]} : vector<16x96xf32> to vector<16x32xf32>
    %189 = vector.extract_strided_slice %188 {offsets = [0, 0], sizes = [16, 8], strides = [1, 1]} : vector<16x32xf32> to vector<16x8xf32>
    %190 = vector.shape_cast %189 : vector<16x8xf32> to vector<2x8x8xf32>
    %191 = vector.extract_strided_slice %188 {offsets = [0, 8], sizes = [16, 8], strides = [1, 1]} : vector<16x32xf32> to vector<16x8xf32>
    %192 = vector.shape_cast %191 : vector<16x8xf32> to vector<2x8x8xf32>
    %193 = vector.extract_strided_slice %188 {offsets = [0, 16], sizes = [16, 8], strides = [1, 1]} : vector<16x32xf32> to vector<16x8xf32>
    %194 = vector.shape_cast %193 : vector<16x8xf32> to vector<2x8x8xf32>
    %195 = vector.extract_strided_slice %188 {offsets = [0, 24], sizes = [16, 8], strides = [1, 1]} : vector<16x32xf32> to vector<16x8xf32>
    %196 = vector.shape_cast %195 : vector<16x8xf32> to vector<2x8x8xf32>
    %197 = tpu.concatenate %190, %192, %194, %196 in 0 : vector<2x8x8xf32>, vector<2x8x8xf32>, vector<2x8x8xf32>, vector<2x8x8xf32> -> vector<8x8x8xf32>
    "tpu.trace_start"() <{level = 10 : i32, message = "bqd,bkd->bqk"}> : () -> ()
    %cst_55 = arith.constant dense<0.000000e+00> : vector<8x8x8xf32>
    %198 = tpu.matmul %177, %187, %cst_55 {dimension_numbers = #tpu.dot_dimension_numbers<[2], [2], [1], [1], [0, 0, 0, 1, 1, 1], [0], [0]>} : vector<8x8x8xf32>, vector<8x8x8xf32>, vector<8x8x8xf32> -> vector<8x8x8xf32>
    "tpu.trace_stop"() : () -> ()
    %cst_56 = arith.constant dense<0xFF800000> : vector<8x8xf32>
    %199 = vector.multi_reduction <maximumf>, %198, %cst_56 [2] : vector<8x8x8xf32> to vector<8x8xf32>
    %200 = vector.shape_cast %199 : vector<8x8xf32> to vector<8x8x1xf32>
    %201 = vector.broadcast %200 : vector<8x8x1xf32> to vector<8x8x8xf32>
    %202 = arith.subf %198, %201 : vector<8x8x8xf32>
    %203 = math.exp %202 : vector<8x8x8xf32>
    %cst_57 = arith.constant dense<0.000000e+00> : vector<8x8xf32>
    %204 = vector.multi_reduction <add>, %203, %cst_57 [2] : vector<8x8x8xf32> to vector<8x8xf32>
    %205 = vector.shape_cast %204 : vector<8x8xf32> to vector<8x8x1xf32>
    %206 = vector.broadcast %205 : vector<8x8x1xf32> to vector<8x8x8xf32>
    %207 = arith.divf %203, %206 : vector<8x8x8xf32>
    "tpu.trace_start"() <{level = 10 : i32, message = "bqk,bkd->bqd"}> : () -> ()
    %cst_58 = arith.constant dense<0.000000e+00> : vector<8x8x8xf32>
    %208 = tpu.matmul %207, %197, %cst_58 {dimension_numbers = #tpu.dot_dimension_numbers<[2], [1], [1], [2], [0, 0, 0, 1, 1, 2], [0], [0]>} : vector<8x8x8xf32>, vector<8x8x8xf32>, vector<8x8x8xf32> -> vector<8x8x8xf32>
    "tpu.trace_stop"() : () -> ()
    %209 = vector.extract_strided_slice %208 {offsets = [0, 0, 0], sizes = [2, 8, 8], strides = [1, 1, 1]} : vector<8x8x8xf32> to vector<2x8x8xf32>
    %210 = vector.shape_cast %209 : vector<2x8x8xf32> to vector<16x8xf32>
    %211 = vector.extract_strided_slice %208 {offsets = [2, 0, 0], sizes = [2, 8, 8], strides = [1, 1, 1]} : vector<8x8x8xf32> to vector<2x8x8xf32>
    %212 = vector.shape_cast %211 : vector<2x8x8xf32> to vector<16x8xf32>
    %213 = vector.extract_strided_slice %208 {offsets = [4, 0, 0], sizes = [2, 8, 8], strides = [1, 1, 1]} : vector<8x8x8xf32> to vector<2x8x8xf32>
    %214 = vector.shape_cast %213 : vector<2x8x8xf32> to vector<16x8xf32>
    %215 = vector.extract_strided_slice %208 {offsets = [6, 0, 0], sizes = [2, 8, 8], strides = [1, 1, 1]} : vector<8x8x8xf32> to vector<2x8x8xf32>
    %216 = vector.shape_cast %215 : vector<2x8x8xf32> to vector<16x8xf32>
    %217 = tpu.concatenate %210, %212, %214, %216 in 1 : vector<16x8xf32>, vector<16x8xf32>, vector<16x8xf32>, vector<16x8xf32> -> vector<16x32xf32>
    %c1_59 = arith.constant 1 : index
    %c0_60 = arith.constant 0 : index
    %c0_61 = arith.constant 0 : index
    %218 = vector.load %arg9[%c1_59, %c0_60, %c0_61] : memref<2x32x32xf32, #tpu.memory_space<vmem>>, vector<1x32x32xf32>
    %219 = vector.shape_cast %218 : vector<1x32x32xf32> to vector<32x32xf32>
    %cst_62 = arith.constant dense<0.000000e+00> : vector<16x32xf32>
    %220 = tpu.matmul %217, %219, %cst_62 {dimension_numbers = #tpu.dot_dimension_numbers<[1], [0], [0], [1], [0, 0, 1, 1], [], []>} : vector<16x32xf32>, vector<32x32xf32>, vector<16x32xf32> -> vector<16x32xf32>
    %221 = vector.extract_strided_slice %0 {offsets = [11, 0], sizes = [1, 32], strides = [1, 1]} : vector<30x32xf32> to vector<1x32xf32>
    %222 = vector.broadcast %221 : vector<1x32xf32> to vector<16x32xf32>
    %223 = arith.addf %220, %222 : vector<16x32xf32>
    %224 = arith.addf %160, %223 : vector<16x32xf32>
    %225 = vector.extract_strided_slice %0 {offsets = [12, 0], sizes = [1, 32], strides = [1, 1]} : vector<30x32xf32> to vector<1x32xf32>
    %226 = vector.extract_strided_slice %0 {offsets = [13, 0], sizes = [1, 32], strides = [1, 1]} : vector<30x32xf32> to vector<1x32xf32>
    %cst_63 = arith.constant dense<0.000000e+00> : vector<16xf32>
    %227 = vector.multi_reduction <add>, %224, %cst_63 [1] : vector<16x32xf32> to vector<16xf32>
    %228 = vector.shape_cast %227 : vector<16xf32> to vector<16x1xf32>
    %cst_64 = arith.constant 3.200000e+01 : f32
    %229 = vector.broadcast %cst_64 : f32 to vector<16x1xf32>
    %230 = arith.divf %228, %229 : vector<16x1xf32>
    %231 = vector.broadcast %230 : vector<16x1xf32> to vector<16x32xf32>
    %232 = arith.subf %224, %231 : vector<16x32xf32>
    %233 = arith.mulf %232, %232 : vector<16x32xf32>
    %cst_65 = arith.constant dense<0.000000e+00> : vector<16xf32>
    %234 = vector.multi_reduction <add>, %233, %cst_65 [1] : vector<16x32xf32> to vector<16xf32>
    %235 = vector.shape_cast %234 : vector<16xf32> to vector<16x1xf32>
    %cst_66 = arith.constant 3.200000e+01 : f32
    %236 = vector.broadcast %cst_66 : f32 to vector<16x1xf32>
    %237 = arith.divf %235, %236 : vector<16x1xf32>
    %cst_67 = arith.constant 9.99999974E-6 : f32
    %238 = vector.broadcast %cst_67 : f32 to vector<16x1xf32>
    %239 = arith.addf %237, %238 : vector<16x1xf32>
    %240 = math.rsqrt %239 : vector<16x1xf32>
    %241 = vector.broadcast %240 : vector<16x1xf32> to vector<16x32xf32>
    %242 = arith.mulf %232, %241 : vector<16x32xf32>
    %243 = vector.broadcast %225 : vector<1x32xf32> to vector<16x32xf32>
    %244 = arith.mulf %243, %242 : vector<16x32xf32>
    %245 = vector.broadcast %226 : vector<1x32xf32> to vector<16x32xf32>
    %246 = arith.addf %244, %245 : vector<16x32xf32>
    %c1_68 = arith.constant 1 : index
    %c0_69 = arith.constant 0 : index
    %c0_70 = arith.constant 0 : index
    %247 = vector.load %arg1[%c1_68, %c0_69, %c0_70] : memref<2x32x32xf32, #tpu.memory_space<vmem>>, vector<1x32x32xf32>
    %248 = vector.shape_cast %247 : vector<1x32x32xf32> to vector<32x32xf32>
    %cst_71 = arith.constant dense<0.000000e+00> : vector<16x32xf32>
    %249 = tpu.matmul %246, %248, %cst_71 {dimension_numbers = #tpu.dot_dimension_numbers<[1], [0], [0], [1], [0, 0, 1, 1], [], []>} : vector<16x32xf32>, vector<32x32xf32>, vector<16x32xf32> -> vector<16x32xf32>
    %250 = vector.extract_strided_slice %0 {offsets = [14, 0], sizes = [1, 32], strides = [1, 1]} : vector<30x32xf32> to vector<1x32xf32>
    %251 = vector.broadcast %250 : vector<1x32xf32> to vector<16x32xf32>
    %252 = arith.addf %249, %251 : vector<16x32xf32>
    %cst_72 = arith.constant 0.000000e+00 : f32
    %253 = vector.broadcast %cst_72 : f32 to vector<16x32xf32>
    %254 = arith.maximumf %252, %253 : vector<16x32xf32>
    %c1_73 = arith.constant 1 : index
    %c0_74 = arith.constant 0 : index
    %c0_75 = arith.constant 0 : index
    %255 = vector.load %arg2[%c1_73, %c0_74, %c0_75] : memref<2x32x32xf32, #tpu.memory_space<vmem>>, vector<1x32x32xf32>
    %256 = vector.shape_cast %255 : vector<1x32x32xf32> to vector<32x32xf32>
    %cst_76 = arith.constant dense<0.000000e+00> : vector<16x32xf32>
    %257 = tpu.matmul %254, %256, %cst_76 {dimension_numbers = #tpu.dot_dimension_numbers<[1], [0], [0], [1], [0, 0, 1, 1], [], []>} : vector<16x32xf32>, vector<32x32xf32>, vector<16x32xf32> -> vector<16x32xf32>
    %258 = vector.extract_strided_slice %0 {offsets = [15, 0], sizes = [1, 32], strides = [1, 1]} : vector<30x32xf32> to vector<1x32xf32>
    %259 = vector.broadcast %258 : vector<1x32xf32> to vector<16x32xf32>
    %260 = arith.addf %257, %259 : vector<16x32xf32>
    %261 = arith.addf %246, %260 : vector<16x32xf32>
    %262 = vector.extract_strided_slice %0 {offsets = [16, 0], sizes = [1, 32], strides = [1, 1]} : vector<30x32xf32> to vector<1x32xf32>
    %263 = vector.extract_strided_slice %0 {offsets = [17, 0], sizes = [1, 32], strides = [1, 1]} : vector<30x32xf32> to vector<1x32xf32>
    %cst_77 = arith.constant dense<0.000000e+00> : vector<16xf32>
    %264 = vector.multi_reduction <add>, %261, %cst_77 [1] : vector<16x32xf32> to vector<16xf32>
    %265 = vector.shape_cast %264 : vector<16xf32> to vector<16x1xf32>
    %cst_78 = arith.constant 3.200000e+01 : f32
    %266 = vector.broadcast %cst_78 : f32 to vector<16x1xf32>
    %267 = arith.divf %265, %266 : vector<16x1xf32>
    %268 = vector.broadcast %267 : vector<16x1xf32> to vector<16x32xf32>
    %269 = arith.subf %261, %268 : vector<16x32xf32>
    %270 = arith.mulf %269, %269 : vector<16x32xf32>
    %cst_79 = arith.constant dense<0.000000e+00> : vector<16xf32>
    %271 = vector.multi_reduction <add>, %270, %cst_79 [1] : vector<16x32xf32> to vector<16xf32>
    %272 = vector.shape_cast %271 : vector<16xf32> to vector<16x1xf32>
    %cst_80 = arith.constant 3.200000e+01 : f32
    %273 = vector.broadcast %cst_80 : f32 to vector<16x1xf32>
    %274 = arith.divf %272, %273 : vector<16x1xf32>
    %cst_81 = arith.constant 9.99999974E-6 : f32
    %275 = vector.broadcast %cst_81 : f32 to vector<16x1xf32>
    %276 = arith.addf %274, %275 : vector<16x1xf32>
    %277 = math.rsqrt %276 : vector<16x1xf32>
    %278 = vector.broadcast %277 : vector<16x1xf32> to vector<16x32xf32>
    %279 = arith.mulf %269, %278 : vector<16x32xf32>
    %280 = vector.broadcast %262 : vector<1x32xf32> to vector<16x32xf32>
    %281 = arith.mulf %280, %279 : vector<16x32xf32>
    %282 = vector.broadcast %263 : vector<1x32xf32> to vector<16x32xf32>
    %283 = arith.addf %281, %282 : vector<16x32xf32>
    %284 = arith.addf %283, %37 : vector<16x32xf32>
    %c0_82 = arith.constant 0 : index
    %c0_83 = arith.constant 0 : index
    %c0_84 = arith.constant 0 : index
    %285 = vector.load %arg7[%c0_82, %c0_83, %c0_84] : memref<2x32x128xf32, #tpu.memory_space<vmem>>, vector<1x32x128xf32>
    %286 = vector.shape_cast %285 : vector<1x32x128xf32> to vector<32x128xf32>
    %cst_85 = arith.constant dense<0.000000e+00> : vector<16x128xf32>
    %287 = tpu.matmul %284, %286, %cst_85 {dimension_numbers = #tpu.dot_dimension_numbers<[1], [0], [0], [1], [0, 0, 1, 1], [], []>} : vector<16x32xf32>, vector<32x128xf32>, vector<16x128xf32> -> vector<16x128xf32>
    %c0_86 = arith.constant 0 : index
    %c0_87 = arith.constant 0 : index
    %c0_88 = arith.constant 0 : index
    %288 = vector.load %arg5[%c0_86, %c0_87, %c0_88] : memref<2x1x128xf32, #tpu.memory_space<vmem>>, vector<1x1x128xf32>
    %289 = vector.shape_cast %288 : vector<1x1x128xf32> to vector<1x128xf32>
    %290 = vector.broadcast %289 : vector<1x128xf32> to vector<16x128xf32>
    %291 = arith.addf %287, %290 : vector<16x128xf32>
    %292 = vector.shape_cast %291 : vector<16x128xf32> to vector<2x8x128xf32>
    %c0_89 = arith.constant 0 : index
    %c0_90 = arith.constant 0 : index
    %c0_91 = arith.constant 0 : index
    %293 = vector.load %arg6[%c0_89, %c0_90, %c0_91] : memref<2x32x128xf32, #tpu.memory_space<vmem>>, vector<1x32x128xf32>
    %294 = vector.shape_cast %293 : vector<1x32x128xf32> to vector<32x128xf32>
    %cst_92 = arith.constant 0.000000e+00 : f32
    %295 = vector.broadcast %cst_92 : f32 to vector<2x32xf32>
    %cst_93 = arith.constant 0.000000e+00 : f32
    %296 = vector.broadcast %cst_93 : f32 to vector<2x32xf32>
    %297 = vector.extract_strided_slice %292 {offsets = [0, 0, 0], sizes = [2, 1, 128], strides = [1, 1, 1]} : vector<2x8x128xf32> to vector<2x1x128xf32>
    %298 = vector.shape_cast %297 : vector<2x1x128xf32> to vector<2x128xf32>
    %cst_94 = arith.constant dense<0.000000e+00> : vector<2x128xf32>
    %299 = tpu.matmul %295, %294, %cst_94 {dimension_numbers = #tpu.dot_dimension_numbers<[1], [0], [0], [1], [0, 0, 1, 1], [], []>} : vector<2x32xf32>, vector<32x128xf32>, vector<2x128xf32> -> vector<2x128xf32>
    %300 = arith.addf %298, %299 : vector<2x128xf32>
    %301 = vector.extract_strided_slice %300 {offsets = [0, 0], sizes = [2, 32], strides = [1, 1]} : vector<2x128xf32> to vector<2x32xf32>
    %302 = arith.negf %301 : vector<2x32xf32>
    %303 = math.exp %302 : vector<2x32xf32>
    %cst_95 = arith.constant 1.000000e+00 : f32
    %304 = vector.broadcast %cst_95 : f32 to vector<2x32xf32>
    %305 = arith.addf %304, %303 : vector<2x32xf32>
    %306 = arith.divf %304, %305 : vector<2x32xf32>
    %307 = vector.extract_strided_slice %300 {offsets = [0, 32], sizes = [2, 32], strides = [1, 1]} : vector<2x128xf32> to vector<2x32xf32>
    %308 = arith.negf %307 : vector<2x32xf32>
    %309 = math.exp %308 : vector<2x32xf32>
    %cst_96 = arith.constant 1.000000e+00 : f32
    %310 = vector.broadcast %cst_96 : f32 to vector<2x32xf32>
    %311 = arith.addf %310, %309 : vector<2x32xf32>
    %312 = arith.divf %310, %311 : vector<2x32xf32>
    %313 = vector.extract_strided_slice %300 {offsets = [0, 64], sizes = [2, 32], strides = [1, 1]} : vector<2x128xf32> to vector<2x32xf32>
    %314 = math.tanh %313 : vector<2x32xf32>
    %315 = vector.extract_strided_slice %300 {offsets = [0, 96], sizes = [2, 32], strides = [1, 1]} : vector<2x128xf32> to vector<2x32xf32>
    %316 = arith.negf %315 : vector<2x32xf32>
    %317 = math.exp %316 : vector<2x32xf32>
    %cst_97 = arith.constant 1.000000e+00 : f32
    %318 = vector.broadcast %cst_97 : f32 to vector<2x32xf32>
    %319 = arith.addf %318, %317 : vector<2x32xf32>
    %320 = arith.divf %318, %319 : vector<2x32xf32>
    %321 = arith.mulf %312, %296 : vector<2x32xf32>
    %322 = arith.mulf %306, %314 : vector<2x32xf32>
    %323 = arith.addf %321, %322 : vector<2x32xf32>
    %324 = math.tanh %323 : vector<2x32xf32>
    %325 = arith.mulf %320, %324 : vector<2x32xf32>
    %326 = vector.extract_strided_slice %292 {offsets = [0, 1, 0], sizes = [2, 1, 128], strides = [1, 1, 1]} : vector<2x8x128xf32> to vector<2x1x128xf32>
    %327 = vector.shape_cast %326 : vector<2x1x128xf32> to vector<2x128xf32>
    %cst_98 = arith.constant dense<0.000000e+00> : vector<2x128xf32>
    %328 = tpu.matmul %325, %294, %cst_98 {dimension_numbers = #tpu.dot_dimension_numbers<[1], [0], [0], [1], [0, 0, 1, 1], [], []>} : vector<2x32xf32>, vector<32x128xf32>, vector<2x128xf32> -> vector<2x128xf32>
    %329 = arith.addf %327, %328 : vector<2x128xf32>
    %330 = vector.extract_strided_slice %329 {offsets = [0, 0], sizes = [2, 32], strides = [1, 1]} : vector<2x128xf32> to vector<2x32xf32>
    %331 = arith.negf %330 : vector<2x32xf32>
    %332 = math.exp %331 : vector<2x32xf32>
    %cst_99 = arith.constant 1.000000e+00 : f32
    %333 = vector.broadcast %cst_99 : f32 to vector<2x32xf32>
    %334 = arith.addf %333, %332 : vector<2x32xf32>
    %335 = arith.divf %333, %334 : vector<2x32xf32>
    %336 = vector.extract_strided_slice %329 {offsets = [0, 32], sizes = [2, 32], strides = [1, 1]} : vector<2x128xf32> to vector<2x32xf32>
    %337 = arith.negf %336 : vector<2x32xf32>
    %338 = math.exp %337 : vector<2x32xf32>
    %cst_100 = arith.constant 1.000000e+00 : f32
    %339 = vector.broadcast %cst_100 : f32 to vector<2x32xf32>
    %340 = arith.addf %339, %338 : vector<2x32xf32>
    %341 = arith.divf %339, %340 : vector<2x32xf32>
    %342 = vector.extract_strided_slice %329 {offsets = [0, 64], sizes = [2, 32], strides = [1, 1]} : vector<2x128xf32> to vector<2x32xf32>
    %343 = math.tanh %342 : vector<2x32xf32>
    %344 = vector.extract_strided_slice %329 {offsets = [0, 96], sizes = [2, 32], strides = [1, 1]} : vector<2x128xf32> to vector<2x32xf32>
    %345 = arith.negf %344 : vector<2x32xf32>
    %346 = math.exp %345 : vector<2x32xf32>
    %cst_101 = arith.constant 1.000000e+00 : f32
    %347 = vector.broadcast %cst_101 : f32 to vector<2x32xf32>
    %348 = arith.addf %347, %346 : vector<2x32xf32>
    %349 = arith.divf %347, %348 : vector<2x32xf32>
    %350 = arith.mulf %341, %323 : vector<2x32xf32>
    %351 = arith.mulf %335, %343 : vector<2x32xf32>
    %352 = arith.addf %350, %351 : vector<2x32xf32>
    %353 = math.tanh %352 : vector<2x32xf32>
    %354 = arith.mulf %349, %353 : vector<2x32xf32>
    %355 = vector.extract_strided_slice %292 {offsets = [0, 2, 0], sizes = [2, 1, 128], strides = [1, 1, 1]} : vector<2x8x128xf32> to vector<2x1x128xf32>
    %356 = vector.shape_cast %355 : vector<2x1x128xf32> to vector<2x128xf32>
    %cst_102 = arith.constant dense<0.000000e+00> : vector<2x128xf32>
    %357 = tpu.matmul %354, %294, %cst_102 {dimension_numbers = #tpu.dot_dimension_numbers<[1], [0], [0], [1], [0, 0, 1, 1], [], []>} : vector<2x32xf32>, vector<32x128xf32>, vector<2x128xf32> -> vector<2x128xf32>
    %358 = arith.addf %356, %357 : vector<2x128xf32>
    %359 = vector.extract_strided_slice %358 {offsets = [0, 0], sizes = [2, 32], strides = [1, 1]} : vector<2x128xf32> to vector<2x32xf32>
    %360 = arith.negf %359 : vector<2x32xf32>
    %361 = math.exp %360 : vector<2x32xf32>
    %cst_103 = arith.constant 1.000000e+00 : f32
    %362 = vector.broadcast %cst_103 : f32 to vector<2x32xf32>
    %363 = arith.addf %362, %361 : vector<2x32xf32>
    %364 = arith.divf %362, %363 : vector<2x32xf32>
    %365 = vector.extract_strided_slice %358 {offsets = [0, 32], sizes = [2, 32], strides = [1, 1]} : vector<2x128xf32> to vector<2x32xf32>
    %366 = arith.negf %365 : vector<2x32xf32>
    %367 = math.exp %366 : vector<2x32xf32>
    %cst_104 = arith.constant 1.000000e+00 : f32
    %368 = vector.broadcast %cst_104 : f32 to vector<2x32xf32>
    %369 = arith.addf %368, %367 : vector<2x32xf32>
    %370 = arith.divf %368, %369 : vector<2x32xf32>
    %371 = vector.extract_strided_slice %358 {offsets = [0, 64], sizes = [2, 32], strides = [1, 1]} : vector<2x128xf32> to vector<2x32xf32>
    %372 = math.tanh %371 : vector<2x32xf32>
    %373 = vector.extract_strided_slice %358 {offsets = [0, 96], sizes = [2, 32], strides = [1, 1]} : vector<2x128xf32> to vector<2x32xf32>
    %374 = arith.negf %373 : vector<2x32xf32>
    %375 = math.exp %374 : vector<2x32xf32>
    %cst_105 = arith.constant 1.000000e+00 : f32
    %376 = vector.broadcast %cst_105 : f32 to vector<2x32xf32>
    %377 = arith.addf %376, %375 : vector<2x32xf32>
    %378 = arith.divf %376, %377 : vector<2x32xf32>
    %379 = arith.mulf %370, %352 : vector<2x32xf32>
    %380 = arith.mulf %364, %372 : vector<2x32xf32>
    %381 = arith.addf %379, %380 : vector<2x32xf32>
    %382 = math.tanh %381 : vector<2x32xf32>
    %383 = arith.mulf %378, %382 : vector<2x32xf32>
    %384 = vector.extract_strided_slice %292 {offsets = [0, 3, 0], sizes = [2, 1, 128], strides = [1, 1, 1]} : vector<2x8x128xf32> to vector<2x1x128xf32>
    %385 = vector.shape_cast %384 : vector<2x1x128xf32> to vector<2x128xf32>
    %cst_106 = arith.constant dense<0.000000e+00> : vector<2x128xf32>
    %386 = tpu.matmul %383, %294, %cst_106 {dimension_numbers = #tpu.dot_dimension_numbers<[1], [0], [0], [1], [0, 0, 1, 1], [], []>} : vector<2x32xf32>, vector<32x128xf32>, vector<2x128xf32> -> vector<2x128xf32>
    %387 = arith.addf %385, %386 : vector<2x128xf32>
    %388 = vector.extract_strided_slice %387 {offsets = [0, 0], sizes = [2, 32], strides = [1, 1]} : vector<2x128xf32> to vector<2x32xf32>
    %389 = arith.negf %388 : vector<2x32xf32>
    %390 = math.exp %389 : vector<2x32xf32>
    %cst_107 = arith.constant 1.000000e+00 : f32
    %391 = vector.broadcast %cst_107 : f32 to vector<2x32xf32>
    %392 = arith.addf %391, %390 : vector<2x32xf32>
    %393 = arith.divf %391, %392 : vector<2x32xf32>
    %394 = vector.extract_strided_slice %387 {offsets = [0, 32], sizes = [2, 32], strides = [1, 1]} : vector<2x128xf32> to vector<2x32xf32>
    %395 = arith.negf %394 : vector<2x32xf32>
    %396 = math.exp %395 : vector<2x32xf32>
    %cst_108 = arith.constant 1.000000e+00 : f32
    %397 = vector.broadcast %cst_108 : f32 to vector<2x32xf32>
    %398 = arith.addf %397, %396 : vector<2x32xf32>
    %399 = arith.divf %397, %398 : vector<2x32xf32>
    %400 = vector.extract_strided_slice %387 {offsets = [0, 64], sizes = [2, 32], strides = [1, 1]} : vector<2x128xf32> to vector<2x32xf32>
    %401 = math.tanh %400 : vector<2x32xf32>
    %402 = vector.extract_strided_slice %387 {offsets = [0, 96], sizes = [2, 32], strides = [1, 1]} : vector<2x128xf32> to vector<2x32xf32>
    %403 = arith.negf %402 : vector<2x32xf32>
    %404 = math.exp %403 : vector<2x32xf32>
    %cst_109 = arith.constant 1.000000e+00 : f32
    %405 = vector.broadcast %cst_109 : f32 to vector<2x32xf32>
    %406 = arith.addf %405, %404 : vector<2x32xf32>
    %407 = arith.divf %405, %406 : vector<2x32xf32>
    %408 = arith.mulf %399, %381 : vector<2x32xf32>
    %409 = arith.mulf %393, %401 : vector<2x32xf32>
    %410 = arith.addf %408, %409 : vector<2x32xf32>
    %411 = math.tanh %410 : vector<2x32xf32>
    %412 = arith.mulf %407, %411 : vector<2x32xf32>
    %413 = vector.extract_strided_slice %292 {offsets = [0, 4, 0], sizes = [2, 1, 128], strides = [1, 1, 1]} : vector<2x8x128xf32> to vector<2x1x128xf32>
    %414 = vector.shape_cast %413 : vector<2x1x128xf32> to vector<2x128xf32>
    %cst_110 = arith.constant dense<0.000000e+00> : vector<2x128xf32>
    %415 = tpu.matmul %412, %294, %cst_110 {dimension_numbers = #tpu.dot_dimension_numbers<[1], [0], [0], [1], [0, 0, 1, 1], [], []>} : vector<2x32xf32>, vector<32x128xf32>, vector<2x128xf32> -> vector<2x128xf32>
    %416 = arith.addf %414, %415 : vector<2x128xf32>
    %417 = vector.extract_strided_slice %416 {offsets = [0, 0], sizes = [2, 32], strides = [1, 1]} : vector<2x128xf32> to vector<2x32xf32>
    %418 = arith.negf %417 : vector<2x32xf32>
    %419 = math.exp %418 : vector<2x32xf32>
    %cst_111 = arith.constant 1.000000e+00 : f32
    %420 = vector.broadcast %cst_111 : f32 to vector<2x32xf32>
    %421 = arith.addf %420, %419 : vector<2x32xf32>
    %422 = arith.divf %420, %421 : vector<2x32xf32>
    %423 = vector.extract_strided_slice %416 {offsets = [0, 32], sizes = [2, 32], strides = [1, 1]} : vector<2x128xf32> to vector<2x32xf32>
    %424 = arith.negf %423 : vector<2x32xf32>
    %425 = math.exp %424 : vector<2x32xf32>
    %cst_112 = arith.constant 1.000000e+00 : f32
    %426 = vector.broadcast %cst_112 : f32 to vector<2x32xf32>
    %427 = arith.addf %426, %425 : vector<2x32xf32>
    %428 = arith.divf %426, %427 : vector<2x32xf32>
    %429 = vector.extract_strided_slice %416 {offsets = [0, 64], sizes = [2, 32], strides = [1, 1]} : vector<2x128xf32> to vector<2x32xf32>
    %430 = math.tanh %429 : vector<2x32xf32>
    %431 = vector.extract_strided_slice %416 {offsets = [0, 96], sizes = [2, 32], strides = [1, 1]} : vector<2x128xf32> to vector<2x32xf32>
    %432 = arith.negf %431 : vector<2x32xf32>
    %433 = math.exp %432 : vector<2x32xf32>
    %cst_113 = arith.constant 1.000000e+00 : f32
    %434 = vector.broadcast %cst_113 : f32 to vector<2x32xf32>
    %435 = arith.addf %434, %433 : vector<2x32xf32>
    %436 = arith.divf %434, %435 : vector<2x32xf32>
    %437 = arith.mulf %428, %410 : vector<2x32xf32>
    %438 = arith.mulf %422, %430 : vector<2x32xf32>
    %439 = arith.addf %437, %438 : vector<2x32xf32>
    %440 = math.tanh %439 : vector<2x32xf32>
    %441 = arith.mulf %436, %440 : vector<2x32xf32>
    %442 = vector.extract_strided_slice %292 {offsets = [0, 5, 0], sizes = [2, 1, 128], strides = [1, 1, 1]} : vector<2x8x128xf32> to vector<2x1x128xf32>
    %443 = vector.shape_cast %442 : vector<2x1x128xf32> to vector<2x128xf32>
    %cst_114 = arith.constant dense<0.000000e+00> : vector<2x128xf32>
    %444 = tpu.matmul %441, %294, %cst_114 {dimension_numbers = #tpu.dot_dimension_numbers<[1], [0], [0], [1], [0, 0, 1, 1], [], []>} : vector<2x32xf32>, vector<32x128xf32>, vector<2x128xf32> -> vector<2x128xf32>
    %445 = arith.addf %443, %444 : vector<2x128xf32>
    %446 = vector.extract_strided_slice %445 {offsets = [0, 0], sizes = [2, 32], strides = [1, 1]} : vector<2x128xf32> to vector<2x32xf32>
    %447 = arith.negf %446 : vector<2x32xf32>
    %448 = math.exp %447 : vector<2x32xf32>
    %cst_115 = arith.constant 1.000000e+00 : f32
    %449 = vector.broadcast %cst_115 : f32 to vector<2x32xf32>
    %450 = arith.addf %449, %448 : vector<2x32xf32>
    %451 = arith.divf %449, %450 : vector<2x32xf32>
    %452 = vector.extract_strided_slice %445 {offsets = [0, 32], sizes = [2, 32], strides = [1, 1]} : vector<2x128xf32> to vector<2x32xf32>
    %453 = arith.negf %452 : vector<2x32xf32>
    %454 = math.exp %453 : vector<2x32xf32>
    %cst_116 = arith.constant 1.000000e+00 : f32
    %455 = vector.broadcast %cst_116 : f32 to vector<2x32xf32>
    %456 = arith.addf %455, %454 : vector<2x32xf32>
    %457 = arith.divf %455, %456 : vector<2x32xf32>
    %458 = vector.extract_strided_slice %445 {offsets = [0, 64], sizes = [2, 32], strides = [1, 1]} : vector<2x128xf32> to vector<2x32xf32>
    %459 = math.tanh %458 : vector<2x32xf32>
    %460 = vector.extract_strided_slice %445 {offsets = [0, 96], sizes = [2, 32], strides = [1, 1]} : vector<2x128xf32> to vector<2x32xf32>
    %461 = arith.negf %460 : vector<2x32xf32>
    %462 = math.exp %461 : vector<2x32xf32>
    %cst_117 = arith.constant 1.000000e+00 : f32
    %463 = vector.broadcast %cst_117 : f32 to vector<2x32xf32>
    %464 = arith.addf %463, %462 : vector<2x32xf32>
    %465 = arith.divf %463, %464 : vector<2x32xf32>
    %466 = arith.mulf %457, %439 : vector<2x32xf32>
    %467 = arith.mulf %451, %459 : vector<2x32xf32>
    %468 = arith.addf %466, %467 : vector<2x32xf32>
    %469 = math.tanh %468 : vector<2x32xf32>
    %470 = arith.mulf %465, %469 : vector<2x32xf32>
    %471 = vector.extract_strided_slice %292 {offsets = [0, 6, 0], sizes = [2, 1, 128], strides = [1, 1, 1]} : vector<2x8x128xf32> to vector<2x1x128xf32>
    %472 = vector.shape_cast %471 : vector<2x1x128xf32> to vector<2x128xf32>
    %cst_118 = arith.constant dense<0.000000e+00> : vector<2x128xf32>
    %473 = tpu.matmul %470, %294, %cst_118 {dimension_numbers = #tpu.dot_dimension_numbers<[1], [0], [0], [1], [0, 0, 1, 1], [], []>} : vector<2x32xf32>, vector<32x128xf32>, vector<2x128xf32> -> vector<2x128xf32>
    %474 = arith.addf %472, %473 : vector<2x128xf32>
    %475 = vector.extract_strided_slice %474 {offsets = [0, 0], sizes = [2, 32], strides = [1, 1]} : vector<2x128xf32> to vector<2x32xf32>
    %476 = arith.negf %475 : vector<2x32xf32>
    %477 = math.exp %476 : vector<2x32xf32>
    %cst_119 = arith.constant 1.000000e+00 : f32
    %478 = vector.broadcast %cst_119 : f32 to vector<2x32xf32>
    %479 = arith.addf %478, %477 : vector<2x32xf32>
    %480 = arith.divf %478, %479 : vector<2x32xf32>
    %481 = vector.extract_strided_slice %474 {offsets = [0, 32], sizes = [2, 32], strides = [1, 1]} : vector<2x128xf32> to vector<2x32xf32>
    %482 = arith.negf %481 : vector<2x32xf32>
    %483 = math.exp %482 : vector<2x32xf32>
    %cst_120 = arith.constant 1.000000e+00 : f32
    %484 = vector.broadcast %cst_120 : f32 to vector<2x32xf32>
    %485 = arith.addf %484, %483 : vector<2x32xf32>
    %486 = arith.divf %484, %485 : vector<2x32xf32>
    %487 = vector.extract_strided_slice %474 {offsets = [0, 64], sizes = [2, 32], strides = [1, 1]} : vector<2x128xf32> to vector<2x32xf32>
    %488 = math.tanh %487 : vector<2x32xf32>
    %489 = vector.extract_strided_slice %474 {offsets = [0, 96], sizes = [2, 32], strides = [1, 1]} : vector<2x128xf32> to vector<2x32xf32>
    %490 = arith.negf %489 : vector<2x32xf32>
    %491 = math.exp %490 : vector<2x32xf32>
    %cst_121 = arith.constant 1.000000e+00 : f32
    %492 = vector.broadcast %cst_121 : f32 to vector<2x32xf32>
    %493 = arith.addf %492, %491 : vector<2x32xf32>
    %494 = arith.divf %492, %493 : vector<2x32xf32>
    %495 = arith.mulf %486, %468 : vector<2x32xf32>
    %496 = arith.mulf %480, %488 : vector<2x32xf32>
    %497 = arith.addf %495, %496 : vector<2x32xf32>
    %498 = math.tanh %497 : vector<2x32xf32>
    %499 = arith.mulf %494, %498 : vector<2x32xf32>
    %500 = vector.extract_strided_slice %292 {offsets = [0, 7, 0], sizes = [2, 1, 128], strides = [1, 1, 1]} : vector<2x8x128xf32> to vector<2x1x128xf32>
    %501 = vector.shape_cast %500 : vector<2x1x128xf32> to vector<2x128xf32>
    %cst_122 = arith.constant dense<0.000000e+00> : vector<2x128xf32>
    %502 = tpu.matmul %499, %294, %cst_122 {dimension_numbers = #tpu.dot_dimension_numbers<[1], [0], [0], [1], [0, 0, 1, 1], [], []>} : vector<2x32xf32>, vector<32x128xf32>, vector<2x128xf32> -> vector<2x128xf32>
    %503 = arith.addf %501, %502 : vector<2x128xf32>
    %504 = vector.extract_strided_slice %503 {offsets = [0, 0], sizes = [2, 32], strides = [1, 1]} : vector<2x128xf32> to vector<2x32xf32>
    %505 = arith.negf %504 : vector<2x32xf32>
    %506 = math.exp %505 : vector<2x32xf32>
    %cst_123 = arith.constant 1.000000e+00 : f32
    %507 = vector.broadcast %cst_123 : f32 to vector<2x32xf32>
    %508 = arith.addf %507, %506 : vector<2x32xf32>
    %509 = arith.divf %507, %508 : vector<2x32xf32>
    %510 = vector.extract_strided_slice %503 {offsets = [0, 32], sizes = [2, 32], strides = [1, 1]} : vector<2x128xf32> to vector<2x32xf32>
    %511 = arith.negf %510 : vector<2x32xf32>
    %512 = math.exp %511 : vector<2x32xf32>
    %cst_124 = arith.constant 1.000000e+00 : f32
    %513 = vector.broadcast %cst_124 : f32 to vector<2x32xf32>
    %514 = arith.addf %513, %512 : vector<2x32xf32>
    %515 = arith.divf %513, %514 : vector<2x32xf32>
    %516 = vector.extract_strided_slice %503 {offsets = [0, 64], sizes = [2, 32], strides = [1, 1]} : vector<2x128xf32> to vector<2x32xf32>
    %517 = math.tanh %516 : vector<2x32xf32>
    %518 = vector.extract_strided_slice %503 {offsets = [0, 96], sizes = [2, 32], strides = [1, 1]} : vector<2x128xf32> to vector<2x32xf32>
    %519 = arith.negf %518 : vector<2x32xf32>
    %520 = math.exp %519 : vector<2x32xf32>
    %cst_125 = arith.constant 1.000000e+00 : f32
    %521 = vector.broadcast %cst_125 : f32 to vector<2x32xf32>
    %522 = arith.addf %521, %520 : vector<2x32xf32>
    %523 = arith.divf %521, %522 : vector<2x32xf32>
    %524 = arith.mulf %515, %497 : vector<2x32xf32>
    %525 = arith.mulf %509, %517 : vector<2x32xf32>
    %526 = arith.addf %524, %525 : vector<2x32xf32>
    %527 = math.tanh %526 : vector<2x32xf32>
    %528 = arith.mulf %523, %527 : vector<2x32xf32>
    %c1_126 = arith.constant 1 : index
    %c0_127 = arith.constant 0 : index
    %c0_128 = arith.constant 0 : index
    %529 = vector.load %arg8[%c1_126, %c0_127, %c0_128] : memref<5x32x32xf32, #tpu.memory_space<vmem>>, vector<1x32x32xf32>
    %530 = vector.shape_cast %529 : vector<1x32x32xf32> to vector<32x32xf32>
    %cst_129 = arith.constant dense<0.000000e+00> : vector<2x32xf32>
    %531 = tpu.matmul %528, %530, %cst_129 {dimension_numbers = #tpu.dot_dimension_numbers<[1], [0], [0], [1], [0, 0, 1, 1], [], []>} : vector<2x32xf32>, vector<32x32xf32>, vector<2x32xf32> -> vector<2x32xf32>
    %532 = vector.extract_strided_slice %0 {offsets = [18, 0], sizes = [1, 32], strides = [1, 1]} : vector<30x32xf32> to vector<1x32xf32>
    %533 = vector.broadcast %532 : vector<1x32xf32> to vector<2x32xf32>
    %534 = arith.addf %531, %533 : vector<2x32xf32>
    %535 = vector.extract_strided_slice %0 {offsets = [19, 0], sizes = [1, 32], strides = [1, 1]} : vector<30x32xf32> to vector<1x32xf32>
    %536 = vector.extract_strided_slice %0 {offsets = [20, 0], sizes = [1, 32], strides = [1, 1]} : vector<30x32xf32> to vector<1x32xf32>
    %cst_130 = arith.constant dense<0.000000e+00> : vector<2xf32>
    %537 = vector.multi_reduction <add>, %534, %cst_130 [1] : vector<2x32xf32> to vector<2xf32>
    %538 = vector.shape_cast %537 : vector<2xf32> to vector<2x1xf32>
    %cst_131 = arith.constant 3.200000e+01 : f32
    %539 = vector.broadcast %cst_131 : f32 to vector<2x1xf32>
    %540 = arith.divf %538, %539 : vector<2x1xf32>
    %541 = vector.broadcast %540 : vector<2x1xf32> to vector<2x32xf32>
    %542 = arith.subf %534, %541 : vector<2x32xf32>
    %543 = arith.mulf %542, %542 : vector<2x32xf32>
    %cst_132 = arith.constant dense<0.000000e+00> : vector<2xf32>
    %544 = vector.multi_reduction <add>, %543, %cst_132 [1] : vector<2x32xf32> to vector<2xf32>
    %545 = vector.shape_cast %544 : vector<2xf32> to vector<2x1xf32>
    %cst_133 = arith.constant 3.200000e+01 : f32
    %546 = vector.broadcast %cst_133 : f32 to vector<2x1xf32>
    %547 = arith.divf %545, %546 : vector<2x1xf32>
    %cst_134 = arith.constant 9.99999974E-6 : f32
    %548 = vector.broadcast %cst_134 : f32 to vector<2x1xf32>
    %549 = arith.addf %547, %548 : vector<2x1xf32>
    %550 = math.rsqrt %549 : vector<2x1xf32>
    %551 = vector.broadcast %550 : vector<2x1xf32> to vector<2x32xf32>
    %552 = arith.mulf %542, %551 : vector<2x32xf32>
    %553 = vector.broadcast %535 : vector<1x32xf32> to vector<2x32xf32>
    %554 = arith.mulf %553, %552 : vector<2x32xf32>
    %555 = vector.broadcast %536 : vector<1x32xf32> to vector<2x32xf32>
    %556 = arith.addf %554, %555 : vector<2x32xf32>
    %cst_135 = arith.constant 0.000000e+00 : f32
    %557 = vector.broadcast %cst_135 : f32 to vector<2x32xf32>
    %558 = arith.maximumf %556, %557 : vector<2x32xf32>
    %559 = arith.addf %558, %528 : vector<2x32xf32>
    %c1_136 = arith.constant 1 : index
    %c0_137 = arith.constant 0 : index
    %c0_138 = arith.constant 0 : index
    %560 = vector.load %arg7[%c1_136, %c0_137, %c0_138] : memref<2x32x128xf32, #tpu.memory_space<vmem>>, vector<1x32x128xf32>
    %561 = vector.shape_cast %560 : vector<1x32x128xf32> to vector<32x128xf32>
    %cst_139 = arith.constant dense<0.000000e+00> : vector<2x128xf32>
    %562 = tpu.matmul %559, %561, %cst_139 {dimension_numbers = #tpu.dot_dimension_numbers<[1], [0], [0], [1], [0, 0, 1, 1], [], []>} : vector<2x32xf32>, vector<32x128xf32>, vector<2x128xf32> -> vector<2x128xf32>
    %c1_140 = arith.constant 1 : index
    %c0_141 = arith.constant 0 : index
    %c0_142 = arith.constant 0 : index
    %563 = vector.load %arg5[%c1_140, %c0_141, %c0_142] : memref<2x1x128xf32, #tpu.memory_space<vmem>>, vector<1x1x128xf32>
    %564 = vector.shape_cast %563 : vector<1x1x128xf32> to vector<1x128xf32>
    %565 = vector.broadcast %564 : vector<1x128xf32> to vector<2x128xf32>
    %566 = arith.addf %562, %565 : vector<2x128xf32>
    %c1_143 = arith.constant 1 : index
    %c0_144 = arith.constant 0 : index
    %c0_145 = arith.constant 0 : index
    %567 = vector.load %arg6[%c1_143, %c0_144, %c0_145] : memref<2x32x128xf32, #tpu.memory_space<vmem>>, vector<1x32x128xf32>
    %568 = vector.shape_cast %567 : vector<1x32x128xf32> to vector<32x128xf32>
    %cst_146 = arith.constant 0.000000e+00 : f32
    %569 = vector.broadcast %cst_146 : f32 to vector<2x32xf32>
    %cst_147 = arith.constant 0.000000e+00 : f32
    %570 = vector.broadcast %cst_147 : f32 to vector<2x32xf32>
    %cst_148 = arith.constant dense<0.000000e+00> : vector<2x128xf32>
    %571 = tpu.matmul %569, %568, %cst_148 {dimension_numbers = #tpu.dot_dimension_numbers<[1], [0], [0], [1], [0, 0, 1, 1], [], []>} : vector<2x32xf32>, vector<32x128xf32>, vector<2x128xf32> -> vector<2x128xf32>
    %572 = arith.addf %566, %571 : vector<2x128xf32>
    %573 = vector.extract_strided_slice %572 {offsets = [0, 0], sizes = [2, 32], strides = [1, 1]} : vector<2x128xf32> to vector<2x32xf32>
    %574 = arith.negf %573 : vector<2x32xf32>
    %575 = math.exp %574 : vector<2x32xf32>
    %cst_149 = arith.constant 1.000000e+00 : f32
    %576 = vector.broadcast %cst_149 : f32 to vector<2x32xf32>
    %577 = arith.addf %576, %575 : vector<2x32xf32>
    %578 = arith.divf %576, %577 : vector<2x32xf32>
    %579 = vector.extract_strided_slice %572 {offsets = [0, 32], sizes = [2, 32], strides = [1, 1]} : vector<2x128xf32> to vector<2x32xf32>
    %580 = arith.negf %579 : vector<2x32xf32>
    %581 = math.exp %580 : vector<2x32xf32>
    %cst_150 = arith.constant 1.000000e+00 : f32
    %582 = vector.broadcast %cst_150 : f32 to vector<2x32xf32>
    %583 = arith.addf %582, %581 : vector<2x32xf32>
    %584 = arith.divf %582, %583 : vector<2x32xf32>
    %585 = vector.extract_strided_slice %572 {offsets = [0, 64], sizes = [2, 32], strides = [1, 1]} : vector<2x128xf32> to vector<2x32xf32>
    %586 = math.tanh %585 : vector<2x32xf32>
    %587 = vector.extract_strided_slice %572 {offsets = [0, 96], sizes = [2, 32], strides = [1, 1]} : vector<2x128xf32> to vector<2x32xf32>
    %588 = arith.negf %587 : vector<2x32xf32>
    %589 = math.exp %588 : vector<2x32xf32>
    %cst_151 = arith.constant 1.000000e+00 : f32
    %590 = vector.broadcast %cst_151 : f32 to vector<2x32xf32>
    %591 = arith.addf %590, %589 : vector<2x32xf32>
    %592 = arith.divf %590, %591 : vector<2x32xf32>
    %593 = arith.mulf %584, %570 : vector<2x32xf32>
    %594 = arith.mulf %578, %586 : vector<2x32xf32>
    %595 = arith.addf %593, %594 : vector<2x32xf32>
    %596 = math.tanh %595 : vector<2x32xf32>
    %597 = arith.mulf %592, %596 : vector<2x32xf32>
    %cst_152 = arith.constant dense<0.000000e+00> : vector<2x128xf32>
    %598 = tpu.matmul %597, %568, %cst_152 {dimension_numbers = #tpu.dot_dimension_numbers<[1], [0], [0], [1], [0, 0, 1, 1], [], []>} : vector<2x32xf32>, vector<32x128xf32>, vector<2x128xf32> -> vector<2x128xf32>
    %599 = arith.addf %566, %598 : vector<2x128xf32>
    %600 = vector.extract_strided_slice %599 {offsets = [0, 0], sizes = [2, 32], strides = [1, 1]} : vector<2x128xf32> to vector<2x32xf32>
    %601 = arith.negf %600 : vector<2x32xf32>
    %602 = math.exp %601 : vector<2x32xf32>
    %cst_153 = arith.constant 1.000000e+00 : f32
    %603 = vector.broadcast %cst_153 : f32 to vector<2x32xf32>
    %604 = arith.addf %603, %602 : vector<2x32xf32>
    %605 = arith.divf %603, %604 : vector<2x32xf32>
    %606 = vector.extract_strided_slice %599 {offsets = [0, 32], sizes = [2, 32], strides = [1, 1]} : vector<2x128xf32> to vector<2x32xf32>
    %607 = arith.negf %606 : vector<2x32xf32>
    %608 = math.exp %607 : vector<2x32xf32>
    %cst_154 = arith.constant 1.000000e+00 : f32
    %609 = vector.broadcast %cst_154 : f32 to vector<2x32xf32>
    %610 = arith.addf %609, %608 : vector<2x32xf32>
    %611 = arith.divf %609, %610 : vector<2x32xf32>
    %612 = vector.extract_strided_slice %599 {offsets = [0, 64], sizes = [2, 32], strides = [1, 1]} : vector<2x128xf32> to vector<2x32xf32>
    %613 = math.tanh %612 : vector<2x32xf32>
    %614 = vector.extract_strided_slice %599 {offsets = [0, 96], sizes = [2, 32], strides = [1, 1]} : vector<2x128xf32> to vector<2x32xf32>
    %615 = arith.negf %614 : vector<2x32xf32>
    %616 = math.exp %615 : vector<2x32xf32>
    %cst_155 = arith.constant 1.000000e+00 : f32
    %617 = vector.broadcast %cst_155 : f32 to vector<2x32xf32>
    %618 = arith.addf %617, %616 : vector<2x32xf32>
    %619 = arith.divf %617, %618 : vector<2x32xf32>
    %620 = arith.mulf %611, %595 : vector<2x32xf32>
    %621 = arith.mulf %605, %613 : vector<2x32xf32>
    %622 = arith.addf %620, %621 : vector<2x32xf32>
    %623 = math.tanh %622 : vector<2x32xf32>
    %624 = arith.mulf %619, %623 : vector<2x32xf32>
    %cst_156 = arith.constant dense<0.000000e+00> : vector<2x128xf32>
    %625 = tpu.matmul %624, %568, %cst_156 {dimension_numbers = #tpu.dot_dimension_numbers<[1], [0], [0], [1], [0, 0, 1, 1], [], []>} : vector<2x32xf32>, vector<32x128xf32>, vector<2x128xf32> -> vector<2x128xf32>
    %626 = arith.addf %566, %625 : vector<2x128xf32>
    %627 = vector.extract_strided_slice %626 {offsets = [0, 0], sizes = [2, 32], strides = [1, 1]} : vector<2x128xf32> to vector<2x32xf32>
    %628 = arith.negf %627 : vector<2x32xf32>
    %629 = math.exp %628 : vector<2x32xf32>
    %cst_157 = arith.constant 1.000000e+00 : f32
    %630 = vector.broadcast %cst_157 : f32 to vector<2x32xf32>
    %631 = arith.addf %630, %629 : vector<2x32xf32>
    %632 = arith.divf %630, %631 : vector<2x32xf32>
    %633 = vector.extract_strided_slice %626 {offsets = [0, 32], sizes = [2, 32], strides = [1, 1]} : vector<2x128xf32> to vector<2x32xf32>
    %634 = arith.negf %633 : vector<2x32xf32>
    %635 = math.exp %634 : vector<2x32xf32>
    %cst_158 = arith.constant 1.000000e+00 : f32
    %636 = vector.broadcast %cst_158 : f32 to vector<2x32xf32>
    %637 = arith.addf %636, %635 : vector<2x32xf32>
    %638 = arith.divf %636, %637 : vector<2x32xf32>
    %639 = vector.extract_strided_slice %626 {offsets = [0, 64], sizes = [2, 32], strides = [1, 1]} : vector<2x128xf32> to vector<2x32xf32>
    %640 = math.tanh %639 : vector<2x32xf32>
    %641 = vector.extract_strided_slice %626 {offsets = [0, 96], sizes = [2, 32], strides = [1, 1]} : vector<2x128xf32> to vector<2x32xf32>
    %642 = arith.negf %641 : vector<2x32xf32>
    %643 = math.exp %642 : vector<2x32xf32>
    %cst_159 = arith.constant 1.000000e+00 : f32
    %644 = vector.broadcast %cst_159 : f32 to vector<2x32xf32>
    %645 = arith.addf %644, %643 : vector<2x32xf32>
    %646 = arith.divf %644, %645 : vector<2x32xf32>
    %647 = arith.mulf %638, %622 : vector<2x32xf32>
    %648 = arith.mulf %632, %640 : vector<2x32xf32>
    %649 = arith.addf %647, %648 : vector<2x32xf32>
    %650 = math.tanh %649 : vector<2x32xf32>
    %651 = arith.mulf %646, %650 : vector<2x32xf32>
    %cst_160 = arith.constant dense<0.000000e+00> : vector<2x128xf32>
    %652 = tpu.matmul %651, %568, %cst_160 {dimension_numbers = #tpu.dot_dimension_numbers<[1], [0], [0], [1], [0, 0, 1, 1], [], []>} : vector<2x32xf32>, vector<32x128xf32>, vector<2x128xf32> -> vector<2x128xf32>
    %653 = arith.addf %566, %652 : vector<2x128xf32>
    %654 = vector.extract_strided_slice %653 {offsets = [0, 0], sizes = [2, 32], strides = [1, 1]} : vector<2x128xf32> to vector<2x32xf32>
    %655 = arith.negf %654 : vector<2x32xf32>
    %656 = math.exp %655 : vector<2x32xf32>
    %cst_161 = arith.constant 1.000000e+00 : f32
    %657 = vector.broadcast %cst_161 : f32 to vector<2x32xf32>
    %658 = arith.addf %657, %656 : vector<2x32xf32>
    %659 = arith.divf %657, %658 : vector<2x32xf32>
    %660 = vector.extract_strided_slice %653 {offsets = [0, 32], sizes = [2, 32], strides = [1, 1]} : vector<2x128xf32> to vector<2x32xf32>
    %661 = arith.negf %660 : vector<2x32xf32>
    %662 = math.exp %661 : vector<2x32xf32>
    %cst_162 = arith.constant 1.000000e+00 : f32
    %663 = vector.broadcast %cst_162 : f32 to vector<2x32xf32>
    %664 = arith.addf %663, %662 : vector<2x32xf32>
    %665 = arith.divf %663, %664 : vector<2x32xf32>
    %666 = vector.extract_strided_slice %653 {offsets = [0, 64], sizes = [2, 32], strides = [1, 1]} : vector<2x128xf32> to vector<2x32xf32>
    %667 = math.tanh %666 : vector<2x32xf32>
    %668 = vector.extract_strided_slice %653 {offsets = [0, 96], sizes = [2, 32], strides = [1, 1]} : vector<2x128xf32> to vector<2x32xf32>
    %669 = arith.negf %668 : vector<2x32xf32>
    %670 = math.exp %669 : vector<2x32xf32>
    %cst_163 = arith.constant 1.000000e+00 : f32
    %671 = vector.broadcast %cst_163 : f32 to vector<2x32xf32>
    %672 = arith.addf %671, %670 : vector<2x32xf32>
    %673 = arith.divf %671, %672 : vector<2x32xf32>
    %674 = arith.mulf %665, %649 : vector<2x32xf32>
    %675 = arith.mulf %659, %667 : vector<2x32xf32>
    %676 = arith.addf %674, %675 : vector<2x32xf32>
    %677 = math.tanh %676 : vector<2x32xf32>
    %678 = arith.mulf %673, %677 : vector<2x32xf32>
    %cst_164 = arith.constant dense<0.000000e+00> : vector<2x128xf32>
    %679 = tpu.matmul %678, %568, %cst_164 {dimension_numbers = #tpu.dot_dimension_numbers<[1], [0], [0], [1], [0, 0, 1, 1], [], []>} : vector<2x32xf32>, vector<32x128xf32>, vector<2x128xf32> -> vector<2x128xf32>
    %680 = arith.addf %566, %679 : vector<2x128xf32>
    %681 = vector.extract_strided_slice %680 {offsets = [0, 0], sizes = [2, 32], strides = [1, 1]} : vector<2x128xf32> to vector<2x32xf32>
    %682 = arith.negf %681 : vector<2x32xf32>
    %683 = math.exp %682 : vector<2x32xf32>
    %cst_165 = arith.constant 1.000000e+00 : f32
    %684 = vector.broadcast %cst_165 : f32 to vector<2x32xf32>
    %685 = arith.addf %684, %683 : vector<2x32xf32>
    %686 = arith.divf %684, %685 : vector<2x32xf32>
    %687 = vector.extract_strided_slice %680 {offsets = [0, 32], sizes = [2, 32], strides = [1, 1]} : vector<2x128xf32> to vector<2x32xf32>
    %688 = arith.negf %687 : vector<2x32xf32>
    %689 = math.exp %688 : vector<2x32xf32>
    %cst_166 = arith.constant 1.000000e+00 : f32
    %690 = vector.broadcast %cst_166 : f32 to vector<2x32xf32>
    %691 = arith.addf %690, %689 : vector<2x32xf32>
    %692 = arith.divf %690, %691 : vector<2x32xf32>
    %693 = vector.extract_strided_slice %680 {offsets = [0, 64], sizes = [2, 32], strides = [1, 1]} : vector<2x128xf32> to vector<2x32xf32>
    %694 = math.tanh %693 : vector<2x32xf32>
    %695 = vector.extract_strided_slice %680 {offsets = [0, 96], sizes = [2, 32], strides = [1, 1]} : vector<2x128xf32> to vector<2x32xf32>
    %696 = arith.negf %695 : vector<2x32xf32>
    %697 = math.exp %696 : vector<2x32xf32>
    %cst_167 = arith.constant 1.000000e+00 : f32
    %698 = vector.broadcast %cst_167 : f32 to vector<2x32xf32>
    %699 = arith.addf %698, %697 : vector<2x32xf32>
    %700 = arith.divf %698, %699 : vector<2x32xf32>
    %701 = arith.mulf %692, %676 : vector<2x32xf32>
    %702 = arith.mulf %686, %694 : vector<2x32xf32>
    %703 = arith.addf %701, %702 : vector<2x32xf32>
    %704 = math.tanh %703 : vector<2x32xf32>
    %705 = arith.mulf %700, %704 : vector<2x32xf32>
    %cst_168 = arith.constant dense<0.000000e+00> : vector<2x128xf32>
    %706 = tpu.matmul %705, %568, %cst_168 {dimension_numbers = #tpu.dot_dimension_numbers<[1], [0], [0], [1], [0, 0, 1, 1], [], []>} : vector<2x32xf32>, vector<32x128xf32>, vector<2x128xf32> -> vector<2x128xf32>
    %707 = arith.addf %566, %706 : vector<2x128xf32>
    %708 = vector.extract_strided_slice %707 {offsets = [0, 0], sizes = [2, 32], strides = [1, 1]} : vector<2x128xf32> to vector<2x32xf32>
    %709 = arith.negf %708 : vector<2x32xf32>
    %710 = math.exp %709 : vector<2x32xf32>
    %cst_169 = arith.constant 1.000000e+00 : f32
    %711 = vector.broadcast %cst_169 : f32 to vector<2x32xf32>
    %712 = arith.addf %711, %710 : vector<2x32xf32>
    %713 = arith.divf %711, %712 : vector<2x32xf32>
    %714 = vector.extract_strided_slice %707 {offsets = [0, 32], sizes = [2, 32], strides = [1, 1]} : vector<2x128xf32> to vector<2x32xf32>
    %715 = arith.negf %714 : vector<2x32xf32>
    %716 = math.exp %715 : vector<2x32xf32>
    %cst_170 = arith.constant 1.000000e+00 : f32
    %717 = vector.broadcast %cst_170 : f32 to vector<2x32xf32>
    %718 = arith.addf %717, %716 : vector<2x32xf32>
    %719 = arith.divf %717, %718 : vector<2x32xf32>
    %720 = vector.extract_strided_slice %707 {offsets = [0, 64], sizes = [2, 32], strides = [1, 1]} : vector<2x128xf32> to vector<2x32xf32>
    %721 = math.tanh %720 : vector<2x32xf32>
    %722 = vector.extract_strided_slice %707 {offsets = [0, 96], sizes = [2, 32], strides = [1, 1]} : vector<2x128xf32> to vector<2x32xf32>
    %723 = arith.negf %722 : vector<2x32xf32>
    %724 = math.exp %723 : vector<2x32xf32>
    %cst_171 = arith.constant 1.000000e+00 : f32
    %725 = vector.broadcast %cst_171 : f32 to vector<2x32xf32>
    %726 = arith.addf %725, %724 : vector<2x32xf32>
    %727 = arith.divf %725, %726 : vector<2x32xf32>
    %728 = arith.mulf %719, %703 : vector<2x32xf32>
    %729 = arith.mulf %713, %721 : vector<2x32xf32>
    %730 = arith.addf %728, %729 : vector<2x32xf32>
    %731 = math.tanh %730 : vector<2x32xf32>
    %732 = arith.mulf %727, %731 : vector<2x32xf32>
    %cst_172 = arith.constant dense<0.000000e+00> : vector<2x128xf32>
    %733 = tpu.matmul %732, %568, %cst_172 {dimension_numbers = #tpu.dot_dimension_numbers<[1], [0], [0], [1], [0, 0, 1, 1], [], []>} : vector<2x32xf32>, vector<32x128xf32>, vector<2x128xf32> -> vector<2x128xf32>
    %734 = arith.addf %566, %733 : vector<2x128xf32>
    %735 = vector.extract_strided_slice %734 {offsets = [0, 0], sizes = [2, 32], strides = [1, 1]} : vector<2x128xf32> to vector<2x32xf32>
    %736 = arith.negf %735 : vector<2x32xf32>
    %737 = math.exp %736 : vector<2x32xf32>
    %cst_173 = arith.constant 1.000000e+00 : f32
    %738 = vector.broadcast %cst_173 : f32 to vector<2x32xf32>
    %739 = arith.addf %738, %737 : vector<2x32xf32>
    %740 = arith.divf %738, %739 : vector<2x32xf32>
    %741 = vector.extract_strided_slice %734 {offsets = [0, 32], sizes = [2, 32], strides = [1, 1]} : vector<2x128xf32> to vector<2x32xf32>
    %742 = arith.negf %741 : vector<2x32xf32>
    %743 = math.exp %742 : vector<2x32xf32>
    %cst_174 = arith.constant 1.000000e+00 : f32
    %744 = vector.broadcast %cst_174 : f32 to vector<2x32xf32>
    %745 = arith.addf %744, %743 : vector<2x32xf32>
    %746 = arith.divf %744, %745 : vector<2x32xf32>
    %747 = vector.extract_strided_slice %734 {offsets = [0, 64], sizes = [2, 32], strides = [1, 1]} : vector<2x128xf32> to vector<2x32xf32>
    %748 = math.tanh %747 : vector<2x32xf32>
    %749 = vector.extract_strided_slice %734 {offsets = [0, 96], sizes = [2, 32], strides = [1, 1]} : vector<2x128xf32> to vector<2x32xf32>
    %750 = arith.negf %749 : vector<2x32xf32>
    %751 = math.exp %750 : vector<2x32xf32>
    %cst_175 = arith.constant 1.000000e+00 : f32
    %752 = vector.broadcast %cst_175 : f32 to vector<2x32xf32>
    %753 = arith.addf %752, %751 : vector<2x32xf32>
    %754 = arith.divf %752, %753 : vector<2x32xf32>
    %755 = arith.mulf %746, %730 : vector<2x32xf32>
    %756 = arith.mulf %740, %748 : vector<2x32xf32>
    %757 = arith.addf %755, %756 : vector<2x32xf32>
    %758 = math.tanh %757 : vector<2x32xf32>
    %759 = arith.mulf %754, %758 : vector<2x32xf32>
    %cst_176 = arith.constant dense<0.000000e+00> : vector<2x128xf32>
    %760 = tpu.matmul %759, %568, %cst_176 {dimension_numbers = #tpu.dot_dimension_numbers<[1], [0], [0], [1], [0, 0, 1, 1], [], []>} : vector<2x32xf32>, vector<32x128xf32>, vector<2x128xf32> -> vector<2x128xf32>
    %761 = arith.addf %566, %760 : vector<2x128xf32>
    %762 = vector.extract_strided_slice %761 {offsets = [0, 0], sizes = [2, 32], strides = [1, 1]} : vector<2x128xf32> to vector<2x32xf32>
    %763 = arith.negf %762 : vector<2x32xf32>
    %764 = math.exp %763 : vector<2x32xf32>
    %cst_177 = arith.constant 1.000000e+00 : f32
    %765 = vector.broadcast %cst_177 : f32 to vector<2x32xf32>
    %766 = arith.addf %765, %764 : vector<2x32xf32>
    %767 = arith.divf %765, %766 : vector<2x32xf32>
    %768 = vector.extract_strided_slice %761 {offsets = [0, 32], sizes = [2, 32], strides = [1, 1]} : vector<2x128xf32> to vector<2x32xf32>
    %769 = arith.negf %768 : vector<2x32xf32>
    %770 = math.exp %769 : vector<2x32xf32>
    %cst_178 = arith.constant 1.000000e+00 : f32
    %771 = vector.broadcast %cst_178 : f32 to vector<2x32xf32>
    %772 = arith.addf %771, %770 : vector<2x32xf32>
    %773 = arith.divf %771, %772 : vector<2x32xf32>
    %774 = vector.extract_strided_slice %761 {offsets = [0, 64], sizes = [2, 32], strides = [1, 1]} : vector<2x128xf32> to vector<2x32xf32>
    %775 = math.tanh %774 : vector<2x32xf32>
    %776 = vector.extract_strided_slice %761 {offsets = [0, 96], sizes = [2, 32], strides = [1, 1]} : vector<2x128xf32> to vector<2x32xf32>
    %777 = arith.negf %776 : vector<2x32xf32>
    %778 = math.exp %777 : vector<2x32xf32>
    %cst_179 = arith.constant 1.000000e+00 : f32
    %779 = vector.broadcast %cst_179 : f32 to vector<2x32xf32>
    %780 = arith.addf %779, %778 : vector<2x32xf32>
    %781 = arith.divf %779, %780 : vector<2x32xf32>
    %782 = arith.mulf %773, %757 : vector<2x32xf32>
    %783 = arith.mulf %767, %775 : vector<2x32xf32>
    %784 = arith.addf %782, %783 : vector<2x32xf32>
    %785 = math.tanh %784 : vector<2x32xf32>
    %786 = arith.mulf %781, %785 : vector<2x32xf32>
    %cst_180 = arith.constant dense<0.000000e+00> : vector<2x128xf32>
    %787 = tpu.matmul %786, %568, %cst_180 {dimension_numbers = #tpu.dot_dimension_numbers<[1], [0], [0], [1], [0, 0, 1, 1], [], []>} : vector<2x32xf32>, vector<32x128xf32>, vector<2x128xf32> -> vector<2x128xf32>
    %788 = arith.addf %566, %787 : vector<2x128xf32>
    %789 = vector.extract_strided_slice %788 {offsets = [0, 0], sizes = [2, 32], strides = [1, 1]} : vector<2x128xf32> to vector<2x32xf32>
    %790 = arith.negf %789 : vector<2x32xf32>
    %791 = math.exp %790 : vector<2x32xf32>
    %cst_181 = arith.constant 1.000000e+00 : f32
    %792 = vector.broadcast %cst_181 : f32 to vector<2x32xf32>
    %793 = arith.addf %792, %791 : vector<2x32xf32>
    %794 = arith.divf %792, %793 : vector<2x32xf32>
    %795 = vector.extract_strided_slice %788 {offsets = [0, 32], sizes = [2, 32], strides = [1, 1]} : vector<2x128xf32> to vector<2x32xf32>
    %796 = arith.negf %795 : vector<2x32xf32>
    %797 = math.exp %796 : vector<2x32xf32>
    %cst_182 = arith.constant 1.000000e+00 : f32
    %798 = vector.broadcast %cst_182 : f32 to vector<2x32xf32>
    %799 = arith.addf %798, %797 : vector<2x32xf32>
    %800 = arith.divf %798, %799 : vector<2x32xf32>
    %801 = vector.extract_strided_slice %788 {offsets = [0, 64], sizes = [2, 32], strides = [1, 1]} : vector<2x128xf32> to vector<2x32xf32>
    %802 = math.tanh %801 : vector<2x32xf32>
    %803 = vector.extract_strided_slice %788 {offsets = [0, 96], sizes = [2, 32], strides = [1, 1]} : vector<2x128xf32> to vector<2x32xf32>
    %804 = arith.negf %803 : vector<2x32xf32>
    %805 = math.exp %804 : vector<2x32xf32>
    %cst_183 = arith.constant 1.000000e+00 : f32
    %806 = vector.broadcast %cst_183 : f32 to vector<2x32xf32>
    %807 = arith.addf %806, %805 : vector<2x32xf32>
    %808 = arith.divf %806, %807 : vector<2x32xf32>
    %809 = arith.mulf %800, %784 : vector<2x32xf32>
    %810 = arith.mulf %794, %802 : vector<2x32xf32>
    %811 = arith.addf %809, %810 : vector<2x32xf32>
    %812 = math.tanh %811 : vector<2x32xf32>
    %813 = arith.mulf %808, %812 : vector<2x32xf32>
    %cst_184 = arith.constant dense<0.000000e+00> : vector<2x128xf32>
    %814 = tpu.matmul %813, %568, %cst_184 {dimension_numbers = #tpu.dot_dimension_numbers<[1], [0], [0], [1], [0, 0, 1, 1], [], []>} : vector<2x32xf32>, vector<32x128xf32>, vector<2x128xf32> -> vector<2x128xf32>
    %815 = arith.addf %566, %814 : vector<2x128xf32>
    %816 = vector.extract_strided_slice %815 {offsets = [0, 0], sizes = [2, 32], strides = [1, 1]} : vector<2x128xf32> to vector<2x32xf32>
    %817 = arith.negf %816 : vector<2x32xf32>
    %818 = math.exp %817 : vector<2x32xf32>
    %cst_185 = arith.constant 1.000000e+00 : f32
    %819 = vector.broadcast %cst_185 : f32 to vector<2x32xf32>
    %820 = arith.addf %819, %818 : vector<2x32xf32>
    %821 = arith.divf %819, %820 : vector<2x32xf32>
    %822 = vector.extract_strided_slice %815 {offsets = [0, 32], sizes = [2, 32], strides = [1, 1]} : vector<2x128xf32> to vector<2x32xf32>
    %823 = arith.negf %822 : vector<2x32xf32>
    %824 = math.exp %823 : vector<2x32xf32>
    %cst_186 = arith.constant 1.000000e+00 : f32
    %825 = vector.broadcast %cst_186 : f32 to vector<2x32xf32>
    %826 = arith.addf %825, %824 : vector<2x32xf32>
    %827 = arith.divf %825, %826 : vector<2x32xf32>
    %828 = vector.extract_strided_slice %815 {offsets = [0, 64], sizes = [2, 32], strides = [1, 1]} : vector<2x128xf32> to vector<2x32xf32>
    %829 = math.tanh %828 : vector<2x32xf32>
    %830 = vector.extract_strided_slice %815 {offsets = [0, 96], sizes = [2, 32], strides = [1, 1]} : vector<2x128xf32> to vector<2x32xf32>
    %831 = arith.negf %830 : vector<2x32xf32>
    %832 = math.exp %831 : vector<2x32xf32>
    %cst_187 = arith.constant 1.000000e+00 : f32
    %833 = vector.broadcast %cst_187 : f32 to vector<2x32xf32>
    %834 = arith.addf %833, %832 : vector<2x32xf32>
    %835 = arith.divf %833, %834 : vector<2x32xf32>
    %836 = arith.mulf %827, %811 : vector<2x32xf32>
    %837 = arith.mulf %821, %829 : vector<2x32xf32>
    %838 = arith.addf %836, %837 : vector<2x32xf32>
    %839 = math.tanh %838 : vector<2x32xf32>
    %840 = arith.mulf %835, %839 : vector<2x32xf32>
    %cst_188 = arith.constant dense<0.000000e+00> : vector<2x128xf32>
    %841 = tpu.matmul %840, %568, %cst_188 {dimension_numbers = #tpu.dot_dimension_numbers<[1], [0], [0], [1], [0, 0, 1, 1], [], []>} : vector<2x32xf32>, vector<32x128xf32>, vector<2x128xf32> -> vector<2x128xf32>
    %842 = arith.addf %566, %841 : vector<2x128xf32>
    %843 = vector.extract_strided_slice %842 {offsets = [0, 0], sizes = [2, 32], strides = [1, 1]} : vector<2x128xf32> to vector<2x32xf32>
    %844 = arith.negf %843 : vector<2x32xf32>
    %845 = math.exp %844 : vector<2x32xf32>
    %cst_189 = arith.constant 1.000000e+00 : f32
    %846 = vector.broadcast %cst_189 : f32 to vector<2x32xf32>
    %847 = arith.addf %846, %845 : vector<2x32xf32>
    %848 = arith.divf %846, %847 : vector<2x32xf32>
    %849 = vector.extract_strided_slice %842 {offsets = [0, 32], sizes = [2, 32], strides = [1, 1]} : vector<2x128xf32> to vector<2x32xf32>
    %850 = arith.negf %849 : vector<2x32xf32>
    %851 = math.exp %850 : vector<2x32xf32>
    %cst_190 = arith.constant 1.000000e+00 : f32
    %852 = vector.broadcast %cst_190 : f32 to vector<2x32xf32>
    %853 = arith.addf %852, %851 : vector<2x32xf32>
    %854 = arith.divf %852, %853 : vector<2x32xf32>
    %855 = vector.extract_strided_slice %842 {offsets = [0, 64], sizes = [2, 32], strides = [1, 1]} : vector<2x128xf32> to vector<2x32xf32>
    %856 = math.tanh %855 : vector<2x32xf32>
    %857 = vector.extract_strided_slice %842 {offsets = [0, 96], sizes = [2, 32], strides = [1, 1]} : vector<2x128xf32> to vector<2x32xf32>
    %858 = arith.negf %857 : vector<2x32xf32>
    %859 = math.exp %858 : vector<2x32xf32>
    %cst_191 = arith.constant 1.000000e+00 : f32
    %860 = vector.broadcast %cst_191 : f32 to vector<2x32xf32>
    %861 = arith.addf %860, %859 : vector<2x32xf32>
    %862 = arith.divf %860, %861 : vector<2x32xf32>
    %863 = arith.mulf %854, %838 : vector<2x32xf32>
    %864 = arith.mulf %848, %856 : vector<2x32xf32>
    %865 = arith.addf %863, %864 : vector<2x32xf32>
    %866 = math.tanh %865 : vector<2x32xf32>
    %867 = arith.mulf %862, %866 : vector<2x32xf32>
    %cst_192 = arith.constant dense<0.000000e+00> : vector<2x128xf32>
    %868 = tpu.matmul %867, %568, %cst_192 {dimension_numbers = #tpu.dot_dimension_numbers<[1], [0], [0], [1], [0, 0, 1, 1], [], []>} : vector<2x32xf32>, vector<32x128xf32>, vector<2x128xf32> -> vector<2x128xf32>
    %869 = arith.addf %566, %868 : vector<2x128xf32>
    %870 = vector.extract_strided_slice %869 {offsets = [0, 0], sizes = [2, 32], strides = [1, 1]} : vector<2x128xf32> to vector<2x32xf32>
    %871 = arith.negf %870 : vector<2x32xf32>
    %872 = math.exp %871 : vector<2x32xf32>
    %cst_193 = arith.constant 1.000000e+00 : f32
    %873 = vector.broadcast %cst_193 : f32 to vector<2x32xf32>
    %874 = arith.addf %873, %872 : vector<2x32xf32>
    %875 = arith.divf %873, %874 : vector<2x32xf32>
    %876 = vector.extract_strided_slice %869 {offsets = [0, 32], sizes = [2, 32], strides = [1, 1]} : vector<2x128xf32> to vector<2x32xf32>
    %877 = arith.negf %876 : vector<2x32xf32>
    %878 = math.exp %877 : vector<2x32xf32>
    %cst_194 = arith.constant 1.000000e+00 : f32
    %879 = vector.broadcast %cst_194 : f32 to vector<2x32xf32>
    %880 = arith.addf %879, %878 : vector<2x32xf32>
    %881 = arith.divf %879, %880 : vector<2x32xf32>
    %882 = vector.extract_strided_slice %869 {offsets = [0, 64], sizes = [2, 32], strides = [1, 1]} : vector<2x128xf32> to vector<2x32xf32>
    %883 = math.tanh %882 : vector<2x32xf32>
    %884 = vector.extract_strided_slice %869 {offsets = [0, 96], sizes = [2, 32], strides = [1, 1]} : vector<2x128xf32> to vector<2x32xf32>
    %885 = arith.negf %884 : vector<2x32xf32>
    %886 = math.exp %885 : vector<2x32xf32>
    %cst_195 = arith.constant 1.000000e+00 : f32
    %887 = vector.broadcast %cst_195 : f32 to vector<2x32xf32>
    %888 = arith.addf %887, %886 : vector<2x32xf32>
    %889 = arith.divf %887, %888 : vector<2x32xf32>
    %890 = arith.mulf %881, %865 : vector<2x32xf32>
    %891 = arith.mulf %875, %883 : vector<2x32xf32>
    %892 = arith.addf %890, %891 : vector<2x32xf32>
    %893 = math.tanh %892 : vector<2x32xf32>
    %894 = arith.mulf %889, %893 : vector<2x32xf32>
    %c2 = arith.constant 2 : index
    %c0_196 = arith.constant 0 : index
    %c0_197 = arith.constant 0 : index
    %895 = vector.load %arg8[%c2, %c0_196, %c0_197] : memref<5x32x32xf32, #tpu.memory_space<vmem>>, vector<1x32x32xf32>
    %896 = vector.shape_cast %895 : vector<1x32x32xf32> to vector<32x32xf32>
    %cst_198 = arith.constant dense<0.000000e+00> : vector<2x32xf32>
    %897 = tpu.matmul %894, %896, %cst_198 {dimension_numbers = #tpu.dot_dimension_numbers<[1], [0], [0], [1], [0, 0, 1, 1], [], []>} : vector<2x32xf32>, vector<32x32xf32>, vector<2x32xf32> -> vector<2x32xf32>
    %898 = vector.extract_strided_slice %0 {offsets = [21, 0], sizes = [1, 32], strides = [1, 1]} : vector<30x32xf32> to vector<1x32xf32>
    %899 = vector.broadcast %898 : vector<1x32xf32> to vector<2x32xf32>
    %900 = arith.addf %897, %899 : vector<2x32xf32>
    %901 = vector.extract_strided_slice %0 {offsets = [22, 0], sizes = [1, 32], strides = [1, 1]} : vector<30x32xf32> to vector<1x32xf32>
    %902 = vector.extract_strided_slice %0 {offsets = [23, 0], sizes = [1, 32], strides = [1, 1]} : vector<30x32xf32> to vector<1x32xf32>
    %cst_199 = arith.constant dense<0.000000e+00> : vector<2xf32>
    %903 = vector.multi_reduction <add>, %900, %cst_199 [1] : vector<2x32xf32> to vector<2xf32>
    %904 = vector.shape_cast %903 : vector<2xf32> to vector<2x1xf32>
    %cst_200 = arith.constant 3.200000e+01 : f32
    %905 = vector.broadcast %cst_200 : f32 to vector<2x1xf32>
    %906 = arith.divf %904, %905 : vector<2x1xf32>
    %907 = vector.broadcast %906 : vector<2x1xf32> to vector<2x32xf32>
    %908 = arith.subf %900, %907 : vector<2x32xf32>
    %909 = arith.mulf %908, %908 : vector<2x32xf32>
    %cst_201 = arith.constant dense<0.000000e+00> : vector<2xf32>
    %910 = vector.multi_reduction <add>, %909, %cst_201 [1] : vector<2x32xf32> to vector<2xf32>
    %911 = vector.shape_cast %910 : vector<2xf32> to vector<2x1xf32>
    %cst_202 = arith.constant 3.200000e+01 : f32
    %912 = vector.broadcast %cst_202 : f32 to vector<2x1xf32>
    %913 = arith.divf %911, %912 : vector<2x1xf32>
    %cst_203 = arith.constant 9.99999974E-6 : f32
    %914 = vector.broadcast %cst_203 : f32 to vector<2x1xf32>
    %915 = arith.addf %913, %914 : vector<2x1xf32>
    %916 = math.rsqrt %915 : vector<2x1xf32>
    %917 = vector.broadcast %916 : vector<2x1xf32> to vector<2x32xf32>
    %918 = arith.mulf %908, %917 : vector<2x32xf32>
    %919 = vector.broadcast %901 : vector<1x32xf32> to vector<2x32xf32>
    %920 = arith.mulf %919, %918 : vector<2x32xf32>
    %921 = vector.broadcast %902 : vector<1x32xf32> to vector<2x32xf32>
    %922 = arith.addf %920, %921 : vector<2x32xf32>
    %cst_204 = arith.constant 0.000000e+00 : f32
    %923 = vector.broadcast %cst_204 : f32 to vector<2x32xf32>
    %924 = arith.maximumf %922, %923 : vector<2x32xf32>
    %925 = arith.addf %924, %894 : vector<2x32xf32>
    %926 = tpu.concatenate %597, %624, %651, %678, %705, %732, %759, %786, %813, %840, %867, %894 in 0 : vector<2x32xf32>, vector<2x32xf32>, vector<2x32xf32>, vector<2x32xf32>, vector<2x32xf32>, vector<2x32xf32>, vector<2x32xf32>, vector<2x32xf32>, vector<2x32xf32>, vector<2x32xf32>, vector<2x32xf32>, vector<2x32xf32> -> vector<24x32xf32>
    %c3 = arith.constant 3 : index
    %c0_205 = arith.constant 0 : index
    %c0_206 = arith.constant 0 : index
    %927 = vector.load %arg8[%c3, %c0_205, %c0_206] : memref<5x32x32xf32, #tpu.memory_space<vmem>>, vector<1x32x32xf32>
    %928 = vector.shape_cast %927 : vector<1x32x32xf32> to vector<32x32xf32>
    %cst_207 = arith.constant dense<0.000000e+00> : vector<24x32xf32>
    %929 = tpu.matmul %926, %928, %cst_207 {dimension_numbers = #tpu.dot_dimension_numbers<[1], [0], [0], [1], [0, 0, 1, 1], [], []>} : vector<24x32xf32>, vector<32x32xf32>, vector<24x32xf32> -> vector<24x32xf32>
    %930 = vector.extract_strided_slice %0 {offsets = [24, 0], sizes = [1, 32], strides = [1, 1]} : vector<30x32xf32> to vector<1x32xf32>
    %931 = vector.broadcast %930 : vector<1x32xf32> to vector<24x32xf32>
    %932 = arith.addf %929, %931 : vector<24x32xf32>
    %933 = vector.extract_strided_slice %0 {offsets = [25, 0], sizes = [1, 32], strides = [1, 1]} : vector<30x32xf32> to vector<1x32xf32>
    %934 = vector.extract_strided_slice %0 {offsets = [26, 0], sizes = [1, 32], strides = [1, 1]} : vector<30x32xf32> to vector<1x32xf32>
    %cst_208 = arith.constant dense<0.000000e+00> : vector<24xf32>
    %935 = vector.multi_reduction <add>, %932, %cst_208 [1] : vector<24x32xf32> to vector<24xf32>
    %936 = vector.shape_cast %935 : vector<24xf32> to vector<24x1xf32>
    %cst_209 = arith.constant 3.200000e+01 : f32
    %937 = vector.broadcast %cst_209 : f32 to vector<24x1xf32>
    %938 = arith.divf %936, %937 : vector<24x1xf32>
    %939 = vector.broadcast %938 : vector<24x1xf32> to vector<24x32xf32>
    %940 = arith.subf %932, %939 : vector<24x32xf32>
    %941 = arith.mulf %940, %940 : vector<24x32xf32>
    %cst_210 = arith.constant dense<0.000000e+00> : vector<24xf32>
    %942 = vector.multi_reduction <add>, %941, %cst_210 [1] : vector<24x32xf32> to vector<24xf32>
    %943 = vector.shape_cast %942 : vector<24xf32> to vector<24x1xf32>
    %cst_211 = arith.constant 3.200000e+01 : f32
    %944 = vector.broadcast %cst_211 : f32 to vector<24x1xf32>
    %945 = arith.divf %943, %944 : vector<24x1xf32>
    %cst_212 = arith.constant 9.99999974E-6 : f32
    %946 = vector.broadcast %cst_212 : f32 to vector<24x1xf32>
    %947 = arith.addf %945, %946 : vector<24x1xf32>
    %948 = math.rsqrt %947 : vector<24x1xf32>
    %949 = vector.broadcast %948 : vector<24x1xf32> to vector<24x32xf32>
    %950 = arith.mulf %940, %949 : vector<24x32xf32>
    %951 = vector.broadcast %933 : vector<1x32xf32> to vector<24x32xf32>
    %952 = arith.mulf %951, %950 : vector<24x32xf32>
    %953 = vector.broadcast %934 : vector<1x32xf32> to vector<24x32xf32>
    %954 = arith.addf %952, %953 : vector<24x32xf32>
    %cst_213 = arith.constant 0.000000e+00 : f32
    %955 = vector.broadcast %cst_213 : f32 to vector<24x32xf32>
    %956 = arith.maximumf %954, %955 : vector<24x32xf32>
    %c4 = arith.constant 4 : index
    %c0_214 = arith.constant 0 : index
    %c0_215 = arith.constant 0 : index
    %957 = vector.load %arg8[%c4, %c0_214, %c0_215] : memref<5x32x32xf32, #tpu.memory_space<vmem>>, vector<1x32x32xf32>
    %958 = vector.shape_cast %957 : vector<1x32x32xf32> to vector<32x32xf32>
    %cst_216 = arith.constant dense<0.000000e+00> : vector<24x32xf32>
    %959 = tpu.matmul %926, %958, %cst_216 {dimension_numbers = #tpu.dot_dimension_numbers<[1], [0], [0], [1], [0, 0, 1, 1], [], []>} : vector<24x32xf32>, vector<32x32xf32>, vector<24x32xf32> -> vector<24x32xf32>
    %960 = vector.extract_strided_slice %0 {offsets = [27, 0], sizes = [1, 32], strides = [1, 1]} : vector<30x32xf32> to vector<1x32xf32>
    %961 = vector.broadcast %960 : vector<1x32xf32> to vector<24x32xf32>
    %962 = arith.addf %959, %961 : vector<24x32xf32>
    %963 = vector.extract_strided_slice %0 {offsets = [28, 0], sizes = [1, 32], strides = [1, 1]} : vector<30x32xf32> to vector<1x32xf32>
    %964 = vector.extract_strided_slice %0 {offsets = [29, 0], sizes = [1, 32], strides = [1, 1]} : vector<30x32xf32> to vector<1x32xf32>
    %cst_217 = arith.constant dense<0.000000e+00> : vector<24xf32>
    %965 = vector.multi_reduction <add>, %962, %cst_217 [1] : vector<24x32xf32> to vector<24xf32>
    %966 = vector.shape_cast %965 : vector<24xf32> to vector<24x1xf32>
    %cst_218 = arith.constant 3.200000e+01 : f32
    %967 = vector.broadcast %cst_218 : f32 to vector<24x1xf32>
    %968 = arith.divf %966, %967 : vector<24x1xf32>
    %969 = vector.broadcast %968 : vector<24x1xf32> to vector<24x32xf32>
    %970 = arith.subf %962, %969 : vector<24x32xf32>
    %971 = arith.mulf %970, %970 : vector<24x32xf32>
    %cst_219 = arith.constant dense<0.000000e+00> : vector<24xf32>
    %972 = vector.multi_reduction <add>, %971, %cst_219 [1] : vector<24x32xf32> to vector<24xf32>
    %973 = vector.shape_cast %972 : vector<24xf32> to vector<24x1xf32>
    %cst_220 = arith.constant 3.200000e+01 : f32
    %974 = vector.broadcast %cst_220 : f32 to vector<24x1xf32>
    %975 = arith.divf %973, %974 : vector<24x1xf32>
    %cst_221 = arith.constant 9.99999974E-6 : f32
    %976 = vector.broadcast %cst_221 : f32 to vector<24x1xf32>
    %977 = arith.addf %975, %976 : vector<24x1xf32>
    %978 = math.rsqrt %977 : vector<24x1xf32>
    %979 = vector.broadcast %978 : vector<24x1xf32> to vector<24x32xf32>
    %980 = arith.mulf %970, %979 : vector<24x32xf32>
    %981 = vector.broadcast %963 : vector<1x32xf32> to vector<24x32xf32>
    %982 = arith.mulf %981, %980 : vector<24x32xf32>
    %983 = vector.broadcast %964 : vector<1x32xf32> to vector<24x32xf32>
    %984 = arith.addf %982, %983 : vector<24x32xf32>
    %cst_222 = arith.constant 0.000000e+00 : f32
    %985 = vector.broadcast %cst_222 : f32 to vector<24x32xf32>
    %986 = arith.maximumf %984, %985 : vector<24x32xf32>
    %987 = tpu.concatenate %956, %986 in 1 : vector<24x32xf32>, vector<24x32xf32> -> vector<24x64xf32>
    %c0_223 = arith.constant 0 : index
    %c0_224 = arith.constant 0 : index
    %988 = vector.load %arg4[%c0_223, %c0_224] : memref<64x4xf32, #tpu.memory_space<vmem>>, vector<64x4xf32>
    %cst_225 = arith.constant dense<0.000000e+00> : vector<24x4xf32>
    %989 = tpu.matmul %987, %988, %cst_225 {dimension_numbers = #tpu.dot_dimension_numbers<[1], [0], [0], [1], [0, 0, 1, 1], [], []>} : vector<24x64xf32>, vector<64x4xf32>, vector<24x4xf32> -> vector<24x4xf32>
    %c0_226 = arith.constant 0 : index
    %c0_227 = arith.constant 0 : index
    %990 = vector.load %arg3[%c0_226, %c0_227] : memref<1x4xf32, #tpu.memory_space<vmem>>, vector<1x4xf32>
    %991 = vector.broadcast %990 : vector<1x4xf32> to vector<24x4xf32>
    %992 = arith.addf %989, %991 : vector<24x4xf32>
    %993 = vector.extract_strided_slice %992 {offsets = [0, 0], sizes = [24, 2], strides = [1, 1]} : vector<24x4xf32> to vector<24x2xf32>
    %994 = vector.extract_strided_slice %992 {offsets = [0, 2], sizes = [24, 2], strides = [1, 1]} : vector<24x4xf32> to vector<24x2xf32>
    %cst_228 = arith.constant 0.000000e+00 : f32
    %995 = vector.broadcast %cst_228 : f32 to vector<24x2xf32>
    %996 = arith.cmpf ogt, %994, %995 : vector<24x2xf32>
    %cst_229 = arith.constant 1.000000e+00 : f32
    %997 = vector.broadcast %cst_229 : f32 to vector<24x2xf32>
    %998 = arith.addf %994, %997 : vector<24x2xf32>
    %999 = math.exp %994 : vector<24x2xf32>
    %1000 = arith.select %996, %998, %999 : vector<24x2xi1>, vector<24x2xf32>
    %cst_230 = arith.constant 1.000000e-03 : f32
    %1001 = vector.broadcast %cst_230 : f32 to vector<24x2xf32>
    %1002 = arith.addf %1000, %1001 : vector<24x2xf32>
    %1003 = tpu.concatenate %559, %528, %526, %925 in 1 : vector<2x32xf32>, vector<2x32xf32>, vector<2x32xf32>, vector<2x32xf32> -> vector<2x128xf32>
    %c0_231 = arith.constant 0 : index
    %c0_232 = arith.constant 0 : index
    %1004 = vector.load %arg14[%c0_231, %c0_232] : memref<2x128xf32, #tpu.memory_space<vmem>>, vector<2x128xf32>
    tpu.vector_store %arg14[%c0_231, %c0_232], %1003 {strides = array<i32>} : memref<2x128xf32, #tpu.memory_space<vmem>>, vector<2x128xf32>,
    %1005 = tpu.concatenate %993, %1002 in 1 : vector<24x2xf32>, vector<24x2xf32> -> vector<24x4xf32>
    %c0_233 = arith.constant 0 : index
    %c0_234 = arith.constant 0 : index
    %1006 = vector.load %arg15[%c0_233, %c0_234] : memref<24x4xf32, #tpu.memory_space<vmem>>, vector<24x4xf32>
    tpu.vector_store %arg15[%c0_233, %c0_234], %1005 {strides = array<i32>} : memref<24x4xf32, #tpu.memory_space<vmem>>, vector<24x4xf32>,
    return
  }
}

</mosaic_0001>

<bundles_post_ra>
// kernel: encoder_trainer_forward.1
= control target key start
LH: loop header
LB: loop body
LE: loop exit
PB: predicated region body
PF: predicated region fallthrough
CT: control target
= control target key end

     0   :  { %21 = vsyncpa [#allocation3], 0  ;;  %s10146_s0 = inlined_call_operand.hbm [shape: f32[6,32], index: 0, kind: input, shape index: {}]   ;;  %s10147_s1 = inlined_call_operand.hbm [shape: f32[2,32,32], index: 1, kind: input, shape index: {}]   ;;  %s10148_s2 = inlined_call_operand.hbm [shape: f32[2,32,32], index: 2, kind: input, shape index: {}]   ;;  %s10149_s3 = inlined_call_operand.hbm [shape: f32[1,4], index: 3, kind: input, shape index: {}]   ;;  %s10150_s4 = inlined_call_operand.vmem [shape: f32[64,4], index: 4, kind: input, shape index: {}]   ;;  %s10151_s5 = inlined_call_operand.hbm [shape: f32[2,1,128], index: 5, kind: input, shape index: {}]   ;;  %s10152_s6 = inlined_call_operand.hbm [shape: f32[2,32,128], index: 6, kind: input, shape index: {}]   ;;  %s10153_s7 = inlined_call_operand.hbm [shape: f32[2,32,128], index: 7, kind: input, shape index: {}]   ;;  %s10154_s8 = inlined_call_operand.vmem [shape: f32[5,32,32], index: 8, kind: input, shape index: {}]   ;;  %s10155_s9 = inlined_call_operand.hbm [shape: f32[2,32,32], index: 9, kind: input, shape index: {}]   ;;  %s10156_s10 = inlined_call_operand.hbm [shape: f32[2,1,96], index: 10, kind: input, shape index: {}]   ;;  %s10157_s11 = inlined_call_operand.hbm [shape: f32[2,32,96], index: 11, kind: input, shape index: {}]   ;;  %s10158_s12 = inlined_call_operand.vmem [shape: f32[30,32], index: 12, kind: input, shape index: {}]   ;;  %s10159_s13 = inlined_call_operand.vmem [shape: f32[16,6], index: 13, kind: input, shape index: {}]   ;;  %s10160_s14 = inlined_call_operand.vmem [shape: f32[2,128], index: 14, kind: output, shape index: {0}]   ;;  %s10161_s15 = inlined_call_operand.vmem [shape: f32[24,4], index: 15, kind: output, shape index: {1}]  }
   0x1   :  { %22 = vsyncpa [#allocation5], 0 }
   0x2   :  { %23 = vsyncpa [#allocation8], 0 }
   0x3   :  { %24 = vsyncpa [#allocation11], 0 }
   0x4   :  { %25 = vsyncpa [#allocation14], 0 }
   0x5   :  { %26 = vsyncpa [#allocation17], 0  ;;  %s8796_s18 = smov [#allocation4]  }
   0x6   :  { %s42_s19 = sshll.u32 %s8796_s18, 4  ;;  %s43_s19 = int_to_ptr.vmem [resolvable:$true] %s42_s19 }
   0x7   :  { %s8592_s20 = scalar_lea.vmem %s43_s19, 1024  ;;  %p8597_p1 = scmp.lt.s32.totalorder %s43_s19, %s43_s19 }
   0x8   :  { %p8593_p0 = scmp.ne.s32.totalorder %s43_s19, %s8592_s20  ;;  %p8598_p2 = scmp.lt.s32.totalorder %s8592_s20, %s8592_s20 }
   0xa   :  { %p8599_p3 = por %p8598_p2, %p8597_p1 }
   0xc   :  { %p8600_p4 = pnand %p8599_p3, %p8593_p0 }
   0xe   :  { %8603 = shalt.err (!%p8600_p4)
}
   0xf   :  { %s8797_s21 = smov 128   ;;  %s8798_s22 = smov 8  }
  0x10   :  { %48 = dma.hbm_to_vmem [thread:$0]  %s10147_s1, 1024, %s43_s19, [#allocation5], %s8797_s21, %s8797_s21, %s8798_s22  }
  0x11   :  { %s8799_s25 = smov [#allocation7]   ;;  %s8800_s27 = smov [#allocation10]  }
  0x12   :  { %s67_s26 = sshll.u32 %s8799_s25, 4  ;;  %s90_s28 = sshll.u32 %s8800_s27, 4  ;;  %s68_s26 = int_to_ptr.vmem [resolvable:$true] %s67_s26  ;;  %s91_s28 = int_to_ptr.vmem [resolvable:$true] %s90_s28 }
  0x13   :  { %s8612_s29 = scalar_lea.vmem %s68_s26, 16  ;;  %s8616_s30 = scalar_lea.vmem %s68_s26, 32 }
  0x14   :  { %p8613_p5 = scmp.ne.s32.totalorder %s68_s26, %s8612_s29  ;;  %p8617_p6 = scmp.lt.s32.totalorder %s68_s26, %s68_s26 }
  0x15   :  { %p8618_p7 = scmp.lt.s32.totalorder %s8616_s30, %s8612_s29 }
  0x17   :  { %p8619_p8 = por %p8618_p7, %p8617_p6 }
  0x19   :  { %p8620_p9 = pnand %p8619_p8, %p8613_p5 }
  0x1b   :  { %8623 = shalt.err (!%p8620_p9)
}
  0x1c   :  { %70 = dma.hbm_to_vmem [thread:$0]  %s10149_s3, 16, %s68_s26, [#allocation8]  }
  0x1d   :  { %s8632_s18 = scalar_lea.vmem %s91_s28, 1024  ;;  %p8637_p11 = scmp.lt.s32.totalorder %s91_s28, %s91_s28 }
  0x1e   :  { %p8633_p10 = scmp.ne.s32.totalorder %s91_s28, %s8632_s18  ;;  %p8638_p12 = scmp.lt.s32.totalorder %s8632_s18, %s8632_s18 }
  0x20   :  { %p8639_p13 = por %p8638_p12, %p8637_p11 }
  0x22   :  { %p8640_p0 = pnand %p8639_p13, %p8633_p10 }
  0x24   :  { %8643 = shalt.err (!%p8640_p0)
}
  0x25   :  { %96 = dma.hbm_to_vmem [thread:$0]  %s10152_s6, 1024, %s91_s28, [#allocation11], %s8797_s21, %s8797_s21, %s8798_s22  }
  0x26   :  { %s8801_s20 = smov [#allocation13]   ;;  %s8802_s24 = smov [#allocation2]  }
  0x27   :  { %s116_s23 = sshll.u32 %s8801_s20, 4  ;;  %s33_s3 = sshll.u32 %s8802_s24, 4  ;;  %s117_s23 = int_to_ptr.vmem [resolvable:$true] %s116_s23  ;;  %s34_s3 = int_to_ptr.vmem [resolvable:$true] %s33_s3 }
  0x28   :  { %s8652_s25 = scalar_lea.vmem %s117_s23, 1024  ;;  %p8657_p2 = scmp.lt.s32.totalorder %s117_s23, %s117_s23 }
  0x29   :  { %p8653_p1 = scmp.ne.s32.totalorder %s117_s23, %s8652_s25  ;;  %p8658_p3 = scmp.lt.s32.totalorder %s8652_s25, %s8652_s25 }
  0x2b   :  { %p8659_p4 = por %p8658_p3, %p8657_p2 }
  0x2d   :  { %p8660_p5 = pnand %p8659_p4, %p8653_p1 }
  0x2f   :  { %8663 = shalt.err (!%p8660_p5)
}
  0x30   :  { %122 = dma.hbm_to_vmem [thread:$0]  %s10155_s9, 1024, %s117_s23, [#allocation14], %s8797_s21, %s8797_s21, %s8798_s22  }
  0x31   :  { %s8672_s6 = scalar_lea.vmem %s34_s3, 128  ;;  %p8677_p7 = scmp.lt.s32.totalorder %s34_s3, %s34_s3 }
  0x32   :  { %p8673_p6 = scmp.ne.s32.totalorder %s34_s3, %s8672_s6  ;;  %p8678_p8 = scmp.lt.s32.totalorder %s8672_s6, %s8672_s6 }
  0x34   :  { %p8679_p9 = por %p8678_p8, %p8677_p7 }
  0x36   :  { %p8680_p10 = pnand %p8679_p9, %p8673_p6 }
  0x38   :  { %8683 = shalt.err (!%p8680_p10)
}
  0x39   :  { %36 = dma.hbm_to_vmem [thread:$0]  %s10146_s0, 128, %s34_s3, [#allocation3]  }
  0x3a   :  { %s8803_s30 = smov [#allocation6]   ;;  %s8804_s17 = smov [#allocation9]  }
  0x3b   :  { %s54_s16 = sshll.u32 %s8803_s30, 4  ;;  %s78_s18 = sshll.u32 %s8804_s17, 4  ;;  %s55_s16 = int_to_ptr.vmem [resolvable:$true] %s54_s16  ;;  %s79_s18 = int_to_ptr.vmem [resolvable:$true] %s78_s18 }
  0x3c   :  { %s8692_s1 = scalar_lea.vmem %s55_s16, 1024  ;;  %p8697_p12 = scmp.lt.s32.totalorder %s55_s16, %s55_s16 }
  0x3d   :  { %p8693_p11 = scmp.ne.s32.totalorder %s55_s16, %s8692_s1  ;;  %p8698_p13 = scmp.lt.s32.totalorder %s8692_s1, %s8692_s1 }
  0x3f   :  { %p8699_p0 = por %p8698_p13, %p8697_p12 }
  0x41   :  { %p8700_p1 = pnand %p8699_p0, %p8693_p11 }
  0x43   :  { %8703 = shalt.err (!%p8700_p1)
}
  0x44   :  { %60 = dma.hbm_to_vmem [thread:$0]  %s10148_s2, 1024, %s55_s16, [#allocation5], %s8797_s21, %s8797_s21, %s8798_s22  }
  0x45   :  { %s8712_s0 = scalar_lea.vmem %s79_s18, 32  ;;  %p8717_p3 = scmp.lt.s32.totalorder %s79_s18, %s79_s18 }
  0x46   :  { %p8713_p2 = scmp.ne.s32.totalorder %s79_s18, %s8712_s0  ;;  %p8718_p4 = scmp.lt.s32.totalorder %s8712_s0, %s8712_s0 }
  0x48   :  { %p8719_p5 = por %p8718_p4, %p8717_p3 }
  0x4a   :  { %p8720_p6 = pnand %p8719_p5, %p8713_p2 }
  0x4c   :  { %8723 = shalt.err (!%p8720_p6)
}
  0x4d   :  { %s8805_s20 = smov 16   ;;  %s8806_s23 = smov 1  }
  0x4e   :  { %84 = dma.hbm_to_vmem [thread:$0]  %s10151_s5, 32, %s79_s18, [#allocation8], %s8805_s20, %s8805_s20, %s8806_s23  }
  0x4f   :  { %s8807_s25 = smov [#allocation12]   ;;  %s8808_s2 = smov [#allocation15]  }
  0x50   :  { %s102_s26 = sshll.u32 %s8807_s25, 4  ;;  %s128_s27 = sshll.u32 %s8808_s2, 4  ;;  %s103_s26 = int_to_ptr.vmem [resolvable:$true] %s102_s26  ;;  %s129_s27 = int_to_ptr.vmem [resolvable:$true] %s128_s27 }
  0x51   :  { %s8732_s6 = scalar_lea.vmem %s103_s26, 1024  ;;  %p8737_p8 = scmp.lt.s32.totalorder %s103_s26, %s103_s26 }
  0x52   :  { %p8733_p7 = scmp.ne.s32.totalorder %s103_s26, %s8732_s6  ;;  %p8738_p9 = scmp.lt.s32.totalorder %s8732_s6, %s8732_s6 }
  0x54   :  { %p8739_p10 = por %p8738_p9, %p8737_p8 }
  0x56   :  { %p8740_p11 = pnand %p8739_p10, %p8733_p7 }
  0x58   :  { %8743 = shalt.err (!%p8740_p11)
}
  0x59   :  { %108 = dma.hbm_to_vmem [thread:$0]  %s10153_s7, 1024, %s103_s26, [#allocation11], %s8797_s21, %s8797_s21, %s8798_s22  }
  0x5a   :  { %s8752_s5 = scalar_lea.vmem %s129_s27, 32  ;;  %p8757_p13 = scmp.lt.s32.totalorder %s129_s27, %s129_s27 }
  0x5b   :  { %p8753_p12 = scmp.ne.s32.totalorder %s129_s27, %s8752_s5  ;;  %p8758_p0 = scmp.lt.s32.totalorder %s8752_s5, %s8752_s5 }
  0x5d   :  { %p8759_p1 = por %p8758_p0, %p8757_p13 }
  0x5f   :  { %p8760_p2 = pnand %p8759_p1, %p8753_p12 }
  0x61   :  { %8763 = shalt.err (!%p8760_p2)
}
  0x62   :  { %134 = dma.hbm_to_vmem [thread:$0]  %s10156_s10, 32, %s129_s27, [#allocation14], %s8805_s20, %s8805_s20, %s8806_s23  }
  0x63   :  { %s8809_s17 = smov [#allocation16]  }
  0x64   :  { %s140_s18 = sshll.u32 %s8809_s17, 4  ;;  %s141_s18 = int_to_ptr.vmem [resolvable:$true] %s140_s18 }
  0x65   :  { %s8772_s1 = scalar_lea.vmem %s141_s18, 1024  ;;  %p8777_p4 = scmp.lt.s32.totalorder %s141_s18, %s141_s18 }
  0x66   :  { %p8773_p3 = scmp.ne.s32.totalorder %s141_s18, %s8772_s1  ;;  %p8778_p5 = scmp.lt.s32.totalorder %s8772_s1, %s8772_s1 }
  0x68   :  { %p8779_p6 = por %p8778_p5, %p8777_p4 }
  0x6a   :  { %p8780_p7 = pnand %p8779_p6, %p8773_p3 }
  0x6c   :  { %8783 = shalt.err (!%p8780_p7)
}
  0x6d   :  { %146 = dma.hbm_to_vmem [thread:$0]  %s10157_s11, 1024, %s141_s18, [#allocation17], %s8797_s21, %s8797_s21, %s8798_s22  }
  0x6e   :  { %8784 = dma.done.wait [#allocation3], 128  }
  0x6f   :  { %8785 = vsyncadd [#allocation3], 4294967168 }
  0x70   :  { %8786 = dma.done.wait [#allocation5], 2048  }
  0x71   :  { %8787 = vsyncadd [#allocation5], 4294965248 }
  0x72   :  { %8788 = dma.done.wait [#allocation8], 48  }
  0x73   :  { %8789 = vsyncadd [#allocation8], 4294967248 }
  0x74   :  { %8790 = dma.done.wait [#allocation11], 2048  }
  0x75   :  { %8791 = vsyncadd [#allocation11], 4294965248 }
  0x76   :  { %8792 = dma.done.wait [#allocation14], 1056  }
  0x77   :  { %8793 = vsyncadd [#allocation14], 4294966240 }
  0x78   :  { %8794 = dma.done.wait [#allocation17], 1024  }
  0x79   :  { %8795 = vsyncadd [#allocation17], 4294966272  ;;  %vm199_vm0 = vcmask 1045504   ;;  %vm192_vm1 = vcmask 48128   ;;  %v187_v0 = vld [vmem:[#allocation2] sm:$0x3f]  ;;  %v188_v7 = vlaneseq }
  0x7a   :  { %v185_v1 = vld [vmem:[%s10159_s13] sm:$0xff]  ;;  %v186_v2 = vld [vmem:[%s10159_s13 + $0x8] sm:$0xff]  ;;  %7642 = vmatprep.subr.msk.mxu0 %vm199_vm0, %v187_v0  ;;  %v281_v3 = vld [vmem:[%s10154_s8 + $0x18] sm:$0xff]  ;;  %vm286_vm2 = vcmask 261120   ;;  %v8810_v61 = vmov 0.0   ;;  %vm8811_vm3 = vmmov 0  }
  0x7b   :  { %7644 = vmatprep.mubr.msk.f32.mxu0 %vm192_vm1, %v185_v1  ;;  %7643 = vmatpush3.msk.msra.mxu0 %vm199_vm0, %v187_v0  ;;  %v280_v4 = vld [vmem:[%s10154_s8 + $0x10] sm:$0xff]  ;;  %v279_v5 = vld [vmem:[%s10154_s8 + $0x8] sm:$0xff]  ;;  %v278_v6 = vld [vmem:[%s10154_s8] sm:$0xff]  ;;  %v8971_v8 = vshrl.u32 %v188_v7, 7  ;;  %s8812_s28 = smov 120   ;;  %s8813_s29 = smov 112  }
  0x7c   :  { %7647 = vmatprep.subr.mxu1 %v281_v3  ;;  %7645 = vmatmul.mubr.msk.f32.vlgmr.msra.gmra.mxu0 %vm192_vm1, %v186_v2  ;;  %v8979_v10 = vld [vmem:[%s10158_s12] sm:$0xff]  ;;  %v412_v36 = vld [vmem:[#allocation16 + $0x8] sm:$0xff]  ;;  %v411_v37 = vld [vmem:[#allocation16] sm:$0xff]  ;;  %s8814_s5 = smov 104   ;;  %s8815_s30 = smov 96   ;;  %vm519_vm4 = vcmask 64512  }
  0x7d   :  { %7648 = vmatpush3.msra.mxu1 %v281_v3  ;;  %v8974_v9 = vsub.s32 0, %v8971_v8  ;;  %v8986_v16 = vsub.s32 1, %v8971_v8  ;;  %v414_v34 = vld [vmem:[#allocation16 + $0x18] sm:$0xff]  ;;  %v413_v35 = vld [vmem:[#allocation16 + $0x10] sm:$0xff]  ;;  %v8995_v44 = vsub.s32 2, %v8971_v8  ;;  %v8998_v45 = vsub.s32 3, %v8971_v8 }
  0x7e   :  { %7649 = vmatprep.subr.mxu1 %v280_v4  ;;  %7658 = vmatprep.subr.mxu0 %v414_v34  ;;  %v7230_v60 = vld [vmem:[#allocation15] ss:$0 sm:$0xff]  ;;  %s8816_s16 = smov 64   ;;  %s8817_s17 = smov 24   ;;  %vm1848_vm5 = vcmask 130048   ;;  %vm1851_vm6 = vcmask 195584  }
  0x7f   :  { %7650 = vmatpush3.msra.mxu1 %v280_v4  ;;  %v191_v11 = vrot.slane %v8979_v10, %v8974_v9  ;;  %v285_v18 = vrot.slane %v8979_v10, %v8986_v16  ;;  %7659 = vmatpush3.msra.mxu0 %v414_v34  ;;  %v398_v46 = vrot.slane %v8979_v10, %v8995_v44  ;;  %s8818_s7 = smov 32   ;;  %vm4225_vm7 = vcmask 1041409  }
  0x80   :  { %7651 = vmatprep.subr.mxu1 %v279_v5  ;;  %7660 = vmatprep.subr.mxu0 %v413_v35  ;;  %v404_v49 = vrot.slane %v8979_v10, %v8998_v45  ;;  %vm5288_vm8 = vcmask 254976   ;;  %vm6729_vm9 = vcmask 1041408   ;;  %vm6731_vm10 = vcmask 1043456  }
  0x81   :  { %7652 = vmatpush3.msra.mxu1 %v279_v5  ;;  %7661 = vmatpush3.msra.mxu0 %v413_v35  ;;  %vm7075_vm11 = vcmask 523264   ;;  %vm7203_vm13 = vcmask 15360   ;;  %vm7207_vm14 = vcmask 31744   ;;  %vm7200_vm1 = vcmask 785408  }
  0x82   :  { %7653 = vmatprep.subr.mxu1 %v278_v6  ;;  %7662 = vmatprep.subr.mxu0 %v412_v36 }
  0x83   :  { %7654 = vmatpush3.msra.mxu1 %v278_v6  ;;  %7663 = vmatpush3.msra.mxu0 %v412_v36 }
  0x84   :  { %7664 = vmatprep.subr.mxu0 %v411_v37  ;;  %7669 = vmatprep.subr.mxu1 %v8810_v61 }
  0x85   :  { %7665 = vmatpush3.msra.mxu0 %v411_v37 }
  0x86   :  { %7684 = vmatprep.subr.mxu0 %v8810_v61 }
 0x13c   :  { %v7646_v12 = vpop.f32.mrf.mxu0 }
 0x13d   :  { %v275_v15 = vadd.f32 %v7646_v12, %v191_v11 }
 0x13e   :  { %v269_v13 = vpop.f32.mrf.mxu0 }
 0x13f   :  { %v270_v14 = vadd.f32 %v269_v13, %v191_v11 }
 0x141   :  { %7655 = vmatprep.mubr.msk.f32.mxu1 %vm286_vm2, %v270_v14 }
 0x142   :  { %7656 = vmatmul.mubr.msk.f32.vlgmr.msra.gmra.mxu1 %vm286_vm2, %v275_v15 }
 0x143   :  { %7671 = vmatprep.mubr.msk.f32.mxu1 %vm8811_vm3, %v8810_v61 }
 0x202   :  { %v7657_v17 = vpop.f32.mrf.mxu1 }
 0x203   :  { %v365_v21 = vadd.f32 %v7657_v17, %v285_v18 }
 0x204   :  { %v359_v19 = vpop.f32.mrf.mxu1 }
 0x205   :  { %v360_v20 = vadd.f32 %v359_v19, %v285_v18  ;;  %v371_v23 = vsel %vm286_vm2, %v365_v21, 0.0 }
 0x207   :  { %v368_v22 = vsel %vm286_vm2, %v360_v20, 0.0 }
 0x208   :  { %369 = vadd.xlane.f32.xlu0 %v368_v22 }
 0x20c   :  { %372 = vadd.xlane.f32.xlu0 %v371_v23 }
 0x291   :  { %v370_v24 = vpop.xlane.xlu0 %369 }
 0x292   :  { %v375_v25 = vmul.f32 0.03125, %v370_v24 }
 0x294   :  { %v377_v26 = vsub.f32 %v360_v20, %v375_v25 }
 0x295   :  { %v373_v27 = vpop.xlane.xlu0 %372 }
 0x296   :  { %v376_v28 = vmul.f32 0.03125, %v373_v27  ;;  %v379_v29 = vmul.f32 %v377_v26, %v377_v26 }
 0x298   :  { %v378_v30 = vsub.f32 %v365_v21, %v376_v28  ;;  %v381_v31 = vsel %vm286_vm2, %v379_v29, 0.0 }
 0x299   :  { %382 = vadd.xlane.f32.xlu1 %v381_v31 }
 0x29a   :  { %v380_v32 = vmul.f32 %v378_v30, %v378_v30 }
 0x29c   :  { %v384_v33 = vsel %vm286_vm2, %v380_v32, 0.0 }
 0x29d   :  { %385 = vadd.xlane.f32.xlu1 %v384_v33 }
 0x322   :  { %v383_v38 = vpop.xlane.xlu1 %382 }
 0x323   :  { %v387_v39 = vmul.f32 0.03125, %v383_v38 }
 0x325   :  { %v389_v40 = vadd.f32 1e-05, %v387_v39 }
 0x326   :  { %v386_v41 = vpop.xlane.xlu1 %385 }
 0x327   :  { %8252 = vrsqrt.f32 %v389_v40  ;;  %v388_v42 = vmul.f32 0.03125, %v386_v41 }
 0x329   :  { %v390_v43 = vadd.f32 1e-05, %v388_v42 }
 0x32b   :  { %8254 = vrsqrt.f32 %v390_v43 }
 0x334   :  { %v8253_v47 = vpop.eup %8252 }
 0x335   :  { %v393_v48 = vmul.f32 %v8253_v47, %v377_v26 }
 0x337   :  { %v399_v50 = vmul.f32 %v398_v46, %v393_v48 }
 0x338   :  { %v8255_v51 = vpop.eup %8254 }
 0x339   :  { %v394_v52 = vmul.f32 %v8255_v51, %v378_v30  ;;  %v405_v53 = vadd.f32 %v404_v49, %v399_v50 }
 0x33b   :  { %v400_v54 = vmul.f32 %v398_v46, %v394_v52  ;;  %v407_v55 = vmax.f32 %v405_v53, 0.0 }
 0x33d   :  { %v406_v56 = vadd.f32 %v404_v49, %v400_v54  ;;  %v9004_v57 = vadd.f32 %v407_v55, %v270_v14 }
 0x33f   :  { %7666 = vmatprep.mubr.msk.f32.mxu0 %vm286_vm2, %v9004_v57  ;;  %v408_v58 = vmax.f32 %v406_v56, 0.0 }
 0x341   :  { %v9008_v59 = vadd.f32 %v408_v58, %v275_v15 }
 0x343   :  { %7667 = vmatmul.mubr.msk.f32.vlgmr.msra.gmra.mxu0 %vm286_vm2, %v9008_v59 }
 0x344   :  { %7686 = vmatprep.mubr.msk.f32.mxu0 %vm8811_vm3, %v8810_v61 }
 0x403   :  { %v7668_v62 = vpop.f32.mrf.mxu0 }
 0x404   :  { %v9014_v63 = vadd.f32 %v7668_v62, %v7230_v60 }
 0x405   :  { %v494_v0 = vpop.f32.mrf.mxu0 }
 0x406   :  { %v9020_v1 = vadd.f32 %v7230_v60, %v494_v0  ;;  %507 = vrot.lane.b32.xlu1 %v9014_v63, %s8812_s28 }
 0x408   :  { %505 = vrot.lane.b32.xlu0 %v9020_v1, %s8812_s28 }
 0x40a   :  { %509 = vrot.lane.b32.xlu1 %v9020_v1, %s8813_s29 }
 0x40c   :  { %513 = vrot.lane.b32.xlu0 %v9020_v1, %s8814_s5 }
 0x40e   :  { %511 = vrot.lane.b32.xlu1 %v9014_v63, %s8813_s29 }
 0x410   :  { %517 = vrot.lane.b32.xlu0 %v9020_v1, %s8815_s30 }
 0x412   :  { %515 = vrot.lane.b32.xlu1 %v9014_v63, %s8814_s5 }
 0x416   :  { %594 = vrot.lane.b32.xlu1 %v9014_v63, %s8815_s30 }
 0x478   :  { %v9038_v2 = vpop.permute.xlu1 %507 }
 0x479   :  { %746 = vrot.lane.b32.xlu1 %v9038_v2, %s8815_s30 }
 0x47a   :  { %v9042_v3 = vpop.permute.xlu0 %505 }
 0x47b   :  { %670 = vrot.lane.b32.xlu0 %v9042_v3, %s8815_s30 }
 0x47c   :  { %v9046_v4 = vpop.permute.xlu1 %509 }
 0x47e   :  { %v9048_v5 = vpop.permute.xlu0 %513 }
 0x47f   :  { %822 = vrot.lane.b32.xlu0 %v9046_v4, %s8815_s30 }
 0x480   :  { %v9052_v6 = vpop.permute.xlu1 %511 }
 0x481   :  { %898 = vrot.lane.b32.xlu1 %v9052_v6, %s8815_s30 }
 0x482   :  { %v518_v7 = vpop.permute.xlu0 %517 }
 0x483   :  { %974 = vrot.lane.b32.xlu0 %v9048_v5, %s8815_s30  ;;  %7670 = vmatpush3.xpose.msk.msra.mxu1 %vm519_vm4, %v518_v7 }
 0x484   :  { %v9059_v11 = vpop.permute.xlu1 %515  ;;  %7674 = vmatprep.subr.mxu1 %v8810_v61 }
 0x485   :  { %1050 = vrot.lane.b32.xlu1 %v9059_v11, %s8815_s30 }
 0x486   :  { %7672 = vmatmul.mubr.msk.f32.vlgmr.msra.gmra.mxu1 %vm519_vm4, %v9020_v1 }
 0x487   :  { %7676 = vmatprep.mubr.msk.f32.mxu1 %vm8811_vm3, %v8810_v61 }
 0x488   :  { %v595_v12 = vpop.permute.xlu1 %594 }
 0x489   :  { %7675 = vmatpush3.xpose.msk.msra.mxu1 %vm519_vm4, %v595_v12 }
 0x48a   :  { %7679 = vmatprep.subr.mxu1 %v8810_v61 }
 0x48c   :  { %7677 = vmatmul.mubr.msk.f32.vlgmr.msra.gmra.mxu1 %vm519_vm4, %v9014_v63 }
 0x48d   :  { %7681 = vmatprep.mubr.msk.f32.mxu1 %vm8811_vm3, %v8810_v61 }
 0x4eb   :  { %v747_v13 = vpop.permute.xlu1 %746 }
 0x4ec   :  { %7685 = vmatpush3.xpose.msk.msra.mxu0 %vm519_vm4, %v747_v13 }
 0x4ed   :  { %v671_v14 = vpop.permute.xlu0 %670  ;;  %7694 = vmatprep.subr.mxu0 %v8810_v61 }
 0x4ee   :  { %7680 = vmatpush3.xpose.msk.msra.mxu1 %vm519_vm4, %v671_v14 }
 0x4ef   :  { %7687 = vmatmul.mubr.msk.f32.vlgmr.msra.gmra.mxu0 %vm519_vm4, %v9038_v2  ;;  %7689 = vmatprep.subr.mxu1 %v8810_v61 }
 0x4f0   :  { %7696 = vmatprep.mubr.msk.f32.mxu0 %vm8811_vm3, %v8810_v61 }
 0x4f1   :  { %7682 = vmatmul.mubr.msk.f32.vlgmr.msra.gmra.mxu1 %vm519_vm4, %v9042_v3  ;;  %v823_v15 = vpop.permute.xlu0 %822 }
 0x4f2   :  { %7690 = vmatpush3.xpose.msk.msra.mxu1 %vm519_vm4, %v823_v15  ;;  %7691 = vmatprep.mubr.msk.f32.mxu1 %vm8811_vm3, %v8810_v61 }
 0x4f3   :  { %v899_v17 = vpop.permute.xlu1 %898  ;;  %7699 = vmatprep.subr.mxu1 %v8810_v61 }
 0x4f4   :  { %7695 = vmatpush3.xpose.msk.msra.mxu0 %vm519_vm4, %v899_v17 }
 0x4f5   :  { %7692 = vmatmul.mubr.msk.f32.vlgmr.msra.gmra.mxu1 %vm519_vm4, %v9046_v4  ;;  %v975_v18 = vpop.permute.xlu0 %974  ;;  %7704 = vmatprep.subr.mxu0 %v8810_v61 }
 0x4f6   :  { %7700 = vmatpush3.xpose.msk.msra.mxu1 %vm519_vm4, %v975_v18  ;;  %7701 = vmatprep.mubr.msk.f32.mxu1 %vm8811_vm3, %v8810_v61 }
 0x4f7   :  { %7697 = vmatmul.mubr.msk.f32.vlgmr.msra.gmra.mxu0 %vm519_vm4, %v9052_v6  ;;  %v1051_v19 = vpop.permute.xlu1 %1050  ;;  %7709 = vmatprep.subr.mxu1 %v8810_v61 }
 0x4f8   :  { %7705 = vmatpush3.xpose.msk.msra.mxu0 %vm519_vm4, %v1051_v19  ;;  %7706 = vmatprep.mubr.msk.f32.mxu0 %vm8811_vm3, %v8810_v61 }
 0x4f9   :  { %7702 = vmatmul.mubr.msk.f32.vlgmr.msra.gmra.mxu1 %vm519_vm4, %v9048_v5  ;;  %7714 = vmatprep.subr.mxu0 %v8810_v61 }
 0x4fa   :  { %7711 = vmatprep.mubr.msk.f32.mxu1 %vm8811_vm3, %v8810_v61 }
 0x4fb   :  { %7707 = vmatmul.mubr.msk.f32.vlgmr.msra.gmra.mxu0 %vm519_vm4, %v9059_v11 }
 0x4fc   :  { %7716 = vmatprep.mubr.msk.f32.mxu0 %vm8811_vm3, %v8810_v61 }
 0x546   :  { %v590_v20 = vpop.f32.mrf.mxu1 }
 0x547   :  { %v1126_v21 = vsel %vm519_vm4, %v590_v20, -inf }
 0x548   :  { %1127 = vmax.xlane.f32.xlu0 %v1126_v21  ;;  %v7673_v22 = vpop.f32.mrf.mxu1 }
 0x54c   :  { %v666_v23 = vpop.f32.mrf.mxu1 }
 0x54d   :  { %v1129_v24 = vsel %vm519_vm4, %v666_v23, -inf }
 0x54e   :  { %1130 = vmax.xlane.f32.xlu1 %v1129_v24  ;;  %v7678_v25 = vpop.f32.mrf.mxu1 }
 0x5af   :  { %v818_v26 = vpop.f32.mrf.mxu0 }
 0x5b0   :  { %v1135_v27 = vsel %vm519_vm4, %v818_v26, -inf }
 0x5b1   :  { %v7688_v28 = vpop.f32.mrf.mxu0  ;;  %1136 = vmax.xlane.f32.xlu0 %v1135_v27  ;;  %v742_v29 = vpop.f32.mrf.mxu1 }
 0x5b2   :  { %v1132_v31 = vsel %vm519_vm4, %v742_v29, -inf }
 0x5b3   :  { %v7683_v30 = vpop.f32.mrf.mxu1 }
 0x5b5   :  { %1133 = vmax.xlane.f32.xlu0 %v1132_v31  ;;  %v894_v32 = vpop.f32.mrf.mxu1 }
 0x5b6   :  { %v1138_v36 = vsel %vm519_vm4, %v894_v32, -inf }
 0x5b7   :  { %v7693_v33 = vpop.f32.mrf.mxu1  ;;  %v970_v34 = vpop.f32.mrf.mxu0 }
 0x5b8   :  { %v1141_v35 = vsel %vm519_vm4, %v970_v34, -inf }
 0x5b9   :  { %v7698_v37 = vpop.f32.mrf.mxu0  ;;  %1142 = vmax.xlane.f32.xlu1 %v1141_v35  ;;  %1139 = vmax.xlane.f32.xlu0 %v1138_v36  ;;  %v1046_v38 = vpop.f32.mrf.mxu1 }
 0x5ba   :  { %v1144_v42 = vsel %vm519_vm4, %v1046_v38, -inf }
 0x5bb   :  { %v7703_v39 = vpop.f32.mrf.mxu1  ;;  %v1122_v40 = vpop.f32.mrf.mxu0 }
 0x5bc   :  { %v1147_v41 = vsel %vm519_vm4, %v1122_v40, -inf }
 0x5bd   :  { %v7708_v43 = vpop.f32.mrf.mxu0  ;;  %1148 = vmax.xlane.f32.xlu1 %v1147_v41  ;;  %1145 = vmax.xlane.f32.xlu0 %v1144_v42 }
 0x5ce   :  { %1290 = vrot.lane.b32.xlu1 %v9014_v63, %s8816_s16 }
 0x5d1   :  { %v1128_v46 = vpop.xlane.xlu0 %1127 }
 0x5d2   :  { %1366 = vrot.lane.b32.xlu1 %v9042_v3, %s8816_s16  ;;  %v1150_v47 = vsub.f32 %v590_v20, %v1128_v46 }
 0x5d3   :  { %1214 = vrot.lane.b32.xlu0 %v9020_v1, %s8816_s16 }
 0x5d4   :  { %v1158_v48 = vmul.f32 1.442695, %v1150_v47 }
 0x5d6   :  { %1442 = vrot.lane.b32.xlu1 %v9038_v2, %s8816_s16  ;;  %8256 = vpow2.f32 %v1158_v48 }
 0x5d7   :  { %1518 = vrot.lane.b32.xlu0 %v9046_v4, %s8816_s16  ;;  %v1131_v49 = vpop.xlane.xlu1 %1130 }
 0x5d8   :  { %v1151_v50 = vsub.f32 %v666_v23, %v1131_v49 }
 0x5da   :  { %1594 = vrot.lane.b32.xlu1 %v9052_v6, %s8816_s16  ;;  %v1160_v51 = vmul.f32 1.442695, %v1151_v50 }
 0x5dc   :  { %8258 = vpow2.f32 %v1160_v51 }
 0x5e3   :  { %v9130_v52 = vpop.eup %8256 }
 0x5e4   :  { %v1174_v53 = vsel %vm519_vm4, %v9130_v52, 0.0 }
 0x5e9   :  { %v9134_v54 = vpop.eup %8258 }
 0x5ea   :  { %v1177_v55 = vsel %vm519_vm4, %v9134_v54, 0.0 }
 0x5f6   :  { %1175 = vadd.xlane.f32.xlu0 %v1174_v53 }
 0x5fe   :  { %1178 = vadd.xlane.f32.xlu1 %v1177_v55 }
 0x63a   :  { %v1137_v56 = vpop.xlane.xlu0 %1136 }
 0x63b   :  { %v1153_v58 = vsub.f32 %v818_v26, %v1137_v56 }
 0x63d   :  { %v1164_v60 = vmul.f32 1.442695, %v1153_v58 }
 0x63e   :  { %v1134_v62 = vpop.xlane.xlu0 %1133 }
 0x63f   :  { %8260 = vpow2.f32 %v1164_v60  ;;  %v1152_v63 = vsub.f32 %v742_v29, %v1134_v62 }
 0x641   :  { %v1162_v0 = vmul.f32 1.442695, %v1152_v63 }
 0x642   :  { %v1143_v1 = vpop.xlane.xlu1 %1142  ;;  %v1140_v2 = vpop.xlane.xlu0 %1139 }
 0x643   :  { %8262 = vpow2.f32 %v1162_v0  ;;  %v1155_v3 = vsub.f32 %v970_v34, %v1143_v1  ;;  %v1154_v4 = vsub.f32 %v894_v32, %v1140_v2 }
 0x645   :  { %v1168_v6 = vmul.f32 1.442695, %v1155_v3  ;;  %v1166_v7 = vmul.f32 1.442695, %v1154_v4 }
 0x646   :  { %v1149_v12 = vpop.xlane.xlu1 %1148  ;;  %v1146_v13 = vpop.xlane.xlu0 %1145 }
 0x647   :  { %8264 = vpow2.f32 %v1168_v6  ;;  %v1157_v14 = vsub.f32 %v1122_v40, %v1149_v12  ;;  %v1156_v15 = vsub.f32 %v1046_v38, %v1146_v13  ;;  %v1856_v12 = vld [vmem:[#allocation13 + $0x10] sm:$0xff]  ;;  %v1855_v13 = vld [vmem:[#allocation13 + $0x8] sm:$0xff] }
 0x648   :  { %8266 = vpow2.f32 %v1166_v7  ;;  %v1857_v7 = vld [vmem:[#allocation13 + $0x18] sm:$0xff] }
 0x649   :  { %v1172_v17 = vmul.f32 1.442695, %v1157_v14  ;;  %v1170_v18 = vmul.f32 1.442695, %v1156_v15  ;;  %v1854_v15 = vld [vmem:[#allocation13] sm:$0xff] }
 0x64a   :  { %v1291_v19 = vpop.permute.xlu1 %1290  ;;  %v1215_v20 = vpop.permute.xlu0 %1214 }
 0x64b   :  { %8268 = vpow2.f32 %v1172_v17  ;;  %7710 = vmatpush3.msra.mxu1 %v1215_v20  ;;  %7715 = vmatpush3.msra.mxu0 %v1291_v19 }
 0x64c   :  { %v8261_v21 = vpop.eup %8260  ;;  %8270 = vpow2.f32 %v1170_v18  ;;  %7719 = vmatprep.subr.mxu1 %v8810_v61  ;;  %7724 = vmatprep.subr.mxu0 %v8810_v61 }
 0x64d   :  { %v1183_v22 = vsel %vm519_vm4, %v8261_v21, 0.0 }
 0x64e   :  { %1184 = vadd.xlane.f32.xlu1 %v1183_v22  ;;  %v1367_v33 = vpop.permute.xlu1 %1366  ;;  %v1519_v34 = vpop.permute.xlu0 %1518 }
 0x650   :  { %v8263_v23 = vpop.eup %8262 }
 0x651   :  { %v1180_v24 = vsel %vm519_vm4, %v8263_v23, 0.0 }
 0x652   :  { %1181 = vadd.xlane.f32.xlu0 %v1180_v24  ;;  %v1443_v35 = vpop.permute.xlu1 %1442 }
 0x654   :  { %v8265_v25 = vpop.eup %8264 }
 0x655   :  { %v8267_v26 = vpop.eup %8266  ;;  %v1189_v27 = vsel %vm519_vm4, %v8265_v25, 0.0 }
 0x656   :  { %1190 = vadd.xlane.f32.xlu1 %v1189_v27  ;;  %v1186_v28 = vsel %vm519_vm4, %v8267_v26, 0.0  ;;  %v1595_v37 = vpop.permute.xlu1 %1594 }
 0x657   :  { %1187 = vadd.xlane.f32.xlu0 %v1186_v28 }
 0x658   :  { %v9144_v29 = vpop.eup %8268 }
 0x659   :  { %v9146_v30 = vpop.eup %8270  ;;  %v1195_v31 = vsel %vm519_vm4, %v9144_v29, 0.0 }
 0x65a   :  { %1196 = vadd.xlane.f32.xlu1 %v1195_v31  ;;  %v1192_v32 = vsel %vm519_vm4, %v9146_v30, 0.0 }
 0x65b   :  { %1193 = vadd.xlane.f32.xlu0 %v1192_v32 }
 0x66b   :  { %1746 = vrot.lane.b32.xlu1 %v9059_v11, %s8816_s16 }
 0x671   :  { %1670 = vrot.lane.b32.xlu0 %v9048_v5, %s8816_s16 }
 0x67f   :  { %v1176_v36 = vpop.xlane.xlu0 %1175 }
 0x680   :  { %8272 = vrcp.f32 %v1176_v36 }
 0x687   :  { %v1179_v38 = vpop.xlane.xlu1 %1178 }
 0x688   :  { %8274 = vrcp.f32 %v1179_v38 }
 0x68d   :  { %v8273_v39 = vpop.eup %8272 }
 0x68e   :  { %v1199_v40 = vmul.f32 %v8273_v39, %v9130_v52 }
 0x690   :  { %7712 = vmatmul.mubr.msk.f32.vlgmr.msra.gmra.mxu1 %vm519_vm4, %v1199_v40  ;;  %v9199_v40 = vsub.s32 4, %v8971_v8 }
 0x691   :  { %7720 = vmatpush3.msra.mxu1 %v1367_v33  ;;  %7721 = vmatprep.mubr.msk.f32.mxu1 %vm8811_vm3, %v8810_v61 }
 0x692   :  { %7729 = vmatprep.subr.mxu1 %v8810_v61 }
 0x695   :  { %v8275_v5 = vpop.eup %8274 }
 0x696   :  { %v1201_v11 = vmul.f32 %v8275_v5, %v9134_v54  ;;  %v1861_v5 = vrot.slane %v8979_v10, %v9199_v40 }
 0x698   :  { %7717 = vmatmul.mubr.msk.f32.vlgmr.msra.gmra.mxu0 %vm519_vm4, %v1201_v11 }
 0x699   :  { %7725 = vmatpush3.msra.mxu0 %v1443_v35  ;;  %7726 = vmatprep.mubr.msk.f32.mxu0 %vm8811_vm3, %v8810_v61 }
 0x69a   :  { %7734 = vmatprep.subr.mxu0 %v8810_v61 }
 0x6d7   :  { %v1185_v41 = vpop.xlane.xlu1 %1184 }
 0x6d8   :  { %8276 = vrcp.f32 %v1185_v41 }
 0x6db   :  { %v1182_v42 = vpop.xlane.xlu0 %1181 }
 0x6dc   :  { %8278 = vrcp.f32 %v1182_v42 }
 0x6df   :  { %v1191_v43 = vpop.xlane.xlu1 %1190 }
 0x6e0   :  { %8280 = vrcp.f32 %v1191_v43  ;;  %v1188_v46 = vpop.xlane.xlu0 %1187 }
 0x6e1   :  { %8282 = vrcp.f32 %v1188_v46 }
 0x6e3   :  { %v1197_v47 = vpop.xlane.xlu1 %1196 }
 0x6e4   :  { %8284 = vrcp.f32 %v1197_v47  ;;  %v1194_v48 = vpop.xlane.xlu0 %1193 }
 0x6e5   :  { %v8277_v49 = vpop.eup %8276  ;;  %8286 = vrcp.f32 %v1194_v48 }
 0x6e6   :  { %v1205_v50 = vmul.f32 %v8277_v49, %v8261_v21 }
 0x6e7   :  { %v1747_v58 = vpop.permute.xlu1 %1746 }
 0x6e8   :  { %7727 = vmatmul.mubr.msk.f32.vlgmr.msra.gmra.mxu0 %vm519_vm4, %v1205_v50  ;;  %v1671_v62 = vpop.permute.xlu0 %1670 }
 0x6e9   :  { %v8279_v51 = vpop.eup %8278  ;;  %7735 = vmatpush3.msra.mxu0 %v1595_v37  ;;  %7736 = vmatprep.mubr.msk.f32.mxu0 %vm8811_vm3, %v8810_v61 }
 0x6ea   :  { %v1203_v52 = vmul.f32 %v8279_v51, %v8263_v23  ;;  %7744 = vmatprep.subr.mxu0 %v8810_v61 }
 0x6ec   :  { %7722 = vmatmul.mubr.msk.f32.vlgmr.msra.gmra.mxu1 %vm519_vm4, %v1203_v52 }
 0x6ed   :  { %v8281_v53 = vpop.eup %8280  ;;  %7730 = vmatpush3.msra.mxu1 %v1519_v34  ;;  %7731 = vmatprep.mubr.msk.f32.mxu1 %vm8811_vm3, %v8810_v61 }
 0x6ee   :  { %v8283_v54 = vpop.eup %8282  ;;  %7739 = vmatprep.subr.mxu1 %v8810_v61  ;;  %v1209_v55 = vmul.f32 %v8281_v53, %v8265_v25 }
 0x6ef   :  { %v1207_v56 = vmul.f32 %v8283_v54, %v8267_v26 }
 0x6f0   :  { %7737 = vmatmul.mubr.msk.f32.vlgmr.msra.gmra.mxu0 %vm519_vm4, %v1209_v55 }
 0x6f1   :  { %v8285_v60 = vpop.eup %8284  ;;  %7732 = vmatmul.mubr.msk.f32.vlgmr.msra.gmra.mxu1 %vm519_vm4, %v1207_v56  ;;  %7745 = vmatpush3.msra.mxu0 %v1747_v58 }
 0x6f2   :  { %v8287_v63 = vpop.eup %8286  ;;  %7740 = vmatpush3.msra.mxu1 %v1671_v62  ;;  %7741 = vmatprep.mubr.msk.f32.mxu1 %vm8811_vm3, %v8810_v61  ;;  %v1213_v0 = vmul.f32 %v8285_v60, %v9144_v29 }
 0x6f3   :  { %7746 = vmatprep.mubr.msk.f32.mxu0 %vm8811_vm3, %v8810_v61  ;;  %v1211_v1 = vmul.f32 %v8287_v63, %v9146_v30  ;;  %7749 = vmatprep.subr.mxu1 %v1857_v7  ;;  %v1986_v63 = vld [vmem:[#allocation4 + $0x18] sm:$0xff] }
 0x6f4   :  { %7747 = vmatmul.mubr.msk.f32.vlgmr.msra.gmra.mxu0 %vm519_vm4, %v1213_v0  ;;  %v1985_v0 = vld [vmem:[#allocation4 + $0x10] sm:$0xff]  ;;  %7760 = vmatprep.subr.mxu0 %v1986_v63 }
 0x6f5   :  { %7742 = vmatmul.mubr.msk.f32.vlgmr.msra.gmra.mxu1 %vm519_vm4, %v1211_v1  ;;  %7761 = vmatpush3.msra.mxu0 %v1986_v63  ;;  %v1984_v1 = vld [vmem:[#allocation4 + $0x8] sm:$0xff] }
 0x6f6   :  { %7750 = vmatpush3.msra.mxu1 %v1857_v7  ;;  %7762 = vmatprep.subr.mxu0 %v1985_v0  ;;  %v2205_v63 = vld [vmem:[#allocation16 + $0x28] sm:$0xff] }
 0x6f7   :  { %7751 = vmatprep.subr.mxu1 %v1856_v12  ;;  %7763 = vmatpush3.msra.mxu0 %v1985_v0  ;;  %v2204_v0 = vld [vmem:[#allocation16 + $0x20] sm:$0xff] }
 0x6f8   :  { %7752 = vmatpush3.msra.mxu1 %v1856_v12  ;;  %7764 = vmatprep.subr.mxu0 %v1984_v1 }
 0x6f9   :  { %7753 = vmatprep.subr.mxu1 %v1855_v13  ;;  %7765 = vmatpush3.msra.mxu0 %v1984_v1 }
 0x6fa   :  { %7754 = vmatpush3.msra.mxu1 %v1855_v13 }
 0x6fb   :  { %7755 = vmatprep.subr.mxu1 %v1854_v15 }
 0x6fc   :  { %7756 = vmatpush3.msra.mxu1 %v1854_v15  ;;  %v9213_v15 = vsub.s32 6, %v8971_v8 }
 0x750   :  { %v1286_v2 = vpop.f32.mrf.mxu1 }
 0x752   :  { %v7713_v3 = vpop.f32.mrf.mxu1 }
 0x758   :  { %v1362_v4 = vpop.f32.mrf.mxu0 }
 0x75a   :  { %v7718_v6 = vpop.f32.mrf.mxu0 }
 0x7a8   :  { %v1514_v14 = vpop.f32.mrf.mxu0 }
 0x7a9   :  { %1826 = vrot.lane.b32.xlu1 %v1514_v14, %s8798_s22  ;;  %v9210_v14 = vsub.s32 5, %v8971_v8 }
 0x7aa   :  { %v7728_v17 = vpop.f32.mrf.mxu0 }
 0x7ab   :  { %v1974_v17 = vrot.slane %v8979_v10, %v9210_v14 }
 0x7ac   :  { %v1438_v18 = vpop.f32.mrf.mxu1 }
 0x7ad   :  { %1824 = vrot.lane.b32.xlu0 %v1438_v18, %s8798_s22 }
 0x7ae   :  { %v7723_v19 = vpop.f32.mrf.mxu1 }
 0x7b0   :  { %v1666_v20 = vpop.f32.mrf.mxu0 }
 0x7b1   :  { %v1590_v21 = vpop.f32.mrf.mxu1  ;;  %1834 = vrot.lane.b32.xlu1 %v1666_v20, %s8805_s20  ;;  %v1980_v20 = vrot.slane %v8979_v10, %v9213_v15 }
 0x7b2   :  { %1832 = vrot.lane.b32.xlu0 %v1590_v21, %s8805_s20  ;;  %v7738_v22 = vpop.f32.mrf.mxu0 }
 0x7b3   :  { %v7733_v23 = vpop.f32.mrf.mxu1 }
 0x7b4   :  { %v1818_v24 = vpop.f32.mrf.mxu0 }
 0x7b5   :  { %v1742_v25 = vpop.f32.mrf.mxu1  ;;  %1842 = vrot.lane.b32.xlu1 %v1818_v24, %s8817_s17 }
 0x7b6   :  { %1840 = vrot.lane.b32.xlu0 %v1742_v25, %s8817_s17  ;;  %v7748_v26 = vpop.f32.mrf.mxu0 }
 0x7b7   :  { %v7743_v27 = vpop.f32.mrf.mxu1 }
 0x7b8   :  { %v2077_v27 = vld [vmem:[#allocation6 + $0x18] sm:$0xff] }
 0x7b9   :  { %7771 = vmatprep.subr.mxu1 %v2077_v27 }
 0x81b   :  { %v1827_v28 = vpop.permute.xlu1 %1826 }
 0x81c   :  { %v1847_v32 = vsel %vm519_vm4, %v1362_v4, %v1827_v28  ;;  %v2076_v28 = vld [vmem:[#allocation6 + $0x10] sm:$0xff] }
 0x81f   :  { %v1825_v29 = vpop.permute.xlu0 %1824 }
 0x820   :  { %v1846_v33 = vsel %vm519_vm4, %v1286_v2, %v1825_v29  ;;  %v1983_v2 = vld [vmem:[#allocation4] sm:$0xff]  ;;  %v2075_v29 = vld [vmem:[#allocation6 + $0x8] sm:$0xff] }
 0x821   :  { %7766 = vmatprep.subr.mxu0 %v1983_v2 }
 0x822   :  { %7767 = vmatpush3.msra.mxu0 %v1983_v2 }
 0x823   :  { %v1835_v30 = vpop.permute.xlu1 %1834 }
 0x824   :  { %v1833_v31 = vpop.permute.xlu0 %1832  ;;  %v1850_v34 = vsel %vm1848_vm5, %v1847_v32, %v1835_v30  ;;  %v2074_v30 = vld [vmem:[#allocation6] sm:$0xff] }
 0x825   :  { %v1849_v36 = vsel %vm1848_vm5, %v1846_v33, %v1833_v31  ;;  %v9223_v31 = vsub.s32 7, %v8971_v8  ;;  %v9234_v8 = vld [vmem:[%s10158_s12 + $0x8] sm:$0xff] }
 0x827   :  { %v1843_v35 = vpop.permute.xlu1 %1842  ;;  %v1990_v32 = vrot.slane %v8979_v10, %v9223_v31  ;;  %v2081_v10 = vrot.slane %v9234_v8, %v8974_v9 }
 0x828   :  { %v1853_v37 = vsel %vm1851_vm6, %v1850_v34, %v1843_v35  ;;  %v1841_v38 = vpop.permute.xlu0 %1840 }
 0x829   :  { %v1852_v39 = vsel %vm1851_vm6, %v1849_v36, %v1841_v38 }
 0x82a   :  { %7757 = vmatprep.mubr.msk.f32.mxu1 %vm286_vm2, %v1852_v39 }
 0x82b   :  { %7758 = vmatmul.mubr.msk.f32.vlgmr.msra.gmra.mxu1 %vm286_vm2, %v1853_v37 }
 0x82c   :  { %7772 = vmatpush3.msra.mxu1 %v2077_v27 }
 0x82d   :  { %7773 = vmatprep.subr.mxu1 %v2076_v28 }
 0x82e   :  { %7774 = vmatpush3.msra.mxu1 %v2076_v28 }
 0x82f   :  { %7775 = vmatprep.subr.mxu1 %v2075_v29 }
 0x830   :  { %7776 = vmatpush3.msra.mxu1 %v2075_v29 }
 0x831   :  { %7777 = vmatprep.subr.mxu1 %v2074_v30 }
 0x832   :  { %7778 = vmatpush3.msra.mxu1 %v2074_v30 }
 0x833   :  { %7793 = vmatprep.subr.mxu1 %v8810_v61 }
 0x8eb   :  { %v7759_v11 = vpop.f32.mrf.mxu1 }
 0x8ec   :  { %v1940_v41 = vadd.f32 %v7759_v11, %v1861_v5 }
 0x8ed   :  { %v1934_v42 = vpop.f32.mrf.mxu1 }
 0x8ee   :  { %v1935_v43 = vadd.f32 %v1934_v42, %v1861_v5  ;;  %v1944_v46 = vadd.f32 %v1940_v41, %v9008_v59 }
 0x8f0   :  { %v1948_v47 = vsel %vm286_vm2, %v1944_v46, 0.0  ;;  %v1943_v48 = vadd.f32 %v1935_v43, %v9004_v57 }
 0x8f1   :  { %1949 = vadd.xlane.f32.xlu1 %v1948_v47 }
 0x8f2   :  { %v1945_v49 = vsel %vm286_vm2, %v1943_v48, 0.0 }
 0x8f3   :  { %1946 = vadd.xlane.f32.xlu0 %v1945_v49 }
 0x97a   :  { %v1950_v50 = vpop.xlane.xlu1 %1949 }
 0x97b   :  { %v1952_v51 = vmul.f32 0.03125, %v1950_v50 }
 0x97c   :  { %v1947_v52 = vpop.xlane.xlu0 %1946 }
 0x97d   :  { %v1951_v53 = vmul.f32 0.03125, %v1947_v52  ;;  %v1954_v54 = vsub.f32 %v1944_v46, %v1952_v51 }
 0x97f   :  { %v1953_v55 = vsub.f32 %v1943_v48, %v1951_v53  ;;  %v1956_v60 = vmul.f32 %v1954_v54, %v1954_v54 }
 0x981   :  { %v1955_v56 = vmul.f32 %v1953_v55, %v1953_v55  ;;  %v1960_v62 = vsel %vm286_vm2, %v1956_v60, 0.0  ;;  %v2207_v60 = vld [vmem:[#allocation16 + $0x38] sm:$0xff] }
 0x982   :  { %7782 = vmatprep.subr.mxu0 %v2207_v60 }
 0x983   :  { %v1957_v58 = vsel %vm286_vm2, %v1955_v56, 0.0 }
 0x984   :  { %1958 = vadd.xlane.f32.xlu0 %v1957_v58 }
 0x988   :  { %1961 = vadd.xlane.f32.xlu0 %v1960_v62  ;;  %v2206_v62 = vld [vmem:[#allocation16 + $0x30] sm:$0xff] }
 0xa0d   :  { %v1959_v3 = vpop.xlane.xlu0 %1958 }
 0xa0e   :  { %v1963_v4 = vmul.f32 0.03125, %v1959_v3 }
 0xa10   :  { %v1965_v6 = vadd.f32 1e-05, %v1963_v4 }
 0xa11   :  { %v1962_v7 = vpop.xlane.xlu0 %1961 }
 0xa12   :  { %8288 = vrsqrt.f32 %v1965_v6  ;;  %v1964_v12 = vmul.f32 0.03125, %v1962_v7 }
 0xa14   :  { %v1966_v13 = vadd.f32 1e-05, %v1964_v12 }
 0xa16   :  { %8290 = vrsqrt.f32 %v1966_v13  ;;  %v2194_v13 = vrot.slane %v9234_v8, %v8986_v16 }
 0xa1f   :  { %v8289_v18 = vpop.eup %8288 }
 0xa20   :  { %v1969_v19 = vmul.f32 %v8289_v18, %v1953_v55 }
 0xa22   :  { %v1975_v21 = vmul.f32 %v1974_v17, %v1969_v19 }
 0xa23   :  { %v8291_v22 = vpop.eup %8290 }
 0xa24   :  { %v1970_v23 = vmul.f32 %v8291_v22, %v1954_v54  ;;  %v1981_v24 = vadd.f32 %v1980_v20, %v1975_v21  ;;  %v2200_v21 = vrot.slane %v9234_v8, %v8995_v44 }
 0xa26   :  { %v1976_v25 = vmul.f32 %v1974_v17, %v1970_v23  ;;  %7768 = vmatprep.mubr.msk.f32.mxu0 %vm286_vm2, %v1981_v24 }
 0xa28   :  { %v1982_v26 = vadd.f32 %v1980_v20, %v1976_v25  ;;  %v7263_v25 = vld [vmem:[#allocation15 + $0x1] ss:$0 sm:$0xff] }
 0xa2a   :  { %7769 = vmatmul.mubr.msk.f32.vlgmr.msra.gmra.mxu0 %vm286_vm2, %v1982_v26 }
 0xa2b   :  { %7783 = vmatpush3.msra.mxu0 %v2207_v60 }
 0xa2c   :  { %7784 = vmatprep.subr.mxu0 %v2206_v62 }
 0xa2d   :  { %7785 = vmatpush3.msra.mxu0 %v2206_v62 }
 0xa2e   :  { %7786 = vmatprep.subr.mxu0 %v2205_v63 }
 0xa2f   :  { %7787 = vmatpush3.msra.mxu0 %v2205_v63 }
 0xa30   :  { %7788 = vmatprep.subr.mxu0 %v2204_v0 }
 0xa31   :  { %7789 = vmatpush3.msra.mxu0 %v2204_v0 }
 0xa32   :  { %7798 = vmatprep.subr.mxu0 %v8810_v61 }
 0xaea   :  { %v7770_v33 = vpop.f32.mrf.mxu0 }
 0xaeb   :  { %v2069_v34 = vadd.f32 %v7770_v33, %v1990_v32 }
 0xaec   :  { %v2063_v35 = vpop.f32.mrf.mxu0 }
 0xaed   :  { %v2064_v36 = vadd.f32 %v2063_v35, %v1990_v32  ;;  %v2073_v38 = vmax.f32 %v2069_v34, 0.0 }
 0xaef   :  { %v2072_v37 = vmax.f32 %v2064_v36, 0.0 }
 0xaf1   :  { %7779 = vmatprep.mubr.msk.f32.mxu1 %vm286_vm2, %v2072_v37 }
 0xaf2   :  { %7780 = vmatmul.mubr.msk.f32.vlgmr.msra.gmra.mxu1 %vm286_vm2, %v2073_v38 }
 0xaf3   :  { %7795 = vmatprep.mubr.msk.f32.mxu1 %vm8811_vm3, %v8810_v61 }
 0xbb2   :  { %v7781_v39 = vpop.f32.mrf.mxu1 }
 0xbb3   :  { %v2160_v5 = vadd.f32 %v7781_v39, %v2081_v10 }
 0xbb4   :  { %v2154_v11 = vpop.f32.mrf.mxu1 }
 0xbb5   :  { %v2155_v41 = vadd.f32 %v2154_v11, %v2081_v10  ;;  %v2164_v42 = vadd.f32 %v2160_v5, %v1982_v26 }
 0xbb7   :  { %v2168_v43 = vsel %vm286_vm2, %v2164_v42, 0.0  ;;  %v2163_v46 = vadd.f32 %v2155_v41, %v1981_v24 }
 0xbb8   :  { %2169 = vadd.xlane.f32.xlu1 %v2168_v43 }
 0xbb9   :  { %v2165_v47 = vsel %vm286_vm2, %v2163_v46, 0.0 }
 0xbba   :  { %2166 = vadd.xlane.f32.xlu0 %v2165_v47 }
 0xc41   :  { %v2170_v48 = vpop.xlane.xlu1 %2169 }
 0xc42   :  { %v2172_v49 = vmul.f32 0.03125, %v2170_v48 }
 0xc43   :  { %v2167_v50 = vpop.xlane.xlu0 %2166 }
 0xc44   :  { %v2174_v51 = vsub.f32 %v2164_v42, %v2172_v49  ;;  %v2171_v52 = vmul.f32 0.03125, %v2167_v50 }
 0xc46   :  { %v2173_v53 = vsub.f32 %v2163_v46, %v2171_v52  ;;  %v2176_v54 = vmul.f32 %v2174_v51, %v2174_v51 }
 0xc48   :  { %v2180_v55 = vsel %vm286_vm2, %v2176_v54, 0.0  ;;  %v2175_v56 = vmul.f32 %v2173_v53, %v2173_v53 }
 0xc49   :  { %2181 = vadd.xlane.f32.xlu1 %v2180_v55 }
 0xc4a   :  { %v2177_v58 = vsel %vm286_vm2, %v2175_v56, 0.0 }
 0xc4b   :  { %2178 = vadd.xlane.f32.xlu0 %v2177_v58 }
 0xcd2   :  { %v2182_v1 = vpop.xlane.xlu1 %2181 }
 0xcd3   :  { %v2184_v2 = vmul.f32 0.03125, %v2182_v1 }
 0xcd4   :  { %v2179_v3 = vpop.xlane.xlu0 %2178 }
 0xcd5   :  { %v2186_v4 = vadd.f32 1e-05, %v2184_v2  ;;  %v2183_v6 = vmul.f32 0.03125, %v2179_v3 }
 0xcd7   :  { %8292 = vrsqrt.f32 %v2186_v4  ;;  %v2185_v7 = vadd.f32 1e-05, %v2183_v6 }
 0xcd9   :  { %8294 = vrsqrt.f32 %v2185_v7 }
 0xce4   :  { %v8293_v12 = vpop.eup %8292 }
 0xce5   :  { %v2190_v17 = vmul.f32 %v8293_v12, %v2174_v51 }
 0xce6   :  { %v8295_v18 = vpop.eup %8294 }
 0xce7   :  { %v2189_v19 = vmul.f32 %v8295_v18, %v2173_v53  ;;  %v2196_v20 = vmul.f32 %v2194_v13, %v2190_v17 }
 0xce9   :  { %v2195_v22 = vmul.f32 %v2194_v13, %v2189_v19  ;;  %v9249_v24 = vadd.f32 %v2200_v21, %v2196_v20 }
 0xceb   :  { %v9247_v23 = vadd.f32 %v2200_v21, %v2195_v22 }
 0xced   :  { %7790 = vmatprep.mubr.msk.f32.mxu0 %vm286_vm2, %v9247_v23 }
 0xcee   :  { %7791 = vmatmul.mubr.msk.f32.vlgmr.msra.gmra.mxu0 %vm286_vm2, %v9249_v24 }
 0xcef   :  { %7800 = vmatprep.mubr.msk.f32.mxu0 %vm8811_vm3, %v8810_v61 }
 0xdae   :  { %v7792_v26 = vpop.f32.mrf.mxu0 }
 0xdaf   :  { %v9257_v27 = vadd.f32 %v7792_v26, %v7263_v25 }
 0xdb0   :  { %v2288_v28 = vpop.f32.mrf.mxu0 }
 0xdb1   :  { %v9259_v29 = vadd.f32 %v7263_v25, %v2288_v28  ;;  %2301 = vrot.lane.b32.xlu1 %v9257_v27, %s8812_s28 }
 0xdb3   :  { %2299 = vrot.lane.b32.xlu0 %v9259_v29, %s8812_s28 }
 0xdb5   :  { %2303 = vrot.lane.b32.xlu1 %v9259_v29, %s8813_s29 }
 0xdb7   :  { %2307 = vrot.lane.b32.xlu0 %v9259_v29, %s8814_s5 }
 0xdb9   :  { %2305 = vrot.lane.b32.xlu1 %v9257_v27, %s8813_s29 }
 0xdbb   :  { %2311 = vrot.lane.b32.xlu0 %v9259_v29, %s8815_s30 }
 0xdbd   :  { %2309 = vrot.lane.b32.xlu1 %v9257_v27, %s8814_s5 }
 0xdc1   :  { %2387 = vrot.lane.b32.xlu1 %v9257_v27, %s8815_s30 }
 0xe23   :  { %v9277_v30 = vpop.permute.xlu1 %2301 }
 0xe24   :  { %2539 = vrot.lane.b32.xlu1 %v9277_v30, %s8815_s30 }
 0xe25   :  { %v9281_v32 = vpop.permute.xlu0 %2299 }
 0xe26   :  { %2463 = vrot.lane.b32.xlu0 %v9281_v32, %s8815_s30 }
 0xe27   :  { %v9285_v33 = vpop.permute.xlu1 %2303 }
 0xe29   :  { %v9287_v34 = vpop.permute.xlu0 %2307 }
 0xe2a   :  { %2615 = vrot.lane.b32.xlu0 %v9285_v33, %s8815_s30 }
 0xe2b   :  { %v9291_v35 = vpop.permute.xlu1 %2305 }
 0xe2c   :  { %2691 = vrot.lane.b32.xlu1 %v9291_v35, %s8815_s30 }
 0xe2d   :  { %v2312_v36 = vpop.permute.xlu0 %2311 }
 0xe2e   :  { %2767 = vrot.lane.b32.xlu0 %v9287_v34, %s8815_s30  ;;  %7794 = vmatpush3.xpose.msk.msra.mxu1 %vm519_vm4, %v2312_v36 }
 0xe2f   :  { %v9298_v37 = vpop.permute.xlu1 %2309  ;;  %7803 = vmatprep.subr.mxu1 %v8810_v61 }
 0xe30   :  { %2843 = vrot.lane.b32.xlu1 %v9298_v37, %s8815_s30 }
 0xe31   :  { %7796 = vmatmul.mubr.msk.f32.vlgmr.msra.gmra.mxu1 %vm519_vm4, %v9259_v29 }
 0xe32   :  { %7805 = vmatprep.mubr.msk.f32.mxu1 %vm8811_vm3, %v8810_v61 }
 0xe33   :  { %v2388_v38 = vpop.permute.xlu1 %2387 }
 0xe34   :  { %7799 = vmatpush3.xpose.msk.msra.mxu0 %vm519_vm4, %v2388_v38 }
 0xe35   :  { %7808 = vmatprep.subr.mxu0 %v8810_v61 }
 0xe37   :  { %7801 = vmatmul.mubr.msk.f32.vlgmr.msra.gmra.mxu0 %vm519_vm4, %v9257_v27 }
 0xe38   :  { %7810 = vmatprep.mubr.msk.f32.mxu0 %vm8811_vm3, %v8810_v61 }
 0xe96   :  { %v2540_v10 = vpop.permute.xlu1 %2539 }
 0xe97   :  { %7809 = vmatpush3.xpose.msk.msra.mxu0 %vm519_vm4, %v2540_v10 }
 0xe98   :  { %v2464_v39 = vpop.permute.xlu0 %2463  ;;  %7818 = vmatprep.subr.mxu0 %v8810_v61 }
 0xe99   :  { %7804 = vmatpush3.xpose.msk.msra.mxu1 %vm519_vm4, %v2464_v39 }
 0xe9a   :  { %7811 = vmatmul.mubr.msk.f32.vlgmr.msra.gmra.mxu0 %vm519_vm4, %v9277_v30  ;;  %7813 = vmatprep.subr.mxu1 %v8810_v61 }
 0xe9b   :  { %7820 = vmatprep.mubr.msk.f32.mxu0 %vm8811_vm3, %v8810_v61 }
 0xe9c   :  { %7806 = vmatmul.mubr.msk.f32.vlgmr.msra.gmra.mxu1 %vm519_vm4, %v9281_v32  ;;  %v2616_v5 = vpop.permute.xlu0 %2615 }
 0xe9d   :  { %7814 = vmatpush3.xpose.msk.msra.mxu1 %vm519_vm4, %v2616_v5  ;;  %7815 = vmatprep.mubr.msk.f32.mxu1 %vm8811_vm3, %v8810_v61 }
 0xe9e   :  { %v2692_v11 = vpop.permute.xlu1 %2691  ;;  %7823 = vmatprep.subr.mxu1 %v8810_v61 }
 0xe9f   :  { %7819 = vmatpush3.xpose.msk.msra.mxu0 %vm519_vm4, %v2692_v11 }
 0xea0   :  { %7816 = vmatmul.mubr.msk.f32.vlgmr.msra.gmra.mxu1 %vm519_vm4, %v9285_v33  ;;  %v2768_v41 = vpop.permute.xlu0 %2767  ;;  %7828 = vmatprep.subr.mxu0 %v8810_v61 }
 0xea1   :  { %7824 = vmatpush3.xpose.msk.msra.mxu1 %vm519_vm4, %v2768_v41  ;;  %7825 = vmatprep.mubr.msk.f32.mxu1 %vm8811_vm3, %v8810_v61 }
 0xea2   :  { %7821 = vmatmul.mubr.msk.f32.vlgmr.msra.gmra.mxu0 %vm519_vm4, %v9291_v35  ;;  %v2844_v42 = vpop.permute.xlu1 %2843  ;;  %7833 = vmatprep.subr.mxu1 %v8810_v61 }
 0xea3   :  { %7829 = vmatpush3.xpose.msk.msra.mxu0 %vm519_vm4, %v2844_v42  ;;  %7830 = vmatprep.mubr.msk.f32.mxu0 %vm8811_vm3, %v8810_v61 }
 0xea4   :  { %7826 = vmatmul.mubr.msk.f32.vlgmr.msra.gmra.mxu1 %vm519_vm4, %v9287_v34  ;;  %7838 = vmatprep.subr.mxu0 %v8810_v61 }
 0xea5   :  { %7835 = vmatprep.mubr.msk.f32.mxu1 %vm8811_vm3, %v8810_v61 }
 0xea6   :  { %7831 = vmatmul.mubr.msk.f32.vlgmr.msra.gmra.mxu0 %vm519_vm4, %v9298_v37 }
 0xea7   :  { %7840 = vmatprep.mubr.msk.f32.mxu0 %vm8811_vm3, %v8810_v61 }
 0xef1   :  { %v2383_v43 = vpop.f32.mrf.mxu1 }
 0xef2   :  { %v2919_v46 = vsel %vm519_vm4, %v2383_v43, -inf }
 0xef3   :  { %2920 = vmax.xlane.f32.xlu0 %v2919_v46  ;;  %v7797_v47 = vpop.f32.mrf.mxu1 }
 0xef7   :  { %v2459_v48 = vpop.f32.mrf.mxu0 }
 0xef8   :  { %v2922_v49 = vsel %vm519_vm4, %v2459_v48, -inf }
 0xef9   :  { %2923 = vmax.xlane.f32.xlu1 %v2922_v49  ;;  %v7802_v50 = vpop.f32.mrf.mxu0 }
 0xf5a   :  { %v2611_v51 = vpop.f32.mrf.mxu0 }
 0xf5b   :  { %v2928_v52 = vsel %vm519_vm4, %v2611_v51, -inf }
 0xf5c   :  { %v7812_v53 = vpop.f32.mrf.mxu0  ;;  %2929 = vmax.xlane.f32.xlu0 %v2928_v52  ;;  %v2535_v54 = vpop.f32.mrf.mxu1 }
 0xf5d   :  { %v2925_v56 = vsel %vm519_vm4, %v2535_v54, -inf }
 0xf5e   :  { %v7807_v55 = vpop.f32.mrf.mxu1 }
 0xf60   :  { %2926 = vmax.xlane.f32.xlu0 %v2925_v56  ;;  %v2687_v58 = vpop.f32.mrf.mxu1 }
 0xf61   :  { %v2931_v0 = vsel %vm519_vm4, %v2687_v58, -inf }
 0xf62   :  { %v7817_v60 = vpop.f32.mrf.mxu1  ;;  %v2763_v62 = vpop.f32.mrf.mxu0 }
 0xf63   :  { %v2934_v63 = vsel %vm519_vm4, %v2763_v62, -inf }
 0xf64   :  { %2935 = vmax.xlane.f32.xlu1 %v2934_v63  ;;  %v7822_v1 = vpop.f32.mrf.mxu0  ;;  %2932 = vmax.xlane.f32.xlu0 %v2931_v0  ;;  %v2839_v2 = vpop.f32.mrf.mxu1 }
 0xf65   :  { %v2937_v7 = vsel %vm519_vm4, %v2839_v2, -inf }
 0xf66   :  { %v7827_v3 = vpop.f32.mrf.mxu1  ;;  %v2915_v4 = vpop.f32.mrf.mxu0 }
 0xf67   :  { %v2940_v6 = vsel %vm519_vm4, %v2915_v4, -inf }
 0xf68   :  { %2941 = vmax.xlane.f32.xlu1 %v2940_v6  ;;  %v7832_v12 = vpop.f32.mrf.mxu0  ;;  %2938 = vmax.xlane.f32.xlu0 %v2937_v7 }
 0xf79   :  { %3083 = vrot.lane.b32.xlu1 %v9257_v27, %s8816_s16 }
 0xf7c   :  { %v2921_v13 = vpop.xlane.xlu0 %2920 }
 0xf7d   :  { %3159 = vrot.lane.b32.xlu1 %v9281_v32, %s8816_s16  ;;  %v2943_v17 = vsub.f32 %v2383_v43, %v2921_v13 }
 0xf7e   :  { %3007 = vrot.lane.b32.xlu0 %v9259_v29, %s8816_s16 }
 0xf7f   :  { %v2951_v18 = vmul.f32 1.442695, %v2943_v17 }
 0xf81   :  { %3235 = vrot.lane.b32.xlu1 %v9277_v30, %s8816_s16  ;;  %8296 = vpow2.f32 %v2951_v18 }
 0xf82   :  { %3311 = vrot.lane.b32.xlu0 %v9285_v33, %s8816_s16  ;;  %v2924_v19 = vpop.xlane.xlu1 %2923 }
 0xf83   :  { %v2944_v20 = vsub.f32 %v2459_v48, %v2924_v19 }
 0xf85   :  { %3387 = vrot.lane.b32.xlu1 %v9291_v35, %s8816_s16  ;;  %v2953_v21 = vmul.f32 1.442695, %v2944_v20 }
 0xf87   :  { %8298 = vpow2.f32 %v2953_v21 }
 0xf8e   :  { %v9369_v22 = vpop.eup %8296 }
 0xf8f   :  { %v2967_v25 = vsel %vm519_vm4, %v9369_v22, 0.0 }
 0xf94   :  { %v9373_v26 = vpop.eup %8298 }
 0xf95   :  { %v2970_v27 = vsel %vm519_vm4, %v9373_v26, 0.0 }
 0xfa1   :  { %2968 = vadd.xlane.f32.xlu0 %v2967_v25 }
 0xfa9   :  { %2971 = vadd.xlane.f32.xlu1 %v2970_v27 }
 0xfe5   :  { %v2930_v28 = vpop.xlane.xlu0 %2929 }
 0xfe6   :  { %v2946_v29 = vsub.f32 %v2611_v51, %v2930_v28 }
 0xfe8   :  { %v2957_v30 = vmul.f32 1.442695, %v2946_v29 }
 0xfe9   :  { %v2927_v32 = vpop.xlane.xlu0 %2926 }
 0xfea   :  { %8300 = vpow2.f32 %v2957_v30  ;;  %v2945_v33 = vsub.f32 %v2535_v54, %v2927_v32 }
 0xfec   :  { %v2955_v35 = vmul.f32 1.442695, %v2945_v33 }
 0xfed   :  { %v2936_v36 = vpop.xlane.xlu1 %2935  ;;  %v2933_v38 = vpop.xlane.xlu0 %2932 }
 0xfee   :  { %8302 = vpow2.f32 %v2955_v35  ;;  %v2948_v10 = vsub.f32 %v2763_v62, %v2936_v36  ;;  %v2947_v39 = vsub.f32 %v2687_v58, %v2933_v38 }
 0xff0   :  { %v2961_v5 = vmul.f32 1.442695, %v2948_v10  ;;  %v2959_v11 = vmul.f32 1.442695, %v2947_v39 }
 0xff1   :  { %v2942_v41 = vpop.xlane.xlu1 %2941  ;;  %v2939_v42 = vpop.xlane.xlu0 %2938 }
 0xff2   :  { %8304 = vpow2.f32 %v2961_v5  ;;  %v2950_v43 = vsub.f32 %v2915_v4, %v2942_v41  ;;  %v2949_v46 = vsub.f32 %v2839_v2, %v2939_v42 }
 0xff3   :  { %8306 = vpow2.f32 %v2959_v11 }
 0xff4   :  { %v2965_v47 = vmul.f32 1.442695, %v2950_v43  ;;  %v2963_v48 = vmul.f32 1.442695, %v2949_v46 }
 0xff5   :  { %v3084_v49 = vpop.permute.xlu1 %3083  ;;  %v3008_v50 = vpop.permute.xlu0 %3007 }
 0xff6   :  { %8308 = vpow2.f32 %v2965_v47  ;;  %7834 = vmatpush3.msra.mxu1 %v3008_v50  ;;  %7839 = vmatpush3.msra.mxu0 %v3084_v49  ;;  %v3649_v47 = vld [vmem:[#allocation13 + $0x38] sm:$0xff]  ;;  %v3647_v49 = vld [vmem:[#allocation13 + $0x28] sm:$0xff] }
 0xff7   :  { %v8301_v51 = vpop.eup %8300  ;;  %8310 = vpow2.f32 %v2963_v48  ;;  %7843 = vmatprep.subr.mxu1 %v8810_v61  ;;  %7848 = vmatprep.subr.mxu0 %v8810_v61  ;;  %v3648_v48 = vld [vmem:[#allocation13 + $0x30] sm:$0xff] }
 0xff8   :  { %v2976_v52 = vsel %vm519_vm4, %v8301_v51, 0.0 }
 0xff9   :  { %2977 = vadd.xlane.f32.xlu1 %v2976_v52  ;;  %v3160_v2 = vpop.permute.xlu1 %3159  ;;  %v3312_v3 = vpop.permute.xlu0 %3311 }
 0xffb   :  { %v8303_v53 = vpop.eup %8302 }
 0xffc   :  { %v2973_v54 = vsel %vm519_vm4, %v8303_v53, 0.0 }
 0xffd   :  { %2974 = vadd.xlane.f32.xlu0 %v2973_v54  ;;  %v3236_v4 = vpop.permute.xlu1 %3235 }
 0xfff   :  { %v8305_v55 = vpop.eup %8304 }
0x1000   :  { %v8307_v56 = vpop.eup %8306  ;;  %v2982_v58 = vsel %vm519_vm4, %v8305_v55, 0.0 }
0x1001   :  { %2983 = vadd.xlane.f32.xlu1 %v2982_v58  ;;  %v2979_v60 = vsel %vm519_vm4, %v8307_v56, 0.0  ;;  %v3388_v7 = vpop.permute.xlu1 %3387 }
0x1002   :  { %2980 = vadd.xlane.f32.xlu0 %v2979_v60 }
0x1003   :  { %v9383_v62 = vpop.eup %8308 }
0x1004   :  { %v9385_v63 = vpop.eup %8310  ;;  %v2988_v0 = vsel %vm519_vm4, %v9383_v62, 0.0 }
0x1005   :  { %2989 = vadd.xlane.f32.xlu1 %v2988_v0  ;;  %v2985_v1 = vsel %vm519_vm4, %v9385_v63, 0.0 }
0x1006   :  { %2986 = vadd.xlane.f32.xlu0 %v2985_v1 }
0x1016   :  { %3539 = vrot.lane.b32.xlu1 %v9298_v37, %s8816_s16 }
0x101c   :  { %3463 = vrot.lane.b32.xlu0 %v9287_v34, %s8816_s16 }
0x102a   :  { %v2969_v6 = vpop.xlane.xlu0 %2968 }
0x102b   :  { %8312 = vrcp.f32 %v2969_v6 }
0x1032   :  { %v2972_v12 = vpop.xlane.xlu1 %2971 }
0x1033   :  { %8314 = vrcp.f32 %v2972_v12 }
0x1038   :  { %v8313_v13 = vpop.eup %8312 }
0x1039   :  { %v2992_v17 = vmul.f32 %v8313_v13, %v9369_v22 }
0x103b   :  { %7836 = vmatmul.mubr.msk.f32.vlgmr.msra.gmra.mxu1 %vm519_vm4, %v2992_v17 }
0x103c   :  { %7844 = vmatpush3.msra.mxu1 %v3160_v2  ;;  %7845 = vmatprep.mubr.msk.f32.mxu1 %vm8811_vm3, %v8810_v61 }
0x103d   :  { %7853 = vmatprep.subr.mxu1 %v8810_v61 }
0x1040   :  { %v8315_v34 = vpop.eup %8314 }
0x1041   :  { %v2994_v37 = vmul.f32 %v8315_v34, %v9373_v26 }
0x1043   :  { %7841 = vmatmul.mubr.msk.f32.vlgmr.msra.gmra.mxu0 %vm519_vm4, %v2994_v37 }
0x1044   :  { %7849 = vmatpush3.msra.mxu0 %v3236_v4  ;;  %7850 = vmatprep.mubr.msk.f32.mxu0 %vm8811_vm3, %v8810_v61 }
0x1045   :  { %7858 = vmatprep.subr.mxu0 %v8810_v61 }
0x1082   :  { %v2978_v18 = vpop.xlane.xlu1 %2977 }
0x1083   :  { %8316 = vrcp.f32 %v2978_v18 }
0x1086   :  { %v2975_v19 = vpop.xlane.xlu0 %2974 }
0x1087   :  { %8318 = vrcp.f32 %v2975_v19 }
0x108a   :  { %v2984_v20 = vpop.xlane.xlu1 %2983 }
0x108b   :  { %8320 = vrcp.f32 %v2984_v20  ;;  %v2981_v21 = vpop.xlane.xlu0 %2980  ;;  %v3653_v20 = vrot.slane %v9234_v8, %v8998_v45 }
0x108c   :  { %8322 = vrcp.f32 %v2981_v21 }
0x108e   :  { %v2990_v22 = vpop.xlane.xlu1 %2989 }
0x108f   :  { %8324 = vrcp.f32 %v2990_v22  ;;  %v2987_v25 = vpop.xlane.xlu0 %2986 }
0x1090   :  { %v8317_v26 = vpop.eup %8316  ;;  %8326 = vrcp.f32 %v2987_v25 }
0x1091   :  { %v2998_v27 = vmul.f32 %v8317_v26, %v8301_v51  ;;  %v3646_v51 = vld [vmem:[#allocation13 + $0x20] sm:$0xff] }
0x1092   :  { %v3540_v36 = vpop.permute.xlu1 %3539 }
0x1093   :  { %7851 = vmatmul.mubr.msk.f32.vlgmr.msra.gmra.mxu0 %vm519_vm4, %v2998_v27  ;;  %v3464_v10 = vpop.permute.xlu0 %3463 }
0x1094   :  { %v8319_v28 = vpop.eup %8318  ;;  %7859 = vmatpush3.msra.mxu0 %v3388_v7  ;;  %7860 = vmatprep.mubr.msk.f32.mxu0 %vm8811_vm3, %v8810_v61 }
0x1095   :  { %v2996_v29 = vmul.f32 %v8319_v28, %v8303_v53  ;;  %7868 = vmatprep.subr.mxu0 %v8810_v61 }
0x1097   :  { %7846 = vmatmul.mubr.msk.f32.vlgmr.msra.gmra.mxu1 %vm519_vm4, %v2996_v29 }
0x1098   :  { %v8321_v30 = vpop.eup %8320  ;;  %7854 = vmatpush3.msra.mxu1 %v3312_v3  ;;  %7855 = vmatprep.mubr.msk.f32.mxu1 %vm8811_vm3, %v8810_v61 }
0x1099   :  { %v8323_v32 = vpop.eup %8322  ;;  %7863 = vmatprep.subr.mxu1 %v8810_v61  ;;  %v3002_v33 = vmul.f32 %v8321_v30, %v8305_v55 }
0x109a   :  { %v3000_v35 = vmul.f32 %v8323_v32, %v8307_v56 }
0x109b   :  { %7861 = vmatmul.mubr.msk.f32.vlgmr.msra.gmra.mxu0 %vm519_vm4, %v3002_v33 }
0x109c   :  { %v8325_v38 = vpop.eup %8324  ;;  %7856 = vmatmul.mubr.msk.f32.vlgmr.msra.gmra.mxu1 %vm519_vm4, %v3000_v35  ;;  %7869 = vmatpush3.msra.mxu0 %v3540_v36 }
0x109d   :  { %v8327_v39 = vpop.eup %8326  ;;  %7864 = vmatpush3.msra.mxu1 %v3464_v10  ;;  %7865 = vmatprep.mubr.msk.f32.mxu1 %vm8811_vm3, %v8810_v61  ;;  %v3006_v5 = vmul.f32 %v8325_v38, %v9383_v62 }
0x109e   :  { %7870 = vmatprep.mubr.msk.f32.mxu0 %vm8811_vm3, %v8810_v61  ;;  %v3004_v11 = vmul.f32 %v8327_v39, %v9385_v63  ;;  %7873 = vmatprep.subr.mxu1 %v3649_v47 }
0x109f   :  { %7871 = vmatmul.mubr.msk.f32.vlgmr.msra.gmra.mxu0 %vm519_vm4, %v3006_v5 }
0x10a0   :  { %7866 = vmatmul.mubr.msk.f32.vlgmr.msra.gmra.mxu1 %vm519_vm4, %v3004_v11 }
0x10a1   :  { %7874 = vmatpush3.msra.mxu1 %v3649_v47 }
0x10a2   :  { %7875 = vmatprep.subr.mxu1 %v3648_v48 }
0x10a3   :  { %7876 = vmatpush3.msra.mxu1 %v3648_v48 }
0x10a4   :  { %7877 = vmatprep.subr.mxu1 %v3647_v49 }
0x10a5   :  { %7878 = vmatpush3.msra.mxu1 %v3647_v49 }
0x10a6   :  { %7879 = vmatprep.subr.mxu1 %v3646_v51 }
0x10a7   :  { %7880 = vmatpush3.msra.mxu1 %v3646_v51 }
0x10fb   :  { %v3079_v41 = vpop.f32.mrf.mxu1 }
0x10fd   :  { %v7837_v42 = vpop.f32.mrf.mxu1 }
0x10fe   :  { %v3777_v42 = vld [vmem:[#allocation4 + $0x28] sm:$0xff] }
0x1103   :  { %v3155_v43 = vpop.f32.mrf.mxu0 }
0x1105   :  { %v7842_v46 = vpop.f32.mrf.mxu0 }
0x1153   :  { %v3307_v50 = vpop.f32.mrf.mxu0 }
0x1154   :  { %3619 = vrot.lane.b32.xlu1 %v3307_v50, %s8798_s22 }
0x1155   :  { %v7852_v52 = vpop.f32.mrf.mxu0 }
0x1156   :  { %v3766_v52 = vrot.slane %v9234_v8, %v9199_v40 }
0x1157   :  { %v3231_v53 = vpop.f32.mrf.mxu1 }
0x1158   :  { %3617 = vrot.lane.b32.xlu0 %v3231_v53, %s8798_s22 }
0x1159   :  { %v7847_v54 = vpop.f32.mrf.mxu1 }
0x115b   :  { %v3459_v55 = vpop.f32.mrf.mxu0 }
0x115c   :  { %v3383_v56 = vpop.f32.mrf.mxu1  ;;  %3627 = vrot.lane.b32.xlu1 %v3459_v55, %s8805_s20  ;;  %v3772_v55 = vrot.slane %v9234_v8, %v9210_v14 }
0x115d   :  { %3625 = vrot.lane.b32.xlu0 %v3383_v56, %s8805_s20  ;;  %v7862_v58 = vpop.f32.mrf.mxu0 }
0x115e   :  { %v7857_v60 = vpop.f32.mrf.mxu1 }
0x115f   :  { %v3611_v62 = vpop.f32.mrf.mxu0 }
0x1160   :  { %v3535_v63 = vpop.f32.mrf.mxu1  ;;  %3635 = vrot.lane.b32.xlu1 %v3611_v62, %s8817_s17 }
0x1161   :  { %3633 = vrot.lane.b32.xlu0 %v3535_v63, %s8817_s17  ;;  %v7872_v0 = vpop.f32.mrf.mxu0 }
0x1162   :  { %v7867_v1 = vpop.f32.mrf.mxu1 }
0x1163   :  { %v3871_v1 = vld [vmem:[#allocation6 + $0x38] sm:$0xff] }
0x1164   :  { %7895 = vmatprep.subr.mxu1 %v3871_v1 }
0x11c6   :  { %v3620_v2 = vpop.permute.xlu1 %3619 }
0x11c7   :  { %v3640_v7 = vsel %vm519_vm4, %v3155_v43, %v3620_v2  ;;  %v3776_v43 = vld [vmem:[#allocation4 + $0x20] sm:$0xff]  ;;  %v3870_v2 = vld [vmem:[#allocation6 + $0x30] sm:$0xff] }
0x11ca   :  { %v3618_v3 = vpop.permute.xlu0 %3617 }
0x11cb   :  { %v3639_v12 = vsel %vm519_vm4, %v3079_v41, %v3618_v3  ;;  %v3778_v41 = vld [vmem:[#allocation4 + $0x30] sm:$0xff]  ;;  %v3869_v3 = vld [vmem:[#allocation6 + $0x28] sm:$0xff] }
0x11ce   :  { %v3628_v4 = vpop.permute.xlu1 %3627 }
0x11cf   :  { %v3626_v6 = vpop.permute.xlu0 %3625  ;;  %v3642_v13 = vsel %vm1848_vm5, %v3640_v7, %v3628_v4  ;;  %v3868_v4 = vld [vmem:[#allocation6 + $0x20] sm:$0xff] }
0x11d0   :  { %v3641_v34 = vsel %vm1848_vm5, %v3639_v12, %v3626_v6  ;;  %v3783_v6 = vrot.slane %v9234_v8, %v9213_v15 }
0x11d2   :  { %v3636_v17 = vpop.permute.xlu1 %3635 }
0x11d3   :  { %v3644_v37 = vsel %vm1851_vm6, %v3642_v13, %v3636_v17  ;;  %v3634_v18 = vpop.permute.xlu0 %3633 }
0x11d4   :  { %v3643_v19 = vsel %vm1851_vm6, %v3641_v34, %v3634_v18  ;;  %v3875_v18 = vrot.slane %v9234_v8, %v9223_v31 }
0x11d5   :  { %7881 = vmatprep.mubr.msk.f32.mxu1 %vm286_vm2, %v3643_v19 }
0x11d6   :  { %7882 = vmatmul.mubr.msk.f32.vlgmr.msra.gmra.mxu1 %vm286_vm2, %v3644_v37 }
0x11d7   :  { %7896 = vmatpush3.msra.mxu1 %v3871_v1 }
0x11d8   :  { %7897 = vmatprep.subr.mxu1 %v3870_v2 }
0x11d9   :  { %7898 = vmatpush3.msra.mxu1 %v3870_v2 }
0x11da   :  { %7899 = vmatprep.subr.mxu1 %v3869_v3 }
0x11db   :  { %7900 = vmatpush3.msra.mxu1 %v3869_v3 }
0x11dc   :  { %7901 = vmatprep.subr.mxu1 %v3868_v4 }
0x11dd   :  { %7902 = vmatpush3.msra.mxu1 %v3868_v4 }
0x11de   :  { %7917 = vmatprep.subr.mxu1 %v8810_v61 }
0x1296   :  { %v7883_v21 = vpop.f32.mrf.mxu1 }
0x1297   :  { %v3732_v22 = vadd.f32 %v7883_v21, %v3653_v20 }
0x1298   :  { %v3726_v25 = vpop.f32.mrf.mxu1 }
0x1299   :  { %v3736_v26 = vadd.f32 %v3732_v22, %v9249_v24  ;;  %v3727_v27 = vadd.f32 %v3726_v25, %v3653_v20 }
0x129b   :  { %v3735_v28 = vadd.f32 %v3727_v27, %v9247_v23  ;;  %v3740_v29 = vsel %vm286_vm2, %v3736_v26, 0.0  ;;  %v3779_v23 = vld [vmem:[#allocation4 + $0x38] sm:$0xff] }
0x129c   :  { %3741 = vadd.xlane.f32.xlu1 %v3740_v29  ;;  %7884 = vmatprep.subr.mxu0 %v3779_v23 }
0x129d   :  { %v3737_v30 = vsel %vm286_vm2, %v3735_v28, 0.0  ;;  %7885 = vmatpush3.msra.mxu0 %v3779_v23  ;;  %v9467_v23 = vld [vmem:[#allocation10 + $0x10] sm:$0xff] }
0x129e   :  { %3738 = vadd.xlane.f32.xlu0 %v3737_v30  ;;  %7886 = vmatprep.subr.mxu0 %v3778_v41 }
0x129f   :  { %7887 = vmatpush3.msra.mxu0 %v3778_v41  ;;  %v4000_v41 = vld [vmem:[#allocation12 + $0x8] sm:$0xff] }
0x12a0   :  { %7888 = vmatprep.subr.mxu0 %v3777_v42 }
0x12a1   :  { %7889 = vmatpush3.msra.mxu0 %v3777_v42  ;;  %v9470_v42 = vld [vmem:[#allocation10 + $0x8] sm:$0xff] }
0x12a2   :  { %7890 = vmatprep.subr.mxu0 %v3776_v43 }
0x12a3   :  { %7891 = vmatpush3.msra.mxu0 %v3776_v43  ;;  %v3999_v43 = vld [vmem:[#allocation12] sm:$0xff] }
0x1325   :  { %v3742_v32 = vpop.xlane.xlu1 %3741 }
0x1326   :  { %v3744_v33 = vmul.f32 0.03125, %v3742_v32 }
0x1327   :  { %v3739_v35 = vpop.xlane.xlu0 %3738 }
0x1328   :  { %v3743_v36 = vmul.f32 0.03125, %v3739_v35  ;;  %v3746_v38 = vsub.f32 %v3736_v26, %v3744_v33 }
0x132a   :  { %v3745_v10 = vsub.f32 %v3735_v28, %v3743_v36  ;;  %v3748_v11 = vmul.f32 %v3746_v38, %v3746_v38 }
0x132c   :  { %v3747_v39 = vmul.f32 %v3745_v10, %v3745_v10  ;;  %v3752_v24 = vsel %vm286_vm2, %v3748_v11, 0.0  ;;  %v9464_v11 = vld [vmem:[#allocation10 + $0x18] sm:$0xff] }
0x132e   :  { %v3749_v5 = vsel %vm286_vm2, %v3747_v39, 0.0 }
0x132f   :  { %3750 = vadd.xlane.f32.xlu0 %v3749_v5  ;;  %v4002_v5 = vld [vmem:[#allocation12 + $0x18] sm:$0xff] }
0x1330   :  { %7906 = vmatprep.subr.mxu0 %v4002_v5 }
0x1333   :  { %3753 = vadd.xlane.f32.xlu0 %v3752_v24  ;;  %v4001_v24 = vld [vmem:[#allocation12 + $0x10] sm:$0xff] }
0x13b8   :  { %v3751_v46 = vpop.xlane.xlu0 %3750 }
0x13b9   :  { %v3755_v47 = vmul.f32 0.03125, %v3751_v46  ;;  %v9474_v46 = vld [vmem:[#allocation10] sm:$0xff] }
0x13bb   :  { %v3757_v48 = vadd.f32 1e-05, %v3755_v47 }
0x13bc   :  { %v3754_v49 = vpop.xlane.xlu0 %3753 }
0x13bd   :  { %8328 = vrsqrt.f32 %v3757_v48  ;;  %v3756_v50 = vmul.f32 0.03125, %v3754_v49 }
0x13bf   :  { %v3758_v51 = vadd.f32 1e-05, %v3756_v50 }
0x13c1   :  { %8330 = vrsqrt.f32 %v3758_v51 }
0x13ca   :  { %v8329_v53 = vpop.eup %8328 }
0x13cb   :  { %v3761_v54 = vmul.f32 %v8329_v53, %v3745_v10  ;;  %v183_v53 = vld [vmem:[%s10158_s12 + $0x10] sm:$0xff] }
0x13cd   :  { %v3767_v56 = vmul.f32 %v3766_v52, %v3761_v54  ;;  %v3988_v54 = vrot.slane %v183_v53, %v8974_v9 }
0x13ce   :  { %v8331_v58 = vpop.eup %8330 }
0x13cf   :  { %v3762_v60 = vmul.f32 %v8331_v58, %v3746_v38  ;;  %v3773_v62 = vadd.f32 %v3772_v55, %v3767_v56 }
0x13d1   :  { %v3768_v63 = vmul.f32 %v3766_v52, %v3762_v60  ;;  %7892 = vmatprep.mubr.msk.f32.mxu0 %vm286_vm2, %v3773_v62  ;;  %v3994_v60 = vrot.slane %v183_v53, %v8986_v16 }
0x13d3   :  { %v3774_v0 = vadd.f32 %v3772_v55, %v3768_v63 }
0x13d5   :  { %7893 = vmatmul.mubr.msk.f32.vlgmr.msra.gmra.mxu0 %vm286_vm2, %v3774_v0 }
0x13d6   :  { %7907 = vmatpush3.msra.mxu0 %v4002_v5 }
0x13d7   :  { %7908 = vmatprep.subr.mxu0 %v4001_v24 }
0x13d8   :  { %7909 = vmatpush3.msra.mxu0 %v4001_v24 }
0x13d9   :  { %7910 = vmatprep.subr.mxu0 %v4000_v41 }
0x13da   :  { %7911 = vmatpush3.msra.mxu0 %v4000_v41 }
0x13db   :  { %7912 = vmatprep.subr.mxu0 %v3999_v43 }
0x13dc   :  { %7913 = vmatpush3.msra.mxu0 %v3999_v43 }
0x13dd   :  { %7928 = vmatprep.subr.mxu0 %v8810_v61 }
0x1495   :  { %v7894_v7 = vpop.f32.mrf.mxu0 }
0x1496   :  { %v3862_v12 = vadd.f32 %v7894_v7, %v3783_v6 }
0x1497   :  { %v3856_v13 = vpop.f32.mrf.mxu0 }
0x1498   :  { %v3857_v17 = vadd.f32 %v3856_v13, %v3783_v6  ;;  %v3866_v37 = vmax.f32 %v3862_v12, 0.0  ;;  %v7296_v6 = vld [vmem:[#allocation9] ss:$0 sm:$0xff] }
0x149a   :  { %v3865_v34 = vmax.f32 %v3857_v17, 0.0 }
0x149c   :  { %7903 = vmatprep.mubr.msk.f32.mxu1 %vm286_vm2, %v3865_v34 }
0x149d   :  { %7904 = vmatmul.mubr.msk.f32.vlgmr.msra.gmra.mxu1 %vm286_vm2, %v3866_v37 }
0x149e   :  { %7925 = vmatprep.mubr.msk.f32.mxu1 %vm8811_vm3, %v8810_v61  ;;  %7918 = vmatpush3.msra.mxu1 %v9464_v11 }
0x149f   :  { %7919 = vmatprep.subr.mxu1 %v8810_v61 }
0x14a0   :  { %7920 = vmatpush3.msra.mxu1 %v9467_v23 }
0x14a1   :  { %7921 = vmatprep.subr.mxu1 %v8810_v61 }
0x14a2   :  { %7922 = vmatpush3.msra.mxu1 %v9470_v42 }
0x14a3   :  { %7923 = vmatprep.subr.mxu1 %v8810_v61 }
0x14a4   :  { %7924 = vmatpush3.msra.mxu1 %v9474_v46 }
0x14a5   :  { %7926 = vmatmul.mubr.f32.vlgmr.msra.gmra.mxu1 %v8810_v61  ;;  %7939 = vmatprep.subr.mxu1 %v8810_v61 }
0x14a6   :  { %7940 = vmatpush3.msra.mxu1 %v9464_v11  ;;  %7947 = vmatprep.mubr.msk.f32.mxu1 %vm8811_vm3, %v8810_v61 }
0x14a7   :  { %7941 = vmatprep.subr.mxu1 %v8810_v61 }
0x14a8   :  { %7942 = vmatpush3.msra.mxu1 %v9467_v23 }
0x14a9   :  { %7943 = vmatprep.subr.mxu1 %v8810_v61 }
0x14aa   :  { %7944 = vmatpush3.msra.mxu1 %v9470_v42 }
0x14ab   :  { %7945 = vmatprep.subr.mxu1 %v8810_v61 }
0x14ac   :  { %7946 = vmatpush3.msra.mxu1 %v9474_v46 }
0x14ad   :  { %7961 = vmatprep.subr.mxu1 %v8810_v61 }
0x155d   :  { %v7905_v19 = vpop.f32.mrf.mxu1 }
0x155e   :  { %v3954_v20 = vadd.f32 %v7905_v19, %v3875_v18 }
0x155f   :  { %v3948_v21 = vpop.f32.mrf.mxu1 }
0x1560   :  { %v3958_v22 = vadd.f32 %v3954_v20, %v3774_v0  ;;  %v3949_v25 = vadd.f32 %v3948_v21, %v3875_v18 }
0x1562   :  { %v3957_v26 = vadd.f32 %v3949_v25, %v3773_v62  ;;  %v3962_v27 = vsel %vm286_vm2, %v3958_v22, 0.0 }
0x1563   :  { %3963 = vadd.xlane.f32.xlu1 %v3962_v27 }
0x1564   :  { %v3959_v28 = vsel %vm286_vm2, %v3957_v26, 0.0 }
0x1565   :  { %3960 = vadd.xlane.f32.xlu0 %v3959_v28 }
0x15ec   :  { %v3964_v29 = vpop.xlane.xlu1 %3963 }
0x15ed   :  { %v3966_v30 = vmul.f32 0.03125, %v3964_v29 }
0x15ee   :  { %v3961_v32 = vpop.xlane.xlu0 %3960 }
0x15ef   :  { %v3968_v33 = vsub.f32 %v3958_v22, %v3966_v30  ;;  %v3965_v35 = vmul.f32 0.03125, %v3961_v32 }
0x15f1   :  { %v3967_v36 = vsub.f32 %v3957_v26, %v3965_v35  ;;  %v3970_v38 = vmul.f32 %v3968_v33, %v3968_v33 }
0x15f3   :  { %v3974_v8 = vsel %vm286_vm2, %v3970_v38, 0.0  ;;  %v3969_v10 = vmul.f32 %v3967_v36, %v3967_v36 }
0x15f4   :  { %3975 = vadd.xlane.f32.xlu1 %v3974_v8 }
0x15f5   :  { %v3971_v39 = vsel %vm286_vm2, %v3969_v10, 0.0 }
0x15f6   :  { %3972 = vadd.xlane.f32.xlu0 %v3971_v39 }
0x167d   :  { %v3976_v47 = vpop.xlane.xlu1 %3975 }
0x167e   :  { %v3978_v48 = vmul.f32 0.03125, %v3976_v47 }
0x167f   :  { %v3973_v49 = vpop.xlane.xlu0 %3972 }
0x1680   :  { %v3980_v50 = vadd.f32 1e-05, %v3978_v48  ;;  %v3977_v51 = vmul.f32 0.03125, %v3973_v49 }
0x1682   :  { %8332 = vrsqrt.f32 %v3980_v50  ;;  %v3979_v52 = vadd.f32 1e-05, %v3977_v51 }
0x1684   :  { %8334 = vrsqrt.f32 %v3979_v52 }
0x168f   :  { %v8333_v55 = vpop.eup %8332 }
0x1690   :  { %v3984_v56 = vmul.f32 %v8333_v55, %v3968_v33 }
0x1691   :  { %v8335_v58 = vpop.eup %8334 }
0x1692   :  { %v3983_v62 = vmul.f32 %v8335_v58, %v3967_v36  ;;  %v3990_v63 = vmul.f32 %v3988_v54, %v3984_v56 }
0x1694   :  { %v3989_v0 = vmul.f32 %v3988_v54, %v3983_v62  ;;  %v3996_v1 = vadd.f32 %v3994_v60, %v3990_v63 }
0x1696   :  { %v3995_v2 = vadd.f32 %v3994_v60, %v3989_v0  ;;  %v3998_v4 = vadd.f32 %v3996_v1, %v9008_v59 }
0x1698   :  { %v3997_v3 = vadd.f32 %v3995_v2, %v9004_v57  ;;  %v4164_v57 = vpop.f32.mrf.mxu1 }
0x1699   :  { %v4169_v7 = vrot.slane %v4164_v57, 1 }
0x169a   :  { %7914 = vmatprep.mubr.msk.f32.mxu0 %vm286_vm2, %v3997_v3  ;;  %v7927_v59 = vpop.f32.mrf.mxu1 }
0x169b   :  { %7915 = vmatmul.mubr.msk.f32.vlgmr.msra.gmra.mxu0 %vm286_vm2, %v3998_v4 }
0x169c   :  { %7929 = vmatpush3.msra.mxu0 %v9464_v11  ;;  %7936 = vmatprep.mubr.msk.f32.mxu0 %vm8811_vm3, %v8810_v61 }
0x169d   :  { %7930 = vmatprep.subr.mxu0 %v8810_v61 }
0x169e   :  { %7931 = vmatpush3.msra.mxu0 %v9467_v23 }
0x169f   :  { %7932 = vmatprep.subr.mxu0 %v8810_v61 }
0x16a0   :  { %7933 = vmatpush3.msra.mxu0 %v9470_v42 }
0x16a1   :  { %7934 = vmatprep.subr.mxu0 %v8810_v61 }
0x16a2   :  { %7935 = vmatpush3.msra.mxu0 %v9474_v46 }
0x16a3   :  { %7950 = vmatprep.subr.mxu0 %v8810_v61 }
0x175b   :  { %v7916_v12 = vpop.f32.mrf.mxu0 }
0x175c   :  { %v9511_v13 = vadd.f32 %v7916_v12, %v7296_v6 }
0x175d   :  { %v4082_v17 = vpop.f32.mrf.mxu0 }
0x175e   :  { %v4173_v34 = vadd.f32 %v4169_v7, %v9511_v13  ;;  %v9514_v37 = vadd.f32 %v7296_v6, %v4082_v17 }
0x1760   :  { %8336 = vtanh.f32 %v4173_v34  ;;  %v4172_v18 = vadd.f32 %v4164_v57, %v9514_v37  ;;  %v7300_v21 = vmul.f32 -1.442695, %v4173_v34 }
0x1762   :  { %8338 = vtanh.f32 %v4172_v18  ;;  %v7299_v22 = vmul.f32 -1.442695, %v4172_v18 }
0x1763   :  { %8340 = vpow2.f32 %v7300_v21 }
0x1764   :  { %8342 = vpow2.f32 %v7299_v22 }
0x176d   :  { %v8337_v19 = vpop.eup %8336 }
0x176e   :  { %4194 = vrot.lane.b32.xlu0 %v8337_v19, %s8816_s16 }
0x176f   :  { %v8339_v20 = vpop.eup %8338 }
0x1770   :  { %4192 = vrot.lane.b32.xlu1 %v8339_v20, %s8816_s16  ;;  %v8341_v25 = vpop.eup %8340 }
0x1771   :  { %v4181_v26 = vadd.f32 1.0, %v8341_v25  ;;  %v8343_v27 = vpop.eup %8342 }
0x1772   :  { %v4180_v28 = vadd.f32 1.0, %v8343_v27 }
0x1773   :  { %8344 = vrcp.f32 %v4181_v26 }
0x1774   :  { %8346 = vrcp.f32 %v4180_v28 }
0x1780   :  { %v8345_v29 = vpop.eup %8344 }
0x1781   :  { %v8347_v35 = vpop.eup %8346  ;;  %v4189_v38 = vmul.f32 0.0, %v8345_v29 }
0x1782   :  { %v4188_v39 = vmul.f32 0.0, %v8347_v35 }
0x17e0   :  { %v4195_v30 = vpop.permute.xlu0 %4194 }
0x17e1   :  { %v4199_v32 = vmul.f32 %v8345_v29, %v4195_v30 }
0x17e2   :  { %v4193_v33 = vpop.permute.xlu1 %4192 }
0x17e3   :  { %4204 = vrot.lane.b32.xlu1 %v4199_v32, %s8818_s7  ;;  %v4198_v36 = vmul.f32 %v8347_v35, %v4193_v33 }
0x17e7   :  { %4202 = vrot.lane.b32.xlu1 %v4198_v36, %s8818_s7 }
0x1855   :  { %v4205_v8 = vpop.permute.xlu1 %4204 }
0x1856   :  { %v4209_v10 = vadd.f32 %v4205_v8, %v4189_v38 }
0x1858   :  { %8348 = vtanh.f32 %v4209_v10  ;;  %v4324_v18 = vrot.slane %v4209_v10, 7 }
0x1859   :  { %v4203_v5 = vpop.permute.xlu1 %4202 }
0x185a   :  { %v4208_v24 = vadd.f32 %v4203_v5, %v4188_v39 }
0x185c   :  { %8350 = vtanh.f32 %v4208_v24  ;;  %v4323_v20 = vrot.slane %v4208_v24, 7 }
0x1865   :  { %v8349_v41 = vpop.eup %8348 }
0x1866   :  { %4216 = vrot.lane.b32.xlu0 %v8349_v41, %s8816_s16 }
0x1869   :  { %v8351_v43 = vpop.eup %8350 }
0x186a   :  { %4214 = vrot.lane.b32.xlu1 %v8351_v43, %s8816_s16 }
0x18d8   :  { %v4217_v47 = vpop.permute.xlu0 %4216 }
0x18d9   :  { %v4221_v48 = vmul.f32 %v8345_v29, %v4217_v47 }
0x18db   :  { %v4224_v50 = vrot.slane %v4221_v48, 7 }
0x18dc   :  { %v4215_v49 = vpop.permute.xlu1 %4214 }
0x18dd   :  { %v4220_v51 = vmul.f32 %v8347_v35, %v4215_v49 }
0x18df   :  { %v4226_v52 = vsel %vm4225_vm7, %v4224_v50, %v4220_v51 }
0x18e0   :  { %4227 = vrot.lane.b32.xlu0 %v4226_v52, %s8818_s7 }
0x1952   :  { %v4228_v53 = vpop.permute.xlu0 %4227 }
0x1953   :  { %7937 = vmatmul.mubr.msk.f32.vlgmr.msra.gmra.mxu0 %vm286_vm2, %v4228_v53 }
0x1954   :  { %7951 = vmatpush3.msra.mxu0 %v9464_v11  ;;  %7958 = vmatprep.mubr.msk.f32.mxu0 %vm8811_vm3, %v8810_v61 }
0x1955   :  { %7952 = vmatprep.subr.mxu0 %v8810_v61 }
0x1956   :  { %7953 = vmatpush3.msra.mxu0 %v9467_v23 }
0x1957   :  { %7954 = vmatprep.subr.mxu0 %v8810_v61 }
0x1958   :  { %7955 = vmatpush3.msra.mxu0 %v9470_v42 }
0x1959   :  { %7956 = vmatprep.subr.mxu0 %v8810_v61 }
0x195a   :  { %7957 = vmatpush3.msra.mxu0 %v9474_v46 }
0x195b   :  { %7972 = vmatprep.subr.mxu0 %v8810_v61 }
0x1a13   :  { %v4297_v54 = vpop.f32.mrf.mxu0 }
0x1a14   :  { %v4302_v55 = vrot.slane %v4297_v54, 7  ;;  %v4306_v56 = vadd.f32 %v4297_v54, %v9511_v13 }
0x1a15   :  { %v7938_v58 = vpop.f32.mrf.mxu0 }
0x1a16   :  { %v4305_v60 = vadd.f32 %v4302_v55, %v9514_v37  ;;  %8352 = vtanh.f32 %v4306_v56  ;;  %v7303_v0 = vmul.f32 -1.442695, %v4306_v56 }
0x1a18   :  { %8354 = vtanh.f32 %v4305_v60  ;;  %v7302_v1 = vmul.f32 -1.442695, %v4305_v60 }
0x1a19   :  { %8356 = vpow2.f32 %v7303_v0 }
0x1a1a   :  { %8358 = vpow2.f32 %v7302_v1 }
0x1a23   :  { %v8353_v62 = vpop.eup %8352 }
0x1a24   :  { %4333 = vrot.lane.b32.xlu0 %v8353_v62, %s8816_s16 }
0x1a25   :  { %v8355_v63 = vpop.eup %8354 }
0x1a26   :  { %4331 = vrot.lane.b32.xlu1 %v8355_v63, %s8816_s16  ;;  %v8357_v2 = vpop.eup %8356 }
0x1a27   :  { %v8359_v3 = vpop.eup %8358  ;;  %v4314_v4 = vadd.f32 1.0, %v8357_v2 }
0x1a28   :  { %v4313_v57 = vadd.f32 1.0, %v8359_v3 }
0x1a29   :  { %8360 = vrcp.f32 %v4314_v4 }
0x1a2a   :  { %8362 = vrcp.f32 %v4313_v57 }
0x1a36   :  { %v8361_v59 = vpop.eup %8360 }
0x1a37   :  { %v8363_v12 = vpop.eup %8362  ;;  %v4328_v19 = vmul.f32 %v8361_v59, %v4324_v18 }
0x1a38   :  { %v4327_v25 = vmul.f32 %v8363_v12, %v4323_v20 }
0x1a96   :  { %v4334_v6 = vpop.permute.xlu0 %4333 }
0x1a97   :  { %v4338_v7 = vmul.f32 %v8361_v59, %v4334_v6 }
0x1a98   :  { %v4332_v17 = vpop.permute.xlu1 %4331 }
0x1a99   :  { %4343 = vrot.lane.b32.xlu0 %v4338_v7, %s8818_s7  ;;  %v4337_v34 = vmul.f32 %v8363_v12, %v4332_v17 }
0x1a9b   :  { %4341 = vrot.lane.b32.xlu1 %v4337_v34, %s8818_s7 }
0x1b0b   :  { %v4344_v21 = vpop.permute.xlu0 %4343 }
0x1b0c   :  { %v4348_v22 = vadd.f32 %v4344_v21, %v4328_v19 }
0x1b0d   :  { %v4342_v26 = vpop.permute.xlu1 %4341 }
0x1b0e   :  { %8364 = vtanh.f32 %v4348_v22  ;;  %v4347_v27 = vadd.f32 %v4342_v26, %v4327_v25  ;;  %v4463_v1 = vrot.slane %v4348_v22, 7 }
0x1b10   :  { %8366 = vtanh.f32 %v4347_v27  ;;  %v4462_v0 = vrot.slane %v4347_v27, 7 }
0x1b1b   :  { %v8365_v28 = vpop.eup %8364 }
0x1b1c   :  { %4355 = vrot.lane.b32.xlu0 %v8365_v28, %s8816_s16 }
0x1b1d   :  { %v8367_v29 = vpop.eup %8366 }
0x1b1e   :  { %4353 = vrot.lane.b32.xlu1 %v8367_v29, %s8816_s16 }
0x1b8e   :  { %v4356_v30 = vpop.permute.xlu0 %4355 }
0x1b8f   :  { %v4360_v35 = vmul.f32 %v8361_v59, %v4356_v30 }
0x1b90   :  { %v4354_v32 = vpop.permute.xlu1 %4353 }
0x1b91   :  { %v4359_v33 = vmul.f32 %v8363_v12, %v4354_v32 }
0x1b93   :  { %v4363_v36 = vrot.slane %v4359_v33, 1 }
0x1b95   :  { %v4364_v38 = vsel %vm4225_vm7, %v4360_v35, %v4363_v36 }
0x1b96   :  { %4365 = vrot.lane.b32.xlu1 %v4364_v38, %s8818_s7 }
0x1c08   :  { %v4366_v8 = vpop.permute.xlu1 %4365 }
0x1c09   :  { %7948 = vmatmul.mubr.msk.f32.vlgmr.msra.gmra.mxu1 %vm286_vm2, %v4366_v8 }
0x1c0a   :  { %7962 = vmatpush3.msra.mxu1 %v9464_v11  ;;  %7969 = vmatprep.mubr.msk.f32.mxu1 %vm8811_vm3, %v8810_v61 }
0x1c0b   :  { %7963 = vmatprep.subr.mxu1 %v8810_v61 }
0x1c0c   :  { %7964 = vmatpush3.msra.mxu1 %v9467_v23 }
0x1c0d   :  { %7965 = vmatprep.subr.mxu1 %v8810_v61 }
0x1c0e   :  { %7966 = vmatpush3.msra.mxu1 %v9470_v42 }
0x1c0f   :  { %7967 = vmatprep.subr.mxu1 %v8810_v61 }
0x1c10   :  { %7968 = vmatpush3.msra.mxu1 %v9474_v46 }
0x1c11   :  { %7983 = vmatprep.subr.mxu1 %v8810_v61 }
0x1cc9   :  { %v4435_v10 = vpop.f32.mrf.mxu1 }
0x1cca   :  { %v4440_v39 = vrot.slane %v4435_v10, 6  ;;  %v4441_v5 = vrot.slane %v4435_v10, 7 }
0x1ccb   :  { %v7949_v24 = vpop.f32.mrf.mxu1 }
0x1ccc   :  { %v4444_v41 = vadd.f32 %v4440_v39, %v9514_v37  ;;  %v4445_v43 = vadd.f32 %v4441_v5, %v9511_v13 }
0x1cce   :  { %8368 = vtanh.f32 %v4444_v41  ;;  %v7305_v49 = vmul.f32 -1.442695, %v4444_v41  ;;  %v7306_v50 = vmul.f32 -1.442695, %v4445_v43 }
0x1ccf   :  { %8370 = vtanh.f32 %v4445_v43 }
0x1cd0   :  { %8372 = vpow2.f32 %v7305_v49 }
0x1cd1   :  { %8374 = vpow2.f32 %v7306_v50 }
0x1cdb   :  { %v8369_v47 = vpop.eup %8368 }
0x1cdc   :  { %v8371_v48 = vpop.eup %8370  ;;  %4470 = vrot.lane.b32.xlu0 %v8369_v47, %s8816_s16 }
0x1cdd   :  { %4472 = vrot.lane.b32.xlu1 %v8371_v48, %s8816_s16  ;;  %v8373_v51 = vpop.eup %8372 }
0x1cde   :  { %v8375_v52 = vpop.eup %8374  ;;  %v4452_v53 = vadd.f32 1.0, %v8373_v51 }
0x1cdf   :  { %v4453_v54 = vadd.f32 1.0, %v8375_v52 }
0x1ce0   :  { %8376 = vrcp.f32 %v4452_v53 }
0x1ce1   :  { %8378 = vrcp.f32 %v4453_v54 }
0x1ced   :  { %v8377_v55 = vpop.eup %8376 }
0x1cee   :  { %v8379_v58 = vpop.eup %8378  ;;  %v4466_v2 = vmul.f32 %v8377_v55, %v4462_v0 }
0x1cef   :  { %v4467_v3 = vmul.f32 %v8379_v58, %v4463_v1 }
0x1d4e   :  { %v4471_v56 = vpop.permute.xlu0 %4470 }
0x1d4f   :  { %v4473_v60 = vpop.permute.xlu1 %4472  ;;  %v4476_v62 = vmul.f32 %v8377_v55, %v4471_v56 }
0x1d50   :  { %v4477_v63 = vmul.f32 %v8379_v58, %v4473_v60 }
0x1d51   :  { %4480 = vrot.lane.b32.xlu0 %v4476_v62, %s8818_s7 }
0x1d52   :  { %4482 = vrot.lane.b32.xlu1 %v4477_v63, %s8818_s7 }
0x1dc3   :  { %v4481_v4 = vpop.permute.xlu0 %4480 }
0x1dc4   :  { %v4483_v57 = vpop.permute.xlu1 %4482  ;;  %v4486_v59 = vadd.f32 %v4481_v4, %v4466_v2 }
0x1dc5   :  { %v4487_v6 = vadd.f32 %v4483_v57, %v4467_v3 }
0x1dc6   :  { %8380 = vtanh.f32 %v4486_v59  ;;  %v4602_v50 = vrot.slane %v4486_v59, 7 }
0x1dc7   :  { %8382 = vtanh.f32 %v4487_v6  ;;  %v4603_v51 = vrot.slane %v4487_v6, 7 }
0x1dd3   :  { %v8381_v7 = vpop.eup %8380 }
0x1dd4   :  { %v8383_v12 = vpop.eup %8382  ;;  %4492 = vrot.lane.b32.xlu0 %v8381_v7, %s8816_s16 }
0x1dd5   :  { %4494 = vrot.lane.b32.xlu1 %v8383_v12, %s8816_s16 }
0x1e46   :  { %v4493_v17 = vpop.permute.xlu0 %4492 }
0x1e47   :  { %v4495_v34 = vpop.permute.xlu1 %4494  ;;  %v4498_v18 = vmul.f32 %v8377_v55, %v4493_v17 }
0x1e48   :  { %v4499_v19 = vmul.f32 %v8379_v58, %v4495_v34 }
0x1e49   :  { %v4502_v20 = vrot.slane %v4498_v18, 2 }
0x1e4a   :  { %v4503_v21 = vrot.slane %v4499_v19, 1 }
0x1e4c   :  { %v4504_v22 = vsel %vm4225_vm7, %v4503_v21, %v4502_v20 }
0x1e4d   :  { %4505 = vrot.lane.b32.xlu0 %v4504_v22, %s8818_s7 }
0x1ebf   :  { %v4506_v25 = vpop.permute.xlu0 %4505 }
0x1ec0   :  { %7959 = vmatmul.mubr.msk.f32.vlgmr.msra.gmra.mxu0 %vm286_vm2, %v4506_v25 }
0x1ec1   :  { %7973 = vmatpush3.msra.mxu0 %v9464_v11  ;;  %7980 = vmatprep.mubr.msk.f32.mxu0 %vm8811_vm3, %v8810_v61 }
0x1ec2   :  { %7974 = vmatprep.subr.mxu0 %v8810_v61 }
0x1ec3   :  { %7975 = vmatpush3.msra.mxu0 %v9467_v23 }
0x1ec4   :  { %7976 = vmatprep.subr.mxu0 %v8810_v61 }
0x1ec5   :  { %7977 = vmatpush3.msra.mxu0 %v9470_v42 }
0x1ec6   :  { %7978 = vmatprep.subr.mxu0 %v8810_v61 }
0x1ec7   :  { %7979 = vmatpush3.msra.mxu0 %v9474_v46 }
0x1ec8   :  { %7994 = vmatprep.subr.mxu0 %v8810_v61 }
0x1f80   :  { %v4575_v26 = vpop.f32.mrf.mxu0 }
0x1f81   :  { %v4580_v27 = vrot.slane %v4575_v26, 5  ;;  %v4581_v28 = vrot.slane %v4575_v26, 6 }
0x1f82   :  { %v7960_v29 = vpop.f32.mrf.mxu0 }
0x1f83   :  { %v4584_v30 = vadd.f32 %v4580_v27, %v9514_v37  ;;  %v4585_v32 = vadd.f32 %v4581_v28, %v9511_v13 }
0x1f85   :  { %8384 = vtanh.f32 %v4584_v30  ;;  %v7308_v36 = vmul.f32 -1.442695, %v4584_v30  ;;  %v7309_v38 = vmul.f32 -1.442695, %v4585_v32 }
0x1f86   :  { %8386 = vtanh.f32 %v4585_v32 }
0x1f87   :  { %8388 = vpow2.f32 %v7308_v36 }
0x1f88   :  { %8390 = vpow2.f32 %v7309_v38 }
0x1f92   :  { %v8385_v33 = vpop.eup %8384 }
0x1f93   :  { %v8387_v35 = vpop.eup %8386  ;;  %4610 = vrot.lane.b32.xlu1 %v8385_v33, %s8816_s16 }
0x1f94   :  { %4612 = vrot.lane.b32.xlu0 %v8387_v35, %s8816_s16  ;;  %v8389_v8 = vpop.eup %8388 }
0x1f95   :  { %v8391_v10 = vpop.eup %8390  ;;  %v4592_v39 = vadd.f32 1.0, %v8389_v8 }
0x1f96   :  { %v4593_v5 = vadd.f32 1.0, %v8391_v10 }
0x1f97   :  { %8392 = vrcp.f32 %v4592_v39 }
0x1f98   :  { %8394 = vrcp.f32 %v4593_v5 }
0x1fa4   :  { %v8393_v24 = vpop.eup %8392 }
0x1fa5   :  { %v8395_v43 = vpop.eup %8394  ;;  %v4606_v52 = vmul.f32 %v8393_v24, %v4602_v50 }
0x1fa6   :  { %v4607_v53 = vmul.f32 %v8395_v43, %v4603_v51 }
0x2005   :  { %v4611_v41 = vpop.permute.xlu1 %4610 }
0x2006   :  { %v4613_v47 = vpop.permute.xlu0 %4612  ;;  %v4616_v48 = vmul.f32 %v8393_v24, %v4611_v41 }
0x2007   :  { %v4617_v49 = vmul.f32 %v8395_v43, %v4613_v47 }
0x2008   :  { %4620 = vrot.lane.b32.xlu1 %v4616_v48, %s8818_s7 }
0x2009   :  { %4622 = vrot.lane.b32.xlu0 %v4617_v49, %s8818_s7 }
0x207a   :  { %v4621_v54 = vpop.permute.xlu1 %4620 }
0x207b   :  { %v4623_v55 = vpop.permute.xlu0 %4622  ;;  %v4626_v56 = vadd.f32 %v4621_v54, %v4606_v52 }
0x207c   :  { %v4627_v58 = vadd.f32 %v4623_v55, %v4607_v53 }
0x207d   :  { %8396 = vtanh.f32 %v4626_v56  ;;  %v4742_v38 = vrot.slane %v4626_v56, 7 }
0x207e   :  { %8398 = vtanh.f32 %v4627_v58  ;;  %v4743_v8 = vrot.slane %v4627_v58, 7 }
0x208a   :  { %v8397_v60 = vpop.eup %8396 }
0x208b   :  { %v8399_v62 = vpop.eup %8398  ;;  %4632 = vrot.lane.b32.xlu1 %v8397_v60, %s8816_s16 }
0x208c   :  { %4634 = vrot.lane.b32.xlu0 %v8399_v62, %s8816_s16 }
0x20fd   :  { %v4633_v63 = vpop.permute.xlu1 %4632 }
0x20fe   :  { %v4635_v0 = vpop.permute.xlu0 %4634  ;;  %v4638_v1 = vmul.f32 %v8393_v24, %v4633_v63 }
0x20ff   :  { %v4639_v2 = vmul.f32 %v8395_v43, %v4635_v0 }
0x2100   :  { %v4642_v3 = vrot.slane %v4638_v1, 3 }
0x2101   :  { %v4643_v4 = vrot.slane %v4639_v2, 2 }
0x2103   :  { %v4644_v57 = vsel %vm4225_vm7, %v4643_v4, %v4642_v3 }
0x2104   :  { %4645 = vrot.lane.b32.xlu1 %v4644_v57, %s8818_s7 }
0x2176   :  { %v4646_v59 = vpop.permute.xlu1 %4645 }
0x2177   :  { %7970 = vmatmul.mubr.msk.f32.vlgmr.msra.gmra.mxu1 %vm286_vm2, %v4646_v59 }
0x2178   :  { %7984 = vmatpush3.msra.mxu1 %v9464_v11  ;;  %7991 = vmatprep.mubr.msk.f32.mxu1 %vm8811_vm3, %v8810_v61 }
0x2179   :  { %7985 = vmatprep.subr.mxu1 %v8810_v61 }
0x217a   :  { %7986 = vmatpush3.msra.mxu1 %v9467_v23 }
0x217b   :  { %7987 = vmatprep.subr.mxu1 %v8810_v61 }
0x217c   :  { %7988 = vmatpush3.msra.mxu1 %v9470_v42 }
0x217d   :  { %7989 = vmatprep.subr.mxu1 %v8810_v61 }
0x217e   :  { %7990 = vmatpush3.msra.mxu1 %v9474_v46 }
0x217f   :  { %8005 = vmatprep.subr.mxu1 %v8810_v61 }
0x2237   :  { %v4715_v6 = vpop.f32.mrf.mxu1 }
0x2238   :  { %v4720_v7 = vrot.slane %v4715_v6, 4  ;;  %v4721_v12 = vrot.slane %v4715_v6, 5 }
0x2239   :  { %v7971_v17 = vpop.f32.mrf.mxu1 }
0x223a   :  { %v4724_v34 = vadd.f32 %v4720_v7, %v9514_v37  ;;  %v4725_v18 = vadd.f32 %v4721_v12, %v9511_v13 }
0x223c   :  { %8400 = vtanh.f32 %v4724_v34  ;;  %v7311_v21 = vmul.f32 -1.442695, %v4724_v34  ;;  %v7312_v22 = vmul.f32 -1.442695, %v4725_v18 }
0x223d   :  { %8402 = vtanh.f32 %v4725_v18 }
0x223e   :  { %8404 = vpow2.f32 %v7311_v21 }
0x223f   :  { %8406 = vpow2.f32 %v7312_v22 }
0x2249   :  { %v8401_v19 = vpop.eup %8400 }
0x224a   :  { %v8403_v20 = vpop.eup %8402  ;;  %4750 = vrot.lane.b32.xlu0 %v8401_v19, %s8816_s16 }
0x224b   :  { %4752 = vrot.lane.b32.xlu1 %v8403_v20, %s8816_s16  ;;  %v8405_v25 = vpop.eup %8404 }
0x224c   :  { %v8407_v26 = vpop.eup %8406  ;;  %v4732_v27 = vadd.f32 1.0, %v8405_v25 }
0x224d   :  { %v4733_v28 = vadd.f32 1.0, %v8407_v26 }
0x224e   :  { %8408 = vrcp.f32 %v4732_v27 }
0x224f   :  { %8410 = vrcp.f32 %v4733_v28 }
0x225b   :  { %v8409_v29 = vpop.eup %8408 }
0x225c   :  { %v8411_v32 = vpop.eup %8410  ;;  %v4746_v10 = vmul.f32 %v8409_v29, %v4742_v38 }
0x225d   :  { %v4747_v39 = vmul.f32 %v8411_v32, %v4743_v8 }
0x22bc   :  { %v4751_v30 = vpop.permute.xlu0 %4750 }
0x22bd   :  { %v4753_v33 = vpop.permute.xlu1 %4752  ;;  %v4756_v35 = vmul.f32 %v8409_v29, %v4751_v30 }
0x22be   :  { %v4757_v36 = vmul.f32 %v8411_v32, %v4753_v33 }
0x22bf   :  { %4760 = vrot.lane.b32.xlu0 %v4756_v35, %s8818_s7 }
0x22c0   :  { %4762 = vrot.lane.b32.xlu1 %v4757_v36, %s8818_s7 }
0x2331   :  { %v4761_v5 = vpop.permute.xlu0 %4760 }
0x2332   :  { %v4763_v24 = vpop.permute.xlu1 %4762  ;;  %v4766_v41 = vadd.f32 %v4761_v5, %v4746_v10 }
0x2333   :  { %v4767_v43 = vadd.f32 %v4763_v24, %v4747_v39 }
0x2334   :  { %8412 = vtanh.f32 %v4766_v41  ;;  %v4882_v18 = vrot.slane %v4766_v41, 7 }
0x2335   :  { %8414 = vtanh.f32 %v4767_v43  ;;  %v4883_v19 = vrot.slane %v4767_v43, 7 }
0x2341   :  { %v8413_v47 = vpop.eup %8412 }
0x2342   :  { %v8415_v48 = vpop.eup %8414  ;;  %4772 = vrot.lane.b32.xlu0 %v8413_v47, %s8816_s16 }
0x2343   :  { %4774 = vrot.lane.b32.xlu1 %v8415_v48, %s8816_s16 }
0x23b4   :  { %v4773_v49 = vpop.permute.xlu0 %4772 }
0x23b5   :  { %v4775_v50 = vpop.permute.xlu1 %4774  ;;  %v4778_v51 = vmul.f32 %v8409_v29, %v4773_v49 }
0x23b6   :  { %v4779_v52 = vmul.f32 %v8411_v32, %v4775_v50 }
0x23b7   :  { %v4782_v53 = vrot.slane %v4778_v51, 4 }
0x23b8   :  { %v4783_v54 = vrot.slane %v4779_v52, 3 }
0x23ba   :  { %v4784_v55 = vsel %vm4225_vm7, %v4783_v54, %v4782_v53 }
0x23bb   :  { %4785 = vrot.lane.b32.xlu0 %v4784_v55, %s8818_s7 }
0x242d   :  { %v4786_v56 = vpop.permute.xlu0 %4785 }
0x242e   :  { %7981 = vmatmul.mubr.msk.f32.vlgmr.msra.gmra.mxu0 %vm286_vm2, %v4786_v56 }
0x242f   :  { %7995 = vmatpush3.msra.mxu0 %v9464_v11  ;;  %8002 = vmatprep.mubr.msk.f32.mxu0 %vm8811_vm3, %v8810_v61 }
0x2430   :  { %7996 = vmatprep.subr.mxu0 %v8810_v61 }
0x2431   :  { %7997 = vmatpush3.msra.mxu0 %v9467_v23 }
0x2432   :  { %7998 = vmatprep.subr.mxu0 %v8810_v61 }
0x2433   :  { %7999 = vmatpush3.msra.mxu0 %v9470_v42 }
0x2434   :  { %8000 = vmatprep.subr.mxu0 %v8810_v61 }
0x2435   :  { %8001 = vmatpush3.msra.mxu0 %v9474_v46 }
0x2436   :  { %8016 = vmatprep.subr.mxu0 %v8810_v61 }
0x24ee   :  { %v4855_v58 = vpop.f32.mrf.mxu0 }
0x24ef   :  { %v4860_v60 = vrot.slane %v4855_v58, 3  ;;  %v4861_v11 = vrot.slane %v4855_v58, 4 }
0x24f0   :  { %v7982_v62 = vpop.f32.mrf.mxu0 }
0x24f1   :  { %v4864_v63 = vadd.f32 %v4860_v60, %v9514_v37  ;;  %v4865_v0 = vadd.f32 %v4861_v11, %v9511_v13 }
0x24f3   :  { %8416 = vtanh.f32 %v4864_v63  ;;  %v7314_v42 = vmul.f32 -1.442695, %v4864_v63  ;;  %v7315_v46 = vmul.f32 -1.442695, %v4865_v0 }
0x24f4   :  { %8418 = vtanh.f32 %v4865_v0 }
0x24f5   :  { %8420 = vpow2.f32 %v7314_v42 }
0x24f6   :  { %8422 = vpow2.f32 %v7315_v46 }
0x2500   :  { %v8417_v23 = vpop.eup %8416 }
0x2501   :  { %v8419_v1 = vpop.eup %8418  ;;  %4890 = vrot.lane.b32.xlu1 %v8417_v23, %s8816_s16 }
0x2502   :  { %4892 = vrot.lane.b32.xlu0 %v8419_v1, %s8816_s16  ;;  %v8421_v2 = vpop.eup %8420 }
0x2503   :  { %v8423_v3 = vpop.eup %8422  ;;  %v4872_v4 = vadd.f32 1.0, %v8421_v2 }
0x2504   :  { %v4873_v57 = vadd.f32 1.0, %v8423_v3 }
0x2505   :  { %8424 = vrcp.f32 %v4872_v4 }
0x2506   :  { %8426 = vrcp.f32 %v4873_v57 }
0x2512   :  { %v8425_v59 = vpop.eup %8424 }
0x2513   :  { %v8427_v7 = vpop.eup %8426  ;;  %v4886_v20 = vmul.f32 %v8425_v59, %v4882_v18 }
0x2514   :  { %v4887_v21 = vmul.f32 %v8427_v7, %v4883_v19 }
0x2573   :  { %v4891_v6 = vpop.permute.xlu1 %4890 }
0x2574   :  { %v4893_v12 = vpop.permute.xlu0 %4892  ;;  %v4896_v17 = vmul.f32 %v8425_v59, %v4891_v6 }
0x2575   :  { %v4897_v34 = vmul.f32 %v8427_v7, %v4893_v12 }
0x2576   :  { %4900 = vrot.lane.b32.xlu1 %v4896_v17, %s8818_s7 }
0x2577   :  { %4902 = vrot.lane.b32.xlu0 %v4897_v34, %s8818_s7 }
0x25e8   :  { %v4901_v22 = vpop.permute.xlu1 %4900 }
0x25e9   :  { %v4903_v25 = vpop.permute.xlu0 %4902  ;;  %v4906_v26 = vadd.f32 %v4901_v22, %v4886_v20 }
0x25ea   :  { %v4907_v27 = vadd.f32 %v4903_v25, %v4887_v21 }
0x25eb   :  { %8428 = vtanh.f32 %v4906_v26  ;;  %v5022_v0 = vrot.slane %v4906_v26, 7 }
0x25ec   :  { %8430 = vtanh.f32 %v4907_v27  ;;  %v5023_v23 = vrot.slane %v4907_v27, 7 }
0x25f8   :  { %v8429_v28 = vpop.eup %8428 }
0x25f9   :  { %v8431_v29 = vpop.eup %8430  ;;  %4912 = vrot.lane.b32.xlu1 %v8429_v28, %s8816_s16 }
0x25fa   :  { %4914 = vrot.lane.b32.xlu0 %v8431_v29, %s8816_s16 }
0x266b   :  { %v4913_v30 = vpop.permute.xlu1 %4912 }
0x266c   :  { %v4915_v32 = vpop.permute.xlu0 %4914  ;;  %v4918_v33 = vmul.f32 %v8425_v59, %v4913_v30 }
0x266d   :  { %v4919_v35 = vmul.f32 %v8427_v7, %v4915_v32 }
0x266e   :  { %v4922_v36 = vrot.slane %v4918_v33, 5 }
0x266f   :  { %v4923_v38 = vrot.slane %v4919_v35, 4 }
0x2671   :  { %v4924_v8 = vsel %vm4225_vm7, %v4923_v38, %v4922_v36 }
0x2672   :  { %4925 = vrot.lane.b32.xlu1 %v4924_v8, %s8818_s7 }
0x26e4   :  { %v4926_v10 = vpop.permute.xlu1 %4925 }
0x26e5   :  { %7992 = vmatmul.mubr.msk.f32.vlgmr.msra.gmra.mxu1 %vm286_vm2, %v4926_v10 }
0x26e6   :  { %8013 = vmatprep.mubr.msk.f32.mxu1 %vm8811_vm3, %v8810_v61 }
0x27a5   :  { %v4995_v39 = vpop.f32.mrf.mxu1 }
0x27a6   :  { %v5000_v5 = vrot.slane %v4995_v39, 2  ;;  %v5001_v24 = vrot.slane %v4995_v39, 3 }
0x27a7   :  { %v7993_v41 = vpop.f32.mrf.mxu1 }
0x27a8   :  { %v5004_v43 = vadd.f32 %v5000_v5, %v9514_v37  ;;  %v5005_v47 = vadd.f32 %v5001_v24, %v9511_v13 }
0x27aa   :  { %8432 = vtanh.f32 %v5004_v43  ;;  %v7317_v50 = vmul.f32 -1.442695, %v5004_v43  ;;  %v7318_v51 = vmul.f32 -1.442695, %v5005_v47 }
0x27ab   :  { %8434 = vtanh.f32 %v5005_v47 }
0x27ac   :  { %8436 = vpow2.f32 %v7317_v50 }
0x27ad   :  { %8438 = vpow2.f32 %v7318_v51 }
0x27b7   :  { %v8433_v48 = vpop.eup %8432 }
0x27b8   :  { %v8435_v49 = vpop.eup %8434  ;;  %5030 = vrot.lane.b32.xlu0 %v8433_v48, %s8816_s16 }
0x27b9   :  { %5032 = vrot.lane.b32.xlu1 %v8435_v49, %s8816_s16  ;;  %v8437_v52 = vpop.eup %8436 }
0x27ba   :  { %v8439_v53 = vpop.eup %8438  ;;  %v5012_v54 = vadd.f32 1.0, %v8437_v52 }
0x27bb   :  { %v5013_v55 = vadd.f32 1.0, %v8439_v53 }
0x27bc   :  { %8440 = vrcp.f32 %v5012_v54 }
0x27bd   :  { %8442 = vrcp.f32 %v5013_v55 }
0x27c9   :  { %v8441_v56 = vpop.eup %8440 }
0x27ca   :  { %v8443_v60 = vpop.eup %8442  ;;  %v5026_v1 = vmul.f32 %v8441_v56, %v5022_v0 }
0x27cb   :  { %v5027_v42 = vmul.f32 %v8443_v60, %v5023_v23 }
0x282a   :  { %v5031_v58 = vpop.permute.xlu0 %5030 }
0x282b   :  { %v5033_v11 = vpop.permute.xlu1 %5032  ;;  %v5036_v62 = vmul.f32 %v8441_v56, %v5031_v58  ;;  %v7324_v58 = vld [vmem:[%s10154_s8 + $0x30] sm:$0xff] }
0x282c   :  { %v5037_v63 = vmul.f32 %v8443_v60, %v5033_v11  ;;  %v7322_v11 = vld [vmem:[%s10154_s8 + $0x20] sm:$0xff] }
0x282d   :  { %5040 = vrot.lane.b32.xlu0 %v5036_v62, %s8818_s7 }
0x282e   :  { %5042 = vrot.lane.b32.xlu1 %v5037_v63, %s8818_s7 }
0x289f   :  { %v5041_v46 = vpop.permute.xlu0 %5040 }
0x28a0   :  { %v5043_v2 = vpop.permute.xlu1 %5042  ;;  %v5046_v3 = vadd.f32 %v5041_v46, %v5026_v1 }
0x28a1   :  { %v5047_v4 = vadd.f32 %v5043_v2, %v5027_v42 }
0x28a2   :  { %8444 = vtanh.f32 %v5046_v3  ;;  %v5162_v41 = vrot.slane %v5046_v3, 7 }
0x28a3   :  { %8446 = vtanh.f32 %v5047_v4  ;;  %v5163_v43 = vrot.slane %v5047_v4, 7 }
0x28af   :  { %v8445_v57 = vpop.eup %8444 }
0x28b0   :  { %v8447_v59 = vpop.eup %8446  ;;  %5052 = vrot.lane.b32.xlu0 %v8445_v57, %s8816_s16  ;;  %v8582_v57 = vld [vmem:[%s10158_s12 + $0x10] sm:$0xff] }
0x28b1   :  { %5054 = vrot.lane.b32.xlu1 %v8447_v59, %s8816_s16  ;;  %v5208_v59 = vrot.slane %v8582_v57, %v8995_v44 }
0x2922   :  { %v5053_v6 = vpop.permute.xlu0 %5052 }
0x2923   :  { %v5055_v7 = vpop.permute.xlu1 %5054  ;;  %v5058_v12 = vmul.f32 %v8441_v56, %v5053_v6  ;;  %v7325_v56 = vld [vmem:[%s10154_s8 + $0x38] sm:$0xff] }
0x2924   :  { %v5059_v17 = vmul.f32 %v8443_v60, %v5055_v7  ;;  %8006 = vmatpush3.msra.mxu1 %v7325_v56  ;;  %v7323_v60 = vld [vmem:[%s10154_s8 + $0x28] sm:$0xff] }
0x2925   :  { %v5062_v34 = vrot.slane %v5058_v12, 6  ;;  %8007 = vmatprep.subr.mxu1 %v8810_v61 }
0x2926   :  { %v5063_v18 = vrot.slane %v5059_v17, 5  ;;  %8008 = vmatpush3.msra.mxu1 %v7324_v58 }
0x2927   :  { %8009 = vmatprep.subr.mxu1 %v8810_v61 }
0x2928   :  { %v5064_v19 = vsel %vm4225_vm7, %v5063_v18, %v5062_v34  ;;  %8010 = vmatpush3.msra.mxu1 %v7323_v60 }
0x2929   :  { %5065 = vrot.lane.b32.xlu0 %v5064_v19, %s8818_s7  ;;  %8011 = vmatprep.subr.mxu1 %v8810_v61 }
0x292a   :  { %8012 = vmatpush3.msra.mxu1 %v7322_v11 }
0x292b   :  { %8027 = vmatprep.subr.mxu1 %v8810_v61 }
0x299b   :  { %v5066_v20 = vpop.permute.xlu0 %5065 }
0x299c   :  { %8003 = vmatmul.mubr.msk.f32.vlgmr.msra.gmra.mxu0 %vm286_vm2, %v5066_v20 }
0x299d   :  { %8024 = vmatprep.mubr.msk.f32.mxu0 %vm8811_vm3, %v8810_v61 }
0x2a5c   :  { %v5135_v21 = vpop.f32.mrf.mxu0 }
0x2a5d   :  { %v5140_v22 = vrot.slane %v5135_v21, 1  ;;  %v5141_v25 = vrot.slane %v5135_v21, 2 }
0x2a5e   :  { %v8004_v26 = vpop.f32.mrf.mxu0 }
0x2a5f   :  { %v5144_v27 = vadd.f32 %v5140_v22, %v9514_v37  ;;  %v5145_v28 = vadd.f32 %v5141_v25, %v9511_v13  ;;  %v5319_v22 = vld [vmem:[#allocation12 + $0x38] sm:$0xff]  ;;  %v5318_v26 = vld [vmem:[#allocation12 + $0x30] sm:$0xff] }
0x2a60   :  { %v9687_v25 = vld [vmem:[#allocation10 + $0x38] sm:$0xff]  ;;  %8017 = vmatpush3.msra.mxu0 %v5319_v22 }
0x2a61   :  { %8448 = vtanh.f32 %v5144_v27  ;;  %v7320_v32 = vmul.f32 -1.442695, %v5144_v27  ;;  %v7321_v33 = vmul.f32 -1.442695, %v5145_v28  ;;  %v9690_v27 = vld [vmem:[#allocation10 + $0x30] sm:$0xff]  ;;  %8018 = vmatprep.subr.mxu0 %v8810_v61 }
0x2a62   :  { %8450 = vtanh.f32 %v5145_v28  ;;  %v5317_v28 = vld [vmem:[#allocation12 + $0x28] sm:$0xff]  ;;  %8019 = vmatpush3.msra.mxu0 %v5318_v26 }
0x2a63   :  { %8452 = vpow2.f32 %v7320_v32  ;;  %8020 = vmatprep.subr.mxu0 %v8810_v61  ;;  %v9702_v32 = vld [vmem:[#allocation10 + $0x20] sm:$0xff] }
0x2a64   :  { %8454 = vpow2.f32 %v7321_v33  ;;  %8021 = vmatpush3.msra.mxu0 %v5317_v28 }
0x2a65   :  { %8022 = vmatprep.subr.mxu0 %v8810_v61 }
0x2a6e   :  { %v8449_v29 = vpop.eup %8448 }
0x2a6f   :  { %v8451_v30 = vpop.eup %8450  ;;  %5170 = vrot.lane.b32.xlu1 %v8449_v29, %s8816_s16  ;;  %v9694_v29 = vld [vmem:[#allocation10 + $0x28] sm:$0xff] }
0x2a70   :  { %5172 = vrot.lane.b32.xlu0 %v8451_v30, %s8816_s16  ;;  %v8453_v35 = vpop.eup %8452  ;;  %v5316_v30 = vld [vmem:[#allocation12 + $0x20] sm:$0xff] }
0x2a71   :  { %v8455_v36 = vpop.eup %8454  ;;  %v5152_v38 = vadd.f32 1.0, %v8453_v35  ;;  %8023 = vmatpush3.msra.mxu0 %v5316_v30 }
0x2a72   :  { %v5153_v8 = vadd.f32 1.0, %v8455_v36  ;;  %8038 = vmatprep.subr.mxu0 %v8810_v61 }
0x2a73   :  { %8456 = vrcp.f32 %v5152_v38  ;;  %v5305_v38 = vrot.slane %v8582_v57, %v8998_v45 }
0x2a74   :  { %8458 = vrcp.f32 %v5153_v8 }
0x2a80   :  { %v8457_v37 = vpop.eup %8456 }
0x2a81   :  { %v8459_v10 = vpop.eup %8458  ;;  %v5166_v47 = vmul.f32 %v8457_v37, %v5162_v41 }
0x2a82   :  { %v5167_v48 = vmul.f32 %v8459_v10, %v5163_v43 }
0x2ae1   :  { %v5171_v13 = vpop.permute.xlu1 %5170 }
0x2ae2   :  { %v5173_v39 = vpop.permute.xlu0 %5172  ;;  %v5176_v5 = vmul.f32 %v8457_v37, %v5171_v13  ;;  %v5310_v13 = vrot.slane %v8582_v57, %v9199_v40 }
0x2ae3   :  { %v5177_v24 = vmul.f32 %v8459_v10, %v5173_v39 }
0x2ae4   :  { %5180 = vrot.lane.b32.xlu1 %v5176_v5, %s8818_s7 }
0x2ae5   :  { %5182 = vrot.lane.b32.xlu0 %v5177_v24, %s8818_s7 }
0x2b56   :  { %v5181_v49 = vpop.permute.xlu1 %5180 }
0x2b57   :  { %v5183_v50 = vpop.permute.xlu0 %5182  ;;  %v5186_v51 = vadd.f32 %v5181_v49, %v5166_v47  ;;  %v7327_v47 = vld [vmem:[#allocation9 + $0x1] ss:$0 sm:$0xff] }
0x2b58   :  { %v5187_v52 = vadd.f32 %v5183_v50, %v5167_v48 }
0x2b59   :  { %8460 = vtanh.f32 %v5186_v51  ;;  %v7188_v53 = vrot.slane %v5186_v51, 7 }
0x2b5a   :  { %8462 = vtanh.f32 %v5187_v52  ;;  %v7189_v54 = vrot.slane %v5187_v52, 6 }
0x2b5c   :  { %v9653_v55 = vsel %vm4225_vm7, %v7189_v54, %v7188_v53 }
0x2b66   :  { %v8461_v62 = vpop.eup %8460 }
0x2b67   :  { %v8463_v63 = vpop.eup %8462  ;;  %5192 = vrot.lane.b32.xlu1 %v8461_v62, %s8816_s16 }
0x2b68   :  { %5194 = vrot.lane.b32.xlu0 %v8463_v63, %s8816_s16 }
0x2bd9   :  { %v5193_v0 = vpop.permute.xlu1 %5192 }
0x2bda   :  { %v5195_v23 = vpop.permute.xlu0 %5194  ;;  %v5198_v1 = vmul.f32 %v8457_v37, %v5193_v0 }
0x2bdb   :  { %v5199_v42 = vmul.f32 %v8459_v10, %v5195_v23 }
0x2bdc   :  { %v5211_v46 = vrot.slane %v5198_v1, 7 }
0x2bdd   :  { %v5212_v2 = vrot.slane %v5199_v42, 6 }
0x2bdf   :  { %v9674_v3 = vsel %vm4225_vm7, %v5212_v2, %v5211_v46 }
0x2be0   :  { %5214 = vrot.lane.b32.xlu1 %v9674_v3, %s8818_s7 }
0x2c52   :  { %v5215_v4 = vpop.permute.xlu1 %5214 }
0x2c53   :  { %8014 = vmatmul.mubr.msk.f32.vlgmr.msra.gmra.mxu1 %vm286_vm2, %v5215_v4 }
0x2c54   :  { %8035 = vmatprep.mubr.msk.f32.mxu1 %vm8811_vm3, %v8810_v61  ;;  %8028 = vmatpush3.msra.mxu1 %v9687_v25 }
0x2c55   :  { %8029 = vmatprep.subr.mxu1 %v8810_v61 }
0x2c56   :  { %8030 = vmatpush3.msra.mxu1 %v9690_v27 }
0x2c57   :  { %8031 = vmatprep.subr.mxu1 %v8810_v61 }
0x2c58   :  { %8032 = vmatpush3.msra.mxu1 %v9694_v29 }
0x2c59   :  { %8033 = vmatprep.subr.mxu1 %v8810_v61 }
0x2c5a   :  { %8034 = vmatpush3.msra.mxu1 %v9702_v32 }
0x2c5b   :  { %8036 = vmatmul.mubr.f32.vlgmr.msra.gmra.mxu1 %v8810_v61  ;;  %8049 = vmatprep.subr.mxu1 %v8810_v61 }
0x2c5c   :  { %8050 = vmatpush3.msra.mxu1 %v9687_v25  ;;  %8057 = vmatprep.mubr.msk.f32.mxu1 %vm8811_vm3, %v8810_v61 }
0x2c5d   :  { %8051 = vmatprep.subr.mxu1 %v8810_v61 }
0x2c5e   :  { %8052 = vmatpush3.msra.mxu1 %v9690_v27 }
0x2c5f   :  { %8053 = vmatprep.subr.mxu1 %v8810_v61 }
0x2c60   :  { %8054 = vmatpush3.msra.mxu1 %v9694_v29 }
0x2c61   :  { %8055 = vmatprep.subr.mxu1 %v8810_v61 }
0x2c62   :  { %8056 = vmatpush3.msra.mxu1 %v9702_v32 }
0x2c63   :  { %8071 = vmatprep.subr.mxu1 %v8810_v61 }
0x2d13   :  { %v5284_v6 = vpop.f32.mrf.mxu1 }
0x2d14   :  { %v5285_v7 = vadd.f32 %v5284_v6, %v5208_v59 }
0x2d15   :  { %v8015_v12 = vpop.f32.mrf.mxu1 }
0x2d16   :  { %v5289_v17 = vsel %vm5288_vm8, %v5285_v7, 0.0 }
0x2d17   :  { %5290 = vadd.xlane.f32.xlu0 %v5289_v17 }
0x2d1b   :  { %v5472_v41 = vpop.f32.mrf.mxu1 }
0x2d1d   :  { %v8037_v43 = vpop.f32.mrf.mxu1 }
0x2da0   :  { %v5291_v34 = vpop.xlane.xlu0 %5290 }
0x2da1   :  { %v5292_v18 = vmul.f32 0.03125, %v5291_v34 }
0x2da3   :  { %v5293_v19 = vsub.f32 %v5285_v7, %v5292_v18 }
0x2da5   :  { %v5294_v20 = vmul.f32 %v5293_v19, %v5293_v19 }
0x2da7   :  { %v5295_v21 = vsel %vm5288_vm8, %v5294_v20, 0.0 }
0x2da8   :  { %5296 = vadd.xlane.f32.xlu1 %v5295_v21 }
0x2e31   :  { %v5297_v33 = vpop.xlane.xlu1 %5296 }
0x2e32   :  { %v5298_v35 = vmul.f32 0.03125, %v5297_v33 }
0x2e34   :  { %v5299_v36 = vadd.f32 1e-05, %v5298_v35 }
0x2e36   :  { %8464 = vrsqrt.f32 %v5299_v36 }
0x2e43   :  { %v8465_v8 = vpop.eup %8464 }
0x2e44   :  { %v5301_v37 = vmul.f32 %v8465_v8, %v5293_v19 }
0x2e46   :  { %v5306_v10 = vmul.f32 %v5305_v38, %v5301_v37 }
0x2e48   :  { %v5311_v39 = vadd.f32 %v5310_v13, %v5306_v10 }
0x2e4a   :  { %v5312_v5 = vmax.f32 %v5311_v39, 0.0 }
0x2e4c   :  { %v9720_v24 = vadd.f32 %v5312_v5, %v5215_v4 }
0x2e4e   :  { %8025 = vmatmul.mubr.msk.f32.vlgmr.msra.gmra.mxu0 %vm286_vm2, %v9720_v24 }
0x2e4f   :  { %8039 = vmatpush3.msra.mxu0 %v9687_v25  ;;  %8046 = vmatprep.mubr.msk.f32.mxu0 %vm8811_vm3, %v8810_v61 }
0x2e50   :  { %8040 = vmatprep.subr.mxu0 %v8810_v61 }
0x2e51   :  { %8041 = vmatpush3.msra.mxu0 %v9690_v27 }
0x2e52   :  { %8042 = vmatprep.subr.mxu0 %v8810_v61 }
0x2e53   :  { %8043 = vmatpush3.msra.mxu0 %v9694_v29 }
0x2e54   :  { %8044 = vmatprep.subr.mxu0 %v8810_v61 }
0x2e55   :  { %8045 = vmatpush3.msra.mxu0 %v9702_v32 }
0x2e56   :  { %8060 = vmatprep.subr.mxu0 %v8810_v61 }
0x2f0e   :  { %v5397_v48 = vpop.f32.mrf.mxu0 }
0x2f0f   :  { %v9734_v49 = vadd.f32 %v7327_v47, %v5397_v48 }
0x2f10   :  { %v8026_v50 = vpop.f32.mrf.mxu0 }
0x2f11   :  { %v5476_v51 = vadd.f32 %v5472_v41, %v9734_v49 }
0x2f13   :  { %8466 = vtanh.f32 %v5476_v51  ;;  %v7329_v53 = vmul.f32 -1.442695, %v5476_v51 }
0x2f15   :  { %8468 = vpow2.f32 %v7329_v53 }
0x2f20   :  { %v8467_v52 = vpop.eup %8466 }
0x2f21   :  { %5486 = vrot.lane.b32.xlu0 %v8467_v52, %s8816_s16 }
0x2f22   :  { %v8469_v54 = vpop.eup %8468 }
0x2f23   :  { %v5480_v56 = vadd.f32 1.0, %v8469_v54 }
0x2f25   :  { %8470 = vrcp.f32 %v5480_v56 }
0x2f32   :  { %v8471_v58 = vpop.eup %8470 }
0x2f33   :  { %v5484_v62 = vmul.f32 0.0, %v8471_v58 }
0x2f93   :  { %v5487_v60 = vpop.permute.xlu0 %5486 }
0x2f94   :  { %v5489_v11 = vmul.f32 %v8471_v58, %v5487_v60 }
0x2f96   :  { %5491 = vrot.lane.b32.xlu1 %v5489_v11, %s8818_s7 }
0x3008   :  { %v5492_v63 = vpop.permute.xlu1 %5491 }
0x3009   :  { %v5494_v0 = vadd.f32 %v5492_v63, %v5484_v62 }
0x300b   :  { %8472 = vtanh.f32 %v5494_v0 }
0x3018   :  { %v8473_v23 = vpop.eup %8472 }
0x3019   :  { %5497 = vrot.lane.b32.xlu0 %v8473_v23, %s8816_s16 }
0x308b   :  { %v5498_v1 = vpop.permute.xlu0 %5497 }
0x308c   :  { %v9740_v42 = vmul.f32 %v8471_v58, %v5498_v1 }
0x308e   :  { %5502 = vrot.lane.b32.xlu1 %v9740_v42, %s8818_s7 }
0x3100   :  { %v5503_v46 = vpop.permute.xlu1 %5502 }
0x3101   :  { %8047 = vmatmul.mubr.msk.f32.vlgmr.msra.gmra.mxu0 %vm286_vm2, %v5503_v46 }
0x3102   :  { %8061 = vmatpush3.msra.mxu0 %v9687_v25  ;;  %8068 = vmatprep.mubr.msk.f32.mxu0 %vm8811_vm3, %v8810_v61 }
0x3103   :  { %8062 = vmatprep.subr.mxu0 %v8810_v61 }
0x3104   :  { %8063 = vmatpush3.msra.mxu0 %v9690_v27 }
0x3105   :  { %8064 = vmatprep.subr.mxu0 %v8810_v61 }
0x3106   :  { %8065 = vmatpush3.msra.mxu0 %v9694_v29 }
0x3107   :  { %8066 = vmatprep.subr.mxu0 %v8810_v61 }
0x3108   :  { %8067 = vmatpush3.msra.mxu0 %v9702_v32 }
0x3109   :  { %8082 = vmatprep.subr.mxu0 %v8810_v61 }
0x31c1   :  { %v5572_v2 = vpop.f32.mrf.mxu0 }
0x31c2   :  { %v5576_v4 = vadd.f32 %v5572_v2, %v9734_v49 }
0x31c3   :  { %v8048_v57 = vpop.f32.mrf.mxu0 }
0x31c4   :  { %8474 = vtanh.f32 %v5576_v4  ;;  %v7331_v6 = vmul.f32 -1.442695, %v5576_v4 }
0x31c6   :  { %8476 = vpow2.f32 %v7331_v6 }
0x31d1   :  { %v8475_v59 = vpop.eup %8474 }
0x31d2   :  { %5586 = vrot.lane.b32.xlu0 %v8475_v59, %s8816_s16 }
0x31d3   :  { %v8477_v7 = vpop.eup %8476 }
0x31d4   :  { %v5580_v12 = vadd.f32 1.0, %v8477_v7 }
0x31d6   :  { %8478 = vrcp.f32 %v5580_v12 }
0x31e3   :  { %v8479_v17 = vpop.eup %8478 }
0x31e4   :  { %v5584_v19 = vmul.f32 %v8479_v17, %v5494_v0 }
0x3244   :  { %v5587_v34 = vpop.permute.xlu0 %5586 }
0x3245   :  { %v5589_v18 = vmul.f32 %v8479_v17, %v5587_v34 }
0x3247   :  { %5591 = vrot.lane.b32.xlu1 %v5589_v18, %s8818_s7 }
0x32b9   :  { %v5592_v20 = vpop.permute.xlu1 %5591 }
0x32ba   :  { %v5594_v21 = vadd.f32 %v5592_v20, %v5584_v19 }
0x32bc   :  { %8480 = vtanh.f32 %v5594_v21 }
0x32c9   :  { %v8481_v22 = vpop.eup %8480 }
0x32ca   :  { %5597 = vrot.lane.b32.xlu0 %v8481_v22, %s8816_s16 }
0x333c   :  { %v5598_v26 = vpop.permute.xlu0 %5597 }
0x333d   :  { %v5600_v28 = vmul.f32 %v8479_v17, %v5598_v26 }
0x333f   :  { %5602 = vrot.lane.b32.xlu1 %v5600_v28, %s8818_s7  ;;  %v6711_v50 = vrot.slane %v5600_v28, 6 }
0x3341   :  { %v6730_v54 = vsel %vm6729_vm9, %v9740_v42, %v6711_v50 }
0x33b1   :  { %v5603_v30 = vpop.permute.xlu1 %5602 }
0x33b2   :  { %8058 = vmatmul.mubr.msk.f32.vlgmr.msra.gmra.mxu1 %vm286_vm2, %v5603_v30 }
0x33b3   :  { %8072 = vmatpush3.msra.mxu1 %v9687_v25  ;;  %8079 = vmatprep.mubr.msk.f32.mxu1 %vm8811_vm3, %v8810_v61 }
0x33b4   :  { %8073 = vmatprep.subr.mxu1 %v8810_v61 }
0x33b5   :  { %8074 = vmatpush3.msra.mxu1 %v9690_v27 }
0x33b6   :  { %8075 = vmatprep.subr.mxu1 %v8810_v61 }
0x33b7   :  { %8076 = vmatpush3.msra.mxu1 %v9694_v29 }
0x33b8   :  { %8077 = vmatprep.subr.mxu1 %v8810_v61 }
0x33b9   :  { %8078 = vmatpush3.msra.mxu1 %v9702_v32 }
0x33ba   :  { %8093 = vmatprep.subr.mxu1 %v8810_v61 }
0x3472   :  { %v5672_v33 = vpop.f32.mrf.mxu1 }
0x3473   :  { %v5676_v35 = vadd.f32 %v5672_v33, %v9734_v49 }
0x3474   :  { %v8059_v36 = vpop.f32.mrf.mxu1 }
0x3475   :  { %8482 = vtanh.f32 %v5676_v35  ;;  %v7333_v8 = vmul.f32 -1.442695, %v5676_v35 }
0x3477   :  { %8484 = vpow2.f32 %v7333_v8 }
0x3482   :  { %v8483_v38 = vpop.eup %8482 }
0x3483   :  { %5686 = vrot.lane.b32.xlu0 %v8483_v38, %s8816_s16 }
0x3484   :  { %v8485_v37 = vpop.eup %8484 }
0x3485   :  { %v5680_v13 = vadd.f32 1.0, %v8485_v37 }
0x3487   :  { %8486 = vrcp.f32 %v5680_v13 }
0x3494   :  { %v8487_v10 = vpop.eup %8486 }
0x3495   :  { %v5684_v41 = vmul.f32 %v8487_v10, %v5594_v21 }
0x34f5   :  { %v5687_v39 = vpop.permute.xlu0 %5686 }
0x34f6   :  { %v5689_v5 = vmul.f32 %v8487_v10, %v5687_v39 }
0x34f8   :  { %5691 = vrot.lane.b32.xlu1 %v5689_v5, %s8818_s7 }
0x356a   :  { %v5692_v43 = vpop.permute.xlu1 %5691 }
0x356b   :  { %v5694_v47 = vadd.f32 %v5692_v43, %v5684_v41 }
0x356d   :  { %8488 = vtanh.f32 %v5694_v47 }
0x357a   :  { %v8489_v48 = vpop.eup %8488 }
0x357b   :  { %5697 = vrot.lane.b32.xlu0 %v8489_v48, %s8816_s16 }
0x35ed   :  { %v5698_v51 = vpop.permute.xlu0 %5697 }
0x35ee   :  { %v5700_v52 = vmul.f32 %v8487_v10, %v5698_v51 }
0x35f0   :  { %v6713_v53 = vrot.slane %v5700_v52, 4  ;;  %5702 = vrot.lane.b32.xlu1 %v5700_v52, %s8818_s7 }
0x35f2   :  { %v6732_v56 = vsel %vm6731_vm10, %v6730_v54, %v6713_v53 }
0x3662   :  { %v5703_v58 = vpop.permute.xlu1 %5702 }
0x3663   :  { %8069 = vmatmul.mubr.msk.f32.vlgmr.msra.gmra.mxu0 %vm286_vm2, %v5703_v58 }
0x3664   :  { %8083 = vmatpush3.msra.mxu0 %v9687_v25  ;;  %8090 = vmatprep.mubr.msk.f32.mxu0 %vm8811_vm3, %v8810_v61 }
0x3665   :  { %8084 = vmatprep.subr.mxu0 %v8810_v61 }
0x3666   :  { %8085 = vmatpush3.msra.mxu0 %v9690_v27 }
0x3667   :  { %8086 = vmatprep.subr.mxu0 %v8810_v61 }
0x3668   :  { %8087 = vmatpush3.msra.mxu0 %v9694_v29 }
0x3669   :  { %8088 = vmatprep.subr.mxu0 %v8810_v61 }
0x366a   :  { %8089 = vmatpush3.msra.mxu0 %v9702_v32 }
0x366b   :  { %8104 = vmatprep.subr.mxu0 %v8810_v61 }
0x3723   :  { %v5772_v60 = vpop.f32.mrf.mxu0 }
0x3724   :  { %v5776_v11 = vadd.f32 %v5772_v60, %v9734_v49 }
0x3725   :  { %v8070_v62 = vpop.f32.mrf.mxu0 }
0x3726   :  { %8490 = vtanh.f32 %v5776_v11  ;;  %v7335_v0 = vmul.f32 -1.442695, %v5776_v11 }
0x3728   :  { %8492 = vpow2.f32 %v7335_v0 }
0x3733   :  { %v8491_v63 = vpop.eup %8490 }
0x3734   :  { %5786 = vrot.lane.b32.xlu0 %v8491_v63, %s8816_s16 }
0x3735   :  { %v8493_v23 = vpop.eup %8492 }
0x3736   :  { %v5780_v1 = vadd.f32 1.0, %v8493_v23 }
0x3738   :  { %8494 = vrcp.f32 %v5780_v1 }
0x3745   :  { %v8495_v42 = vpop.eup %8494 }
0x3746   :  { %v5784_v4 = vmul.f32 %v8495_v42, %v5694_v47 }
0x37a6   :  { %v5787_v46 = vpop.permute.xlu0 %5786 }
0x37a7   :  { %v5789_v2 = vmul.f32 %v8495_v42, %v5787_v46 }
0x37a9   :  { %5791 = vrot.lane.b32.xlu1 %v5789_v2, %s8818_s7 }
0x381b   :  { %v5792_v57 = vpop.permute.xlu1 %5791 }
0x381c   :  { %v5794_v59 = vadd.f32 %v5792_v57, %v5784_v4 }
0x381e   :  { %8496 = vtanh.f32 %v5794_v59 }
0x382b   :  { %v8497_v6 = vpop.eup %8496 }
0x382c   :  { %5797 = vrot.lane.b32.xlu0 %v8497_v6, %s8816_s16 }
0x389e   :  { %v5798_v7 = vpop.permute.xlu0 %5797 }
0x389f   :  { %v5800_v12 = vmul.f32 %v8495_v42, %v5798_v7 }
0x38a1   :  { %v6715_v17 = vrot.slane %v5800_v12, 2  ;;  %5802 = vrot.lane.b32.xlu1 %v5800_v12, %s8818_s7 }
0x38a3   :  { %v9796_v34 = vsel %vm199_vm0, %v6732_v56, %v6715_v17 }
0x3913   :  { %v5803_v18 = vpop.permute.xlu1 %5802 }
0x3914   :  { %8080 = vmatmul.mubr.msk.f32.vlgmr.msra.gmra.mxu1 %vm286_vm2, %v5803_v18 }
0x3915   :  { %8094 = vmatpush3.msra.mxu1 %v9687_v25  ;;  %8101 = vmatprep.mubr.msk.f32.mxu1 %vm8811_vm3, %v8810_v61 }
0x3916   :  { %8095 = vmatprep.subr.mxu1 %v8810_v61 }
0x3917   :  { %8096 = vmatpush3.msra.mxu1 %v9690_v27 }
0x3918   :  { %8097 = vmatprep.subr.mxu1 %v8810_v61 }
0x3919   :  { %8098 = vmatpush3.msra.mxu1 %v9694_v29 }
0x391a   :  { %8099 = vmatprep.subr.mxu1 %v8810_v61 }
0x391b   :  { %8100 = vmatpush3.msra.mxu1 %v9702_v32 }
0x391c   :  { %8115 = vmatprep.subr.mxu1 %v8810_v61 }
0x39d4   :  { %v5872_v19 = vpop.f32.mrf.mxu1 }
0x39d5   :  { %v5876_v20 = vadd.f32 %v5872_v19, %v9734_v49 }
0x39d6   :  { %v8081_v21 = vpop.f32.mrf.mxu1 }
0x39d7   :  { %8498 = vtanh.f32 %v5876_v20  ;;  %v7337_v26 = vmul.f32 -1.442695, %v5876_v20 }
0x39d9   :  { %8500 = vpow2.f32 %v7337_v26 }
0x39e4   :  { %v8499_v22 = vpop.eup %8498 }
0x39e5   :  { %5886 = vrot.lane.b32.xlu0 %v8499_v22, %s8816_s16 }
0x39e6   :  { %v8501_v28 = vpop.eup %8500 }
0x39e7   :  { %v5880_v30 = vadd.f32 1.0, %v8501_v28 }
0x39e9   :  { %8502 = vrcp.f32 %v5880_v30 }
0x39f6   :  { %v8503_v33 = vpop.eup %8502 }
0x39f7   :  { %v5884_v38 = vmul.f32 %v8503_v33, %v5794_v59 }
0x3a57   :  { %v5887_v35 = vpop.permute.xlu0 %5886 }
0x3a58   :  { %v5889_v36 = vmul.f32 %v8503_v33, %v5887_v35 }
0x3a5a   :  { %5891 = vrot.lane.b32.xlu1 %v5889_v36, %s8818_s7 }
0x3acc   :  { %v5892_v8 = vpop.permute.xlu1 %5891 }
0x3acd   :  { %v5894_v37 = vadd.f32 %v5892_v8, %v5884_v38 }
0x3acf   :  { %8504 = vtanh.f32 %v5894_v37 }
0x3adc   :  { %v8505_v13 = vpop.eup %8504 }
0x3add   :  { %5897 = vrot.lane.b32.xlu0 %v8505_v13, %s8816_s16 }
0x3b4f   :  { %v5898_v10 = vpop.permute.xlu0 %5897 }
0x3b50   :  { %v9813_v39 = vmul.f32 %v8503_v33, %v5898_v10 }
0x3b52   :  { %5902 = vrot.lane.b32.xlu1 %v9813_v39, %s8818_s7 }
0x3bc4   :  { %v5903_v5 = vpop.permute.xlu1 %5902 }
0x3bc5   :  { %8091 = vmatmul.mubr.msk.f32.vlgmr.msra.gmra.mxu0 %vm286_vm2, %v5903_v5 }
0x3bc6   :  { %8105 = vmatpush3.msra.mxu0 %v9687_v25  ;;  %8112 = vmatprep.mubr.msk.f32.mxu0 %vm8811_vm3, %v8810_v61 }
0x3bc7   :  { %8106 = vmatprep.subr.mxu0 %v8810_v61 }
0x3bc8   :  { %8107 = vmatpush3.msra.mxu0 %v9690_v27 }
0x3bc9   :  { %8108 = vmatprep.subr.mxu0 %v8810_v61 }
0x3bca   :  { %8109 = vmatpush3.msra.mxu0 %v9694_v29 }
0x3bcb   :  { %8110 = vmatprep.subr.mxu0 %v8810_v61 }
0x3bcc   :  { %8111 = vmatpush3.msra.mxu0 %v9702_v32 }
0x3bcd   :  { %8126 = vmatprep.subr.mxu0 %v8810_v61 }
0x3c85   :  { %v5972_v41 = vpop.f32.mrf.mxu0 }
0x3c86   :  { %v5976_v43 = vadd.f32 %v5972_v41, %v9734_v49 }
0x3c87   :  { %v8092_v47 = vpop.f32.mrf.mxu0 }
0x3c88   :  { %8506 = vtanh.f32 %v5976_v43  ;;  %v7339_v50 = vmul.f32 -1.442695, %v5976_v43 }
0x3c8a   :  { %8508 = vpow2.f32 %v7339_v50 }
0x3c95   :  { %v8507_v48 = vpop.eup %8506 }
0x3c96   :  { %5986 = vrot.lane.b32.xlu0 %v8507_v48, %s8816_s16 }
0x3c97   :  { %v8509_v51 = vpop.eup %8508 }
0x3c98   :  { %v5980_v52 = vadd.f32 1.0, %v8509_v51 }
0x3c9a   :  { %8510 = vrcp.f32 %v5980_v52 }
0x3ca7   :  { %v8511_v53 = vpop.eup %8510 }
0x3ca8   :  { %v5984_v58 = vmul.f32 %v8511_v53, %v5894_v37 }
0x3d08   :  { %v5987_v54 = vpop.permute.xlu0 %5986 }
0x3d09   :  { %v5989_v56 = vmul.f32 %v8511_v53, %v5987_v54 }
0x3d0b   :  { %5991 = vrot.lane.b32.xlu1 %v5989_v56, %s8818_s7 }
0x3d7d   :  { %v5992_v60 = vpop.permute.xlu1 %5991 }
0x3d7e   :  { %v5994_v11 = vadd.f32 %v5992_v60, %v5984_v58 }
0x3d80   :  { %8512 = vtanh.f32 %v5994_v11 }
0x3d8d   :  { %v8513_v62 = vpop.eup %8512 }
0x3d8e   :  { %5997 = vrot.lane.b32.xlu0 %v8513_v62, %s8816_s16 }
0x3e00   :  { %v5998_v63 = vpop.permute.xlu0 %5997 }
0x3e01   :  { %v6000_v0 = vmul.f32 %v8511_v53, %v5998_v63 }
0x3e03   :  { %6002 = vrot.lane.b32.xlu1 %v6000_v0, %s8818_s7  ;;  %v6717_v21 = vrot.slane %v6000_v0, 6 }
0x3e05   :  { %v6734_v30 = vsel %vm6729_vm9, %v9813_v39, %v6717_v21 }
0x3e75   :  { %v6003_v23 = vpop.permute.xlu1 %6002 }
0x3e76   :  { %8102 = vmatmul.mubr.msk.f32.vlgmr.msra.gmra.mxu1 %vm286_vm2, %v6003_v23 }
0x3e77   :  { %8116 = vmatpush3.msra.mxu1 %v9687_v25  ;;  %8123 = vmatprep.mubr.msk.f32.mxu1 %vm8811_vm3, %v8810_v61 }
0x3e78   :  { %8117 = vmatprep.subr.mxu1 %v8810_v61 }
0x3e79   :  { %8118 = vmatpush3.msra.mxu1 %v9690_v27 }
0x3e7a   :  { %8119 = vmatprep.subr.mxu1 %v8810_v61 }
0x3e7b   :  { %8120 = vmatpush3.msra.mxu1 %v9694_v29 }
0x3e7c   :  { %8121 = vmatprep.subr.mxu1 %v8810_v61 }
0x3e7d   :  { %8122 = vmatpush3.msra.mxu1 %v9702_v32 }
0x3e7e   :  { %8137 = vmatprep.subr.mxu1 %v8810_v61 }
0x3f36   :  { %v6072_v1 = vpop.f32.mrf.mxu1 }
0x3f37   :  { %v6076_v42 = vadd.f32 %v6072_v1, %v9734_v49 }
0x3f38   :  { %v8103_v46 = vpop.f32.mrf.mxu1 }
0x3f39   :  { %8514 = vtanh.f32 %v6076_v42  ;;  %v7341_v4 = vmul.f32 -1.442695, %v6076_v42 }
0x3f3b   :  { %8516 = vpow2.f32 %v7341_v4 }
0x3f46   :  { %v8515_v2 = vpop.eup %8514 }
0x3f47   :  { %6086 = vrot.lane.b32.xlu0 %v8515_v2, %s8816_s16 }
0x3f48   :  { %v8517_v57 = vpop.eup %8516 }
0x3f49   :  { %v6080_v59 = vadd.f32 1.0, %v8517_v57 }
0x3f4b   :  { %8518 = vrcp.f32 %v6080_v59 }
0x3f58   :  { %v8519_v6 = vpop.eup %8518 }
0x3f59   :  { %v6084_v17 = vmul.f32 %v8519_v6, %v5994_v11 }
0x3fb9   :  { %v6087_v7 = vpop.permute.xlu0 %6086 }
0x3fba   :  { %v6089_v12 = vmul.f32 %v8519_v6, %v6087_v7 }
0x3fbc   :  { %6091 = vrot.lane.b32.xlu1 %v6089_v12, %s8818_s7 }
0x402e   :  { %v6092_v18 = vpop.permute.xlu1 %6091 }
0x402f   :  { %v6094_v19 = vadd.f32 %v6092_v18, %v6084_v17 }
0x4031   :  { %8520 = vtanh.f32 %v6094_v19 }
0x403e   :  { %v8521_v20 = vpop.eup %8520 }
0x403f   :  { %6097 = vrot.lane.b32.xlu0 %v8521_v20, %s8816_s16 }
0x40b1   :  { %v6098_v22 = vpop.permute.xlu0 %6097 }
0x40b2   :  { %v6100_v26 = vmul.f32 %v8519_v6, %v6098_v22 }
0x40b4   :  { %v6719_v28 = vrot.slane %v6100_v26, 4  ;;  %6102 = vrot.lane.b32.xlu1 %v6100_v26, %s8818_s7 }
0x40b6   :  { %v6735_v33 = vsel %vm6731_vm10, %v6734_v30, %v6719_v28 }
0x4126   :  { %v6103_v35 = vpop.permute.xlu1 %6102 }
0x4127   :  { %8113 = vmatmul.mubr.msk.f32.vlgmr.msra.gmra.mxu0 %vm286_vm2, %v6103_v35 }
0x4128   :  { %8127 = vmatpush3.msra.mxu0 %v9687_v25  ;;  %8134 = vmatprep.mubr.msk.f32.mxu0 %vm8811_vm3, %v8810_v61 }
0x4129   :  { %8128 = vmatprep.subr.mxu0 %v8810_v61 }
0x412a   :  { %8129 = vmatpush3.msra.mxu0 %v9690_v27 }
0x412b   :  { %8130 = vmatprep.subr.mxu0 %v8810_v61 }
0x412c   :  { %8131 = vmatpush3.msra.mxu0 %v9694_v29 }
0x412d   :  { %8132 = vmatprep.subr.mxu0 %v8810_v61 }
0x412e   :  { %8133 = vmatpush3.msra.mxu0 %v9702_v32 }
0x412f   :  { %8148 = vmatprep.subr.mxu0 %v8810_v61 }
0x41e7   :  { %v6172_v36 = vpop.f32.mrf.mxu0 }
0x41e8   :  { %v6176_v38 = vadd.f32 %v6172_v36, %v9734_v49 }
0x41e9   :  { %v8114_v8 = vpop.f32.mrf.mxu0 }
0x41ea   :  { %8522 = vtanh.f32 %v6176_v38  ;;  %v7343_v13 = vmul.f32 -1.442695, %v6176_v38 }
0x41ec   :  { %8524 = vpow2.f32 %v7343_v13 }
0x41f7   :  { %v8523_v37 = vpop.eup %8522 }
0x41f8   :  { %6186 = vrot.lane.b32.xlu0 %v8523_v37, %s8816_s16 }
0x41f9   :  { %v8525_v10 = vpop.eup %8524 }
0x41fa   :  { %v6180_v39 = vadd.f32 1.0, %v8525_v10 }
0x41fc   :  { %8526 = vrcp.f32 %v6180_v39 }
0x4209   :  { %v8527_v5 = vpop.eup %8526 }
0x420a   :  { %v6184_v47 = vmul.f32 %v8527_v5, %v6094_v19 }
0x426a   :  { %v6187_v41 = vpop.permute.xlu0 %6186 }
0x426b   :  { %v6189_v43 = vmul.f32 %v8527_v5, %v6187_v41 }
0x426d   :  { %6191 = vrot.lane.b32.xlu1 %v6189_v43, %s8818_s7 }
0x42df   :  { %v6192_v48 = vpop.permute.xlu1 %6191 }
0x42e0   :  { %v6194_v50 = vadd.f32 %v6192_v48, %v6184_v47 }
0x42e2   :  { %8528 = vtanh.f32 %v6194_v50 }
0x42ef   :  { %v8529_v51 = vpop.eup %8528 }
0x42f0   :  { %6197 = vrot.lane.b32.xlu0 %v8529_v51, %s8816_s16 }
0x4362   :  { %v6198_v52 = vpop.permute.xlu0 %6197 }
0x4363   :  { %v6200_v53 = vmul.f32 %v8527_v5, %v6198_v52 }
0x4365   :  { %v6721_v54 = vrot.slane %v6200_v53, 2  ;;  %6202 = vrot.lane.b32.xlu1 %v6200_v53, %s8818_s7 }
0x4367   :  { %v9869_v56 = vsel %vm199_vm0, %v6735_v33, %v6721_v54 }
0x43d7   :  { %v6203_v58 = vpop.permute.xlu1 %6202 }
0x43d8   :  { %8124 = vmatmul.mubr.msk.f32.vlgmr.msra.gmra.mxu1 %vm286_vm2, %v6203_v58 }
0x43d9   :  { %8138 = vmatpush3.msra.mxu1 %v9687_v25  ;;  %8145 = vmatprep.mubr.msk.f32.mxu1 %vm8811_vm3, %v8810_v61 }
0x43da   :  { %8139 = vmatprep.subr.mxu1 %v8810_v61 }
0x43db   :  { %8140 = vmatpush3.msra.mxu1 %v9690_v27 }
0x43dc   :  { %8141 = vmatprep.subr.mxu1 %v8810_v61 }
0x43dd   :  { %8142 = vmatpush3.msra.mxu1 %v9694_v29 }
0x43de   :  { %8143 = vmatprep.subr.mxu1 %v8810_v61 }
0x43df   :  { %8144 = vmatpush3.msra.mxu1 %v9702_v32 }
0x43e0   :  { %8159 = vmatprep.subr.mxu1 %v8810_v61 }
0x4498   :  { %v6272_v60 = vpop.f32.mrf.mxu1 }
0x4499   :  { %v6276_v11 = vadd.f32 %v6272_v60, %v9734_v49 }
0x449a   :  { %v8125_v62 = vpop.f32.mrf.mxu1 }
0x449b   :  { %8530 = vtanh.f32 %v6276_v11  ;;  %v7345_v0 = vmul.f32 -1.442695, %v6276_v11 }
0x449d   :  { %8532 = vpow2.f32 %v7345_v0 }
0x44a8   :  { %v8531_v63 = vpop.eup %8530 }
0x44a9   :  { %6286 = vrot.lane.b32.xlu0 %v8531_v63, %s8816_s16 }
0x44aa   :  { %v8533_v23 = vpop.eup %8532 }
0x44ab   :  { %v6280_v1 = vadd.f32 1.0, %v8533_v23 }
0x44ad   :  { %8534 = vrcp.f32 %v6280_v1 }
0x44ba   :  { %v8535_v42 = vpop.eup %8534 }
0x44bb   :  { %v6284_v4 = vmul.f32 %v8535_v42, %v6194_v50 }
0x451b   :  { %v6287_v46 = vpop.permute.xlu0 %6286 }
0x451c   :  { %v6289_v2 = vmul.f32 %v8535_v42, %v6287_v46 }
0x451e   :  { %6291 = vrot.lane.b32.xlu1 %v6289_v2, %s8818_s7 }
0x4590   :  { %v6292_v57 = vpop.permute.xlu1 %6291 }
0x4591   :  { %v6294_v59 = vadd.f32 %v6292_v57, %v6284_v4 }
0x4593   :  { %8536 = vtanh.f32 %v6294_v59 }
0x45a0   :  { %v8537_v6 = vpop.eup %8536 }
0x45a1   :  { %6297 = vrot.lane.b32.xlu0 %v8537_v6, %s8816_s16 }
0x4613   :  { %v6298_v7 = vpop.permute.xlu0 %6297 }
0x4614   :  { %v9886_v12 = vmul.f32 %v8535_v42, %v6298_v7 }
0x4616   :  { %6302 = vrot.lane.b32.xlu1 %v9886_v12, %s8818_s7 }
0x4688   :  { %v6303_v17 = vpop.permute.xlu1 %6302 }
0x4689   :  { %8135 = vmatmul.mubr.msk.f32.vlgmr.msra.gmra.mxu0 %vm286_vm2, %v6303_v17  ;;  %v7360_v17 = vld [vmem:[%s10154_s8 + $0x78] sm:$0xff] }
0x468a   :  { %8149 = vmatpush3.msra.mxu0 %v9687_v25  ;;  %8156 = vmatprep.mubr.msk.f32.mxu0 %vm8811_vm3, %v8810_v61 }
0x468b   :  { %8150 = vmatprep.subr.mxu0 %v8810_v61 }
0x468c   :  { %8151 = vmatpush3.msra.mxu0 %v9690_v27 }
0x468d   :  { %8152 = vmatprep.subr.mxu0 %v8810_v61 }
0x468e   :  { %8153 = vmatpush3.msra.mxu0 %v9694_v29 }
0x468f   :  { %8154 = vmatprep.subr.mxu0 %v8810_v61 }
0x4690   :  { %8155 = vmatpush3.msra.mxu0 %v9702_v32 }
0x4691   :  { %8170 = vmatprep.subr.mxu0 %v8810_v61 }
0x4749   :  { %v6372_v18 = vpop.f32.mrf.mxu0 }
0x474a   :  { %v6376_v25 = vadd.f32 %v6372_v18, %v9734_v49 }
0x474b   :  { %v8136_v19 = vpop.f32.mrf.mxu0 }
0x474c   :  { %8538 = vtanh.f32 %v6376_v25  ;;  %v7347_v21 = vmul.f32 -1.442695, %v6376_v25 }
0x474e   :  { %8540 = vpow2.f32 %v7347_v21  ;;  %v7357_v21 = vld [vmem:[%s10154_s8 + $0x60] sm:$0xff] }
0x4759   :  { %v8539_v20 = vpop.eup %8538 }
0x475a   :  { %6386 = vrot.lane.b32.xlu0 %v8539_v20, %s8816_s16  ;;  %v7358_v20 = vld [vmem:[%s10154_s8 + $0x68] sm:$0xff] }
0x475b   :  { %v8541_v27 = vpop.eup %8540 }
0x475c   :  { %v6380_v22 = vadd.f32 1.0, %v8541_v27  ;;  %v7355_v27 = vld [vmem:[%s10154_s8 + $0x58] sm:$0xff] }
0x475e   :  { %8542 = vrcp.f32 %v6380_v22  ;;  %v7354_v22 = vld [vmem:[%s10154_s8 + $0x50] sm:$0xff] }
0x476b   :  { %v8543_v29 = vpop.eup %8542 }
0x476c   :  { %v6384_v32 = vmul.f32 %v8543_v29, %v6294_v59 }
0x47cc   :  { %v6387_v26 = vpop.permute.xlu0 %6386 }
0x47cd   :  { %v6389_v28 = vmul.f32 %v8543_v29, %v6387_v26  ;;  %v7352_v26 = vld [vmem:[%s10154_s8 + $0x40] sm:$0xff] }
0x47cf   :  { %6391 = vrot.lane.b32.xlu1 %v6389_v28, %s8818_s7 }
0x4841   :  { %v6392_v30 = vpop.permute.xlu1 %6391 }
0x4842   :  { %v6394_v33 = vadd.f32 %v6392_v30, %v6384_v32 }
0x4844   :  { %8544 = vtanh.f32 %v6394_v33 }
0x4851   :  { %v8545_v35 = vpop.eup %8544 }
0x4852   :  { %6397 = vrot.lane.b32.xlu0 %v8545_v35, %s8816_s16 }
0x48c4   :  { %v6398_v36 = vpop.permute.xlu0 %6397 }
0x48c5   :  { %v6400_v38 = vmul.f32 %v8543_v29, %v6398_v36  ;;  %v7353_v29 = vld [vmem:[%s10154_s8 + $0x48] sm:$0xff] }
0x48c7   :  { %6402 = vrot.lane.b32.xlu1 %v6400_v38, %s8818_s7  ;;  %v6723_v58 = vrot.slane %v6400_v38, 6 }
0x48c9   :  { %v6737_v63 = vsel %vm6729_vm9, %v9886_v12, %v6723_v58 }
0x4939   :  { %v6403_v8 = vpop.permute.xlu1 %6402 }
0x493a   :  { %8146 = vmatmul.mubr.msk.f32.vlgmr.msra.gmra.mxu1 %vm286_vm2, %v6403_v8  ;;  %v7366_v8 = vld [vmem:[%s10154_s8 + $0x90] sm:$0xff] }
0x493b   :  { %8167 = vmatprep.mubr.msk.f32.mxu1 %vm8811_vm3, %v8810_v61  ;;  %8160 = vmatpush3.msra.mxu1 %v7355_v27 }
0x493c   :  { %8161 = vmatprep.subr.mxu1 %v8810_v61 }
0x493d   :  { %8162 = vmatpush3.msra.mxu1 %v7354_v22 }
0x493e   :  { %8163 = vmatprep.subr.mxu1 %v8810_v61 }
0x493f   :  { %8164 = vmatpush3.msra.mxu1 %v7353_v29 }
0x4940   :  { %8165 = vmatprep.subr.mxu1 %v8810_v61 }
0x4941   :  { %8166 = vmatpush3.msra.mxu1 %v7352_v26 }
0x4942   :  { %8187 = vmatprep.subr.mxu1 %v8810_v61 }
0x49fa   :  { %v6472_v37 = vpop.f32.mrf.mxu1 }
0x49fb   :  { %v6476_v13 = vadd.f32 %v6472_v37, %v9734_v49 }
0x49fc   :  { %v8147_v10 = vpop.f32.mrf.mxu1 }
0x49fd   :  { %8546 = vtanh.f32 %v6476_v13  ;;  %v7349_v5 = vmul.f32 -1.442695, %v6476_v13  ;;  %v7364_v13 = vld [vmem:[%s10154_s8 + $0x80] sm:$0xff] }
0x49ff   :  { %8548 = vpow2.f32 %v7349_v5 }
0x4a0a   :  { %v8547_v39 = vpop.eup %8546 }
0x4a0b   :  { %6486 = vrot.lane.b32.xlu0 %v8547_v39, %s8816_s16 }
0x4a0c   :  { %v8549_v41 = vpop.eup %8548 }
0x4a0d   :  { %v6480_v43 = vadd.f32 1.0, %v8549_v41 }
0x4a0f   :  { %8550 = vrcp.f32 %v6480_v43 }
0x4a1c   :  { %v8551_v47 = vpop.eup %8550 }
0x4a1d   :  { %v6484_v51 = vmul.f32 %v8551_v47, %v6394_v33 }
0x4a7d   :  { %v6487_v48 = vpop.permute.xlu0 %6486 }
0x4a7e   :  { %v6489_v50 = vmul.f32 %v8551_v47, %v6487_v48 }
0x4a80   :  { %6491 = vrot.lane.b32.xlu1 %v6489_v50, %s8818_s7 }
0x4af2   :  { %v6492_v52 = vpop.permute.xlu1 %6491 }
0x4af3   :  { %v6494_v53 = vadd.f32 %v6492_v52, %v6484_v51 }
0x4af5   :  { %8552 = vtanh.f32 %v6494_v53 }
0x4b02   :  { %v8553_v54 = vpop.eup %8552 }
0x4b03   :  { %6497 = vrot.lane.b32.xlu0 %v8553_v54, %s8816_s16 }
0x4b75   :  { %v6498_v60 = vpop.permute.xlu0 %6497 }
0x4b76   :  { %v6500_v11 = vmul.f32 %v8551_v47, %v6498_v60  ;;  %v10005_v47 = vld [vmem:[%s10158_s12 + $0x18] sm:$0x3f] }
0x4b77   :  { %v6908_v50 = vrot.slane %v10005_v47, %v8998_v45  ;;  %v6748_v54 = vrot.slane %v10005_v47, %v8974_v9 }
0x4b78   :  { %v6725_v62 = vrot.slane %v6500_v11, 4  ;;  %6502 = vrot.lane.b32.xlu1 %v6500_v11, %s8818_s7 }
0x4b7a   :  { %v6738_v0 = vsel %vm6731_vm10, %v6737_v63, %v6725_v62 }
0x4bea   :  { %v6503_v23 = vpop.permute.xlu1 %6502 }
0x4beb   :  { %8157 = vmatmul.mubr.msk.f32.vlgmr.msra.gmra.mxu0 %vm286_vm2, %v6503_v23 }
0x4bec   :  { %8178 = vmatprep.mubr.msk.f32.mxu0 %vm8811_vm3, %v8810_v61  ;;  %8171 = vmatpush3.msra.mxu0 %v7360_v17 }
0x4bed   :  { %8172 = vmatprep.subr.mxu0 %v8810_v61 }
0x4cab   :  { %v6572_v1 = vpop.f32.mrf.mxu0 }
0x4cac   :  { %v6576_v42 = vadd.f32 %v6572_v1, %v9734_v49  ;;  %v7359_v49 = vld [vmem:[%s10154_s8 + $0x70] sm:$0xff] }
0x4cad   :  { %v8158_v46 = vpop.f32.mrf.mxu0  ;;  %8173 = vmatpush3.msra.mxu0 %v7359_v49 }
0x4cae   :  { %8554 = vtanh.f32 %v6576_v42  ;;  %v7351_v4 = vmul.f32 -1.442695, %v6576_v42  ;;  %8174 = vmatprep.subr.mxu0 %v8810_v61 }
0x4caf   :  { %8175 = vmatpush3.msra.mxu0 %v7358_v20 }
0x4cb0   :  { %8556 = vpow2.f32 %v7351_v4  ;;  %8176 = vmatprep.subr.mxu0 %v8810_v61 }
0x4cb1   :  { %8177 = vmatpush3.msra.mxu0 %v7357_v21 }
0x4cb2   :  { %8204 = vmatprep.subr.mxu0 %v8810_v61 }
0x4cbb   :  { %v8555_v2 = vpop.eup %8554 }
0x4cbc   :  { %6586 = vrot.lane.b32.xlu0 %v8555_v2, %s8816_s16 }
0x4cbd   :  { %v8557_v57 = vpop.eup %8556 }
0x4cbe   :  { %v6580_v59 = vadd.f32 1.0, %v8557_v57 }
0x4cc0   :  { %8558 = vrcp.f32 %v6580_v59 }
0x4ccd   :  { %v8559_v6 = vpop.eup %8558 }
0x4cce   :  { %v6584_v18 = vmul.f32 %v8559_v6, %v6494_v53 }
0x4d2e   :  { %v6587_v7 = vpop.permute.xlu0 %6586 }
0x4d2f   :  { %v6589_v12 = vmul.f32 %v8559_v6, %v6587_v7 }
0x4d31   :  { %6591 = vrot.lane.b32.xlu1 %v6589_v12, %s8818_s7 }
0x4da3   :  { %v6592_v25 = vpop.permute.xlu1 %6591 }
0x4da4   :  { %v6594_v19 = vadd.f32 %v6592_v25, %v6584_v18 }
0x4da6   :  { %8560 = vtanh.f32 %v6594_v19 }
0x4db3   :  { %v8561_v28 = vpop.eup %8560 }
0x4db4   :  { %6597 = vrot.lane.b32.xlu0 %v8561_v28, %s8816_s16 }
0x4db8   :  { %6752 = vrot.lane.b32.xlu0 %v9796_v34, %s8818_s7  ;;  %v7367_v34 = vld [vmem:[%s10154_s8 + $0x98] sm:$0xff] }
0x4e26   :  { %v6598_v32 = vpop.permute.xlu0 %6597 }
0x4e27   :  { %v6600_v30 = vmul.f32 %v8559_v6, %v6598_v32 }
0x4e29   :  { %v6727_v33 = vrot.slane %v6600_v30, 2  ;;  %6611 = vrot.lane.b32.xlu1 %v6600_v30, %s8818_s7 }
0x4e2a   :  { %v6753_v35 = vpop.permute.xlu0 %6752 }
0x4e2b   :  { %8179 = vmatmul.mubr.msk.f32.vlgmr.msra.gmra.mxu0 %vm286_vm2, %v6753_v35  ;;  %v6739_v36 = vsel %vm199_vm0, %v6738_v0, %v6727_v33 }
0x4e2c   :  { %6756 = vrot.lane.b32.xlu0 %v6739_v36, %s8818_s7  ;;  %8181 = vmatprep.mubr.msk.f32.mxu0 %vm8811_vm3, %v8810_v61 }
0x4e2d   :  { %6754 = vrot.lane.b32.xlu1 %v9869_v56, %s8818_s7  ;;  %v7365_v56 = vld [vmem:[%s10154_s8 + $0x88] sm:$0xff] }
0x4e9b   :  { %v9969_v38 = vpop.permute.xlu1 %6611 }
0x4e9c   :  { %8168 = vmatmul.mubr.msk.f32.vlgmr.msra.gmra.mxu1 %vm286_vm2, %v9969_v38 }
0x4e9d   :  { %8188 = vmatpush3.msra.mxu1 %v7367_v34  ;;  %8195 = vmatprep.mubr.msk.f32.mxu1 %vm8811_vm3, %v8810_v61 }
0x4e9e   :  { %8189 = vmatprep.subr.mxu1 %v8810_v61  ;;  %v6757_v10 = vpop.permute.xlu0 %6756 }
0x4e9f   :  { %8190 = vmatpush3.msra.mxu1 %v7366_v8  ;;  %v6755_v37 = vpop.permute.xlu1 %6754 }
0x4ea0   :  { %8191 = vmatprep.subr.mxu1 %v8810_v61  ;;  %8182 = vmatmul.mubr.msk.f32.gmra.mxu0 %vm286_vm2, %v6755_v37 }
0x4ea1   :  { %8192 = vmatpush3.msra.mxu1 %v7365_v56  ;;  %8184 = vmatprep.mubr.msk.f32.mxu0 %vm8811_vm3, %v8810_v61 }
0x4ea2   :  { %8193 = vmatprep.subr.mxu1 %v8810_v61 }
0x4ea3   :  { %8194 = vmatpush3.msra.mxu1 %v7364_v13 }
0x4ea4   :  { %8196 = vmatmul.mubr.msk.f32.vlgmr.msra.gmra.mxu1 %vm286_vm2, %v6753_v35  ;;  %8185 = vmatmul.mubr.msk.f32.gmra.mxu0 %vm286_vm2, %v6757_v10 }
0x4ea5   :  { %8198 = vmatprep.mubr.msk.f32.mxu1 %vm8811_vm3, %v8810_v61  ;;  %8220 = vmatprep.mubr.msk.f32.mxu0 %vm8811_vm3, %v8810_v61 }
0x4ea8   :  { %8199 = vmatmul.mubr.msk.f32.gmra.mxu1 %vm286_vm2, %v6755_v37 }
0x4ea9   :  { %8201 = vmatprep.mubr.msk.f32.mxu1 %vm8811_vm3, %v8810_v61 }
0x4eac   :  { %8202 = vmatmul.mubr.msk.f32.gmra.mxu1 %vm286_vm2, %v6757_v10 }
0x4eeb   :  { %v6830_v39 = vpop.f32.mrf.mxu0 }
0x4eec   :  { %v6831_v9 = vadd.f32 %v6830_v39, %v6748_v54 }
0x4eed   :  { %v8180_v5 = vpop.f32.mrf.mxu0 }
0x4eee   :  { %v6844_v6 = vsel %vm286_vm2, %v6831_v9, 0.0 }
0x4f5c   :  { %v10000_v41 = vpop.f32.mrf.mxu1 }
0x4f5e   :  { %v8169_v43 = vpop.f32.mrf.mxu1 }
0x4f60   :  { %v6835_v48 = vpop.f32.mrf.mxu0 }
0x4f61   :  { %v6836_v62 = vadd.f32 %v6835_v48, %v6748_v54 }
0x4f62   :  { %v8183_v51 = vpop.f32.mrf.mxu0 }
0x4f63   :  { %v6847_v45 = vsel %vm286_vm2, %v6836_v62, 0.0 }
0x4f64   :  { %v6975_v52 = vpop.f32.mrf.mxu1  ;;  %v6840_v53 = vpop.f32.mrf.mxu0 }
0x4f65   :  { %v6976_v58 = vadd.f32 %v6975_v52, %v6908_v50  ;;  %v6841_v59 = vadd.f32 %v6840_v53, %v6748_v54  ;;  %v7067_v52 = vld [vmem:[%s10150_s4 + $0x38] sm:$0xff]  ;;  %v7066_v53 = vld [vmem:[%s10150_s4 + $0x30] sm:$0xff]  ;;  %v7065_v54 = vld [vmem:[%s10150_s4 + $0x28] sm:$0xff] }
0x4f66   :  { %v8197_v60 = vpop.f32.mrf.mxu1  ;;  %v8186_v11 = vpop.f32.mrf.mxu0  ;;  %8205 = vmatpush3.msra.mxu0 %v7067_v52 }
0x4f67   :  { %v6989_v63 = vsel %vm286_vm2, %v6976_v58, 0.0  ;;  %v6850_v7 = vsel %vm286_vm2, %v6841_v59, 0.0  ;;  %8206 = vmatprep.subr.mxu0 %v8810_v61  ;;  %v7063_v60 = vld [vmem:[%s10150_s4 + $0x18] sm:$0xff]  ;;  %v7062_v11 = vld [vmem:[%s10150_s4 + $0x10] sm:$0xff] }
0x4f68   :  { %6990 = vadd.xlane.f32.xlu1 %v6989_v63  ;;  %v6980_v0 = vpop.f32.mrf.mxu1  ;;  %8207 = vmatpush3.msra.mxu0 %v7066_v53 }
0x4f69   :  { %v6981_v23 = vadd.f32 %v6980_v0, %v6908_v50  ;;  %8208 = vmatprep.subr.mxu0 %v8810_v61 }
0x4f6a   :  { %v8200_v1 = vpop.f32.mrf.mxu1  ;;  %8209 = vmatpush3.msra.mxu0 %v7065_v54 }
0x4f6b   :  { %v6992_v42 = vsel %vm286_vm2, %v6981_v23, 0.0  ;;  %8210 = vmatprep.subr.mxu0 %v8810_v61 }
0x4f6c   :  { %6993 = vadd.xlane.f32.xlu0 %v6992_v42  ;;  %v6985_v46 = vpop.f32.mrf.mxu1  ;;  %6848 = vadd.xlane.f32.xlu1 %v6847_v45 }
0x4f6d   :  { %v6986_v2 = vadd.f32 %v6985_v46, %v6908_v50 }
0x4f6e   :  { %v8203_v4 = vpop.f32.mrf.mxu1 }
0x4f6f   :  { %v6995_v57 = vsel %vm286_vm2, %v6986_v2, 0.0 }
0x4f70   :  { %6996 = vadd.xlane.f32.xlu0 %v6995_v57  ;;  %v7031_v57 = vrot.slane %v10005_v47, %v9199_v40 }
0x4f74   :  { %6845 = vadd.xlane.f32.xlu0 %v6844_v6 }
0x4f78   :  { %6851 = vadd.xlane.f32.xlu0 %v6850_v7  ;;  %v7038_v7 = vrot.slane %v10005_v47, %v9210_v14 }
0x4ff1   :  { %v6991_v12 = vpop.xlane.xlu1 %6990 }
0x4ff2   :  { %v6998_v17 = vmul.f32 0.03125, %v6991_v12 }
0x4ff4   :  { %v10017_v49 = vsub.f32 %v6976_v58, %v6998_v17  ;;  %v7064_v58 = vld [vmem:[%s10150_s4 + $0x20] sm:$0xff] }
0x4ff5   :  { %v6994_v18 = vpop.xlane.xlu0 %6993  ;;  %v6849_v25 = vpop.xlane.xlu1 %6848  ;;  %8211 = vmatpush3.msra.mxu0 %v7064_v58 }
0x4ff6   :  { %v6999_v19 = vmul.f32 0.03125, %v6994_v18  ;;  %v7004_v20 = vmul.f32 %v10017_v49, %v10017_v49  ;;  %v6854_v27 = vmul.f32 0.03125, %v6849_v25  ;;  %8212 = vmatprep.subr.mxu0 %v8810_v61 }
0x4ff7   :  { %8213 = vmatpush3.msra.mxu0 %v7063_v60 }
0x4ff8   :  { %v10021_v21 = vsub.f32 %v6981_v23, %v6999_v19  ;;  %v7007_v22 = vsel %vm286_vm2, %v7004_v20, 0.0  ;;  %v10026_v32 = vsub.f32 %v6836_v62, %v6854_v27  ;;  %8214 = vmatprep.subr.mxu0 %v8810_v61  ;;  %v7061_v62 = vld [vmem:[%s10150_s4 + $0x8] sm:$0xff] }
0x4ff9   :  { %v6997_v29 = vpop.xlane.xlu0 %6996  ;;  %7008 = vadd.xlane.f32.xlu1 %v7007_v22  ;;  %8215 = vmatpush3.msra.mxu0 %v7062_v11 }
0x4ffa   :  { %v7000_v26 = vmul.f32 0.03125, %v6997_v29  ;;  %v7005_v28 = vmul.f32 %v10021_v21, %v10021_v21  ;;  %v6860_v37 = vmul.f32 %v10026_v32, %v10026_v32  ;;  %8216 = vmatprep.subr.mxu0 %v8810_v61 }
0x4ffb   :  { %8217 = vmatpush3.msra.mxu0 %v7061_v62 }
0x4ffc   :  { %v10028_v30 = vsub.f32 %v6986_v2, %v7000_v26  ;;  %v7010_v33 = vsel %vm286_vm2, %v7005_v28, 0.0  ;;  %v6865_v43 = vsel %vm286_vm2, %v6860_v37, 0.0  ;;  %8218 = vmatprep.subr.mxu0 %v8810_v61 }
0x4ffd   :  { %v6846_v35 = vpop.xlane.xlu0 %6845  ;;  %7011 = vadd.xlane.f32.xlu0 %v7010_v33 }
0x4ffe   :  { %v6853_v36 = vmul.f32 0.03125, %v6846_v35  ;;  %v7006_v34 = vmul.f32 %v10028_v30, %v10028_v30 }
0x5000   :  { %v10033_v8 = vsub.f32 %v6831_v9, %v6853_v36  ;;  %v7013_v56 = vsel %vm286_vm2, %v7006_v34, 0.0  ;;  %v7060_v9 = vld [vmem:[%s10150_s4] sm:$0xff] }
0x5001   :  { %7014 = vadd.xlane.f32.xlu1 %v7013_v56  ;;  %v6852_v13 = vpop.xlane.xlu0 %6851  ;;  %8219 = vmatpush3.msra.mxu0 %v7060_v9 }
0x5002   :  { %v6855_v10 = vmul.f32 0.03125, %v6852_v13  ;;  %v6859_v39 = vmul.f32 %v10033_v8, %v10033_v8 }
0x5004   :  { %v10040_v5 = vsub.f32 %v6841_v59, %v6855_v10  ;;  %v6862_v48 = vsel %vm286_vm2, %v6859_v39, 0.0 }
0x5005   :  { %6866 = vadd.xlane.f32.xlu1 %v6865_v43  ;;  %6863 = vadd.xlane.f32.xlu0 %v6862_v48 }
0x5006   :  { %v6861_v50 = vmul.f32 %v10040_v5, %v10040_v5 }
0x5008   :  { %v6868_v51 = vsel %vm286_vm2, %v6861_v50, 0.0 }
0x5009   :  { %6869 = vadd.xlane.f32.xlu0 %v6868_v51 }
0x5082   :  { %v7009_v63 = vpop.xlane.xlu1 %7008 }
0x5083   :  { %v7016_v0 = vmul.f32 0.03125, %v7009_v63 }
0x5085   :  { %v7019_v23 = vadd.f32 1e-05, %v7016_v0 }
0x5086   :  { %v7012_v1 = vpop.xlane.xlu0 %7011 }
0x5087   :  { %8562 = vrsqrt.f32 %v7019_v23  ;;  %v7017_v42 = vmul.f32 0.03125, %v7012_v1 }
0x5089   :  { %v7020_v45 = vadd.f32 1e-05, %v7017_v42 }
0x508a   :  { %v7015_v46 = vpop.xlane.xlu1 %7014 }
0x508b   :  { %8564 = vrsqrt.f32 %v7020_v45  ;;  %v7018_v2 = vmul.f32 0.03125, %v7015_v46 }
0x508d   :  { %v7021_v4 = vadd.f32 1e-05, %v7018_v2 }
0x508e   :  { %v6864_v36 = vpop.xlane.xlu0 %6863  ;;  %v6867_v56 = vpop.xlane.xlu1 %6866 }
0x508f   :  { %8566 = vrsqrt.f32 %v7021_v4  ;;  %v6871_v34 = vmul.f32 0.03125, %v6864_v36  ;;  %v6872_v37 = vmul.f32 0.03125, %v6867_v56 }
0x5091   :  { %v6874_v13 = vadd.f32 1e-05, %v6871_v34  ;;  %v6875_v39 = vadd.f32 1e-05, %v6872_v37 }
0x5092   :  { %v6870_v10 = vpop.xlane.xlu0 %6869 }
0x5093   :  { %8568 = vrsqrt.f32 %v6874_v13  ;;  %v6873_v43 = vmul.f32 0.03125, %v6870_v10 }
0x5094   :  { %v8563_v59 = vpop.eup %8562  ;;  %8570 = vrsqrt.f32 %v6875_v39 }
0x5095   :  { %v7025_v6 = vmul.f32 %v8563_v59, %v10017_v49  ;;  %v6876_v48 = vadd.f32 1e-05, %v6873_v43 }
0x5097   :  { %v7032_v12 = vmul.f32 %v7031_v57, %v7025_v6  ;;  %8572 = vrsqrt.f32 %v6876_v48 }
0x5098   :  { %v8565_v17 = vpop.eup %8564 }
0x5099   :  { %v7039_v18 = vadd.f32 %v7038_v7, %v7032_v12  ;;  %v7026_v25 = vmul.f32 %v8565_v17, %v10021_v21  ;;  %v10091_v21 = vld [vmem:[%s10158_s12 + $0x10] sm:$0xff] }
0x509a   :  { %v6609_v33 = vrot.slane %v10091_v21, %v9210_v14 }
0x509b   :  { %v7042_v19 = vmax.f32 %v7039_v18, 0.0  ;;  %v7033_v20 = vmul.f32 %v7031_v57, %v7026_v25 }
0x509c   :  { %v8567_v27 = vpop.eup %8566  ;;  %v6682_v35 = vadd.f32 %v10000_v41, %v6609_v33  ;;  %v6886_v41 = vrot.slane %v10005_v47, %v8986_v16 }
0x509d   :  { %7048 = vrot.lane.b32.xlu1 %v7042_v19, %s8818_s7  ;;  %v7040_v22 = vadd.f32 %v7038_v7, %v7033_v20  ;;  %v7027_v29 = vmul.f32 %v8567_v27, %v10028_v30 }
0x509e   :  { %v6685_v30 = vsel %vm5288_vm8, %v6682_v35, 0.0 }
0x509f   :  { %v7043_v40 = vmax.f32 %v7040_v22, 0.0  ;;  %v7034_v26 = vmul.f32 %v7031_v57, %v7027_v29  ;;  %v7371_v57 = vld [vmem:[#allocation7] ss:$0 sm:$0xff] }
0x50a0   :  { %v8569_v14 = vpop.eup %8568 }
0x50a1   :  { %7050 = vrot.lane.b32.xlu0 %v7043_v40, %s8818_s7  ;;  %v7041_v49 = vadd.f32 %v7038_v7, %v7034_v26  ;;  %v6880_v50 = vmul.f32 %v8569_v14, %v10033_v8  ;;  %v8571_v51 = vpop.eup %8570  ;;  %v6701_v14 = vrot.slane %v10091_v21, %v9213_v15 }
0x50a2   :  { %v6881_v53 = vmul.f32 %v8571_v51, %v10026_v32 }
0x50a3   :  { %v7044_v28 = vmax.f32 %v7041_v49, 0.0  ;;  %v6887_v52 = vmul.f32 %v6886_v41, %v6880_v50  ;;  %v6706_v50 = vrot.slane %v10091_v21, %v9223_v31 }
0x50a4   :  { %v8573_v54 = vpop.eup %8572  ;;  %v6888_v60 = vmul.f32 %v6886_v41, %v6881_v53 }
0x50a5   :  { %7052 = vrot.lane.b32.xlu1 %v7044_v28, %s8818_s7  ;;  %v6882_v11 = vmul.f32 %v8573_v54, %v10040_v5 }
0x50a7   :  { %v6889_v0 = vmul.f32 %v6886_v41, %v6882_v11 }
0x50c9   :  { %6686 = vadd.xlane.f32.xlu1 %v6685_v30 }
0x50da   :  { %7191 = vrot.lane.b32.xlu1 %v9653_v55, %s8818_s7  ;;  %v6893_v55 = vrot.slane %v10005_v47, %v8995_v44 }
0x50dc   :  { %v6894_v58 = vadd.f32 %v6893_v55, %v6887_v52  ;;  %v6895_v63 = vadd.f32 %v6893_v55, %v6888_v60  ;;  %v6896_v44 = vadd.f32 %v6893_v55, %v6889_v0 }
0x50de   :  { %v6897_v62 = vmax.f32 %v6894_v58, 0.0  ;;  %v6898_v8 = vmax.f32 %v6895_v63, 0.0  ;;  %v6899_v5 = vmax.f32 %v6896_v44, 0.0 }
0x510f   :  { %v7049_v23 = vpop.permute.xlu1 %7048 }
0x5110   :  { %v7057_v16 = vsel %vm286_vm2, %v6897_v62, %v7049_v23 }
0x5111   :  { %8221 = vmatmul.mubr.msk.f32.vlgmr.msra.gmra.mxu0 %vm7075_vm11, %v7057_v16 }
0x5112   :  { %8223 = vmatprep.mubr.msk.f32.mxu0 %vm8811_vm3, %v8810_v61 }
0x5113   :  { %v7051_v47 = vpop.permute.xlu0 %7050 }
0x5114   :  { %v7058_v32 = vsel %vm286_vm2, %v6898_v8, %v7051_v47 }
0x5115   :  { %8224 = vmatmul.mubr.msk.f32.gmra.mxu0 %vm7075_vm11, %v7058_v32 }
0x5116   :  { %8226 = vmatprep.mubr.msk.f32.mxu0 %vm8811_vm3, %v8810_v61 }
0x5117   :  { %v7053_v1 = vpop.permute.xlu1 %7052 }
0x5118   :  { %v7059_v42 = vsel %vm286_vm2, %v6899_v5, %v7053_v1 }
0x5119   :  { %8227 = vmatmul.mubr.msk.f32.gmra.mxu0 %vm7075_vm11, %v7059_v42 }
0x5152   :  { %v6687_v45 = vpop.xlane.xlu1 %6686 }
0x5153   :  { %v6688_v46 = vmul.f32 0.03125, %v6687_v45 }
0x5155   :  { %v6689_v2 = vsub.f32 %v6682_v35, %v6688_v46 }
0x5156   :  { %v7192_v60 = vpop.permute.xlu1 %7191 }
0x5157   :  { %v6690_v4 = vmul.f32 %v6689_v2, %v6689_v2 }
0x5159   :  { %v6691_v9 = vsel %vm5288_vm8, %v6690_v4, 0.0 }
0x515a   :  { %6692 = vadd.xlane.f32.xlu0 %v6691_v9 }
0x5170   :  { %7183 = vrot.lane.b32.xlu0 %v9674_v3, %s8816_s16 }
0x51d1   :  { %v7151_v59 = vpop.f32.mrf.mxu0 }
0x51d2   :  { %v7152_v6 = vadd.f32 %v7371_v57, %v7151_v59 }
0x51d3   :  { %v8222_v7 = vpop.f32.mrf.mxu0 }
0x51d4   :  { %v7171_v61 = vmul.f32 1.442695, %v7152_v6  ;;  %v7168_v29 = vadd.f32 1.0, %v7152_v6  ;;  %vm7165_vm12 = vcmp.gt.f32.partialorder %v7152_v6, 0.0 }
0x51d5   :  { %v7156_v12 = vpop.f32.mrf.mxu0 }
0x51d6   :  { %8574 = vpow2.f32 %v7171_v61  ;;  %v7157_v17 = vadd.f32 %v7371_v57, %v7156_v12 }
0x51d7   :  { %v8225_v18 = vpop.f32.mrf.mxu0 }
0x51d8   :  { %v7173_v25 = vmul.f32 1.442695, %v7157_v17  ;;  %v7169_v33 = vadd.f32 1.0, %v7157_v17  ;;  %vm7166_vm15 = vcmp.gt.f32.partialorder %v7157_v17, 0.0 }
0x51d9   :  { %v7161_v19 = vpop.f32.mrf.mxu0 }
0x51da   :  { %8576 = vpow2.f32 %v7173_v25  ;;  %v7162_v20 = vadd.f32 %v7371_v57, %v7161_v19 }
0x51db   :  { %v8228_v27 = vpop.f32.mrf.mxu0 }
0x51dc   :  { %v7175_v22 = vmul.f32 1.442695, %v7162_v20  ;;  %v7170_v37 = vadd.f32 1.0, %v7162_v20  ;;  %vm7167_vm0 = vcmp.gt.f32.partialorder %v7162_v20, 0.0 }
0x51de   :  { %8578 = vpow2.f32 %v7175_v22 }
0x51e3   :  { %v8575_v40 = vpop.eup %8574  ;;  %v6693_v3 = vpop.xlane.xlu0 %6692 }
0x51e4   :  { %v7177_v26 = vsel %vm7165_vm12, %v7168_v29, %v8575_v40  ;;  %v6694_v49 = vmul.f32 0.03125, %v6693_v3 }
0x51e5   :  { %v7180_v28 = vadd.f32 0.001, %v7177_v26 }
0x51e6   :  { %v6695_v35 = vadd.f32 1e-05, %v6694_v49 }
0x51e7   :  { %v8577_v30 = vpop.eup %8576  ;;  %v7204_v36 = vsel %vm7203_vm13, %v7152_v6, %v7180_v28  ;;  %v7184_v58 = vpop.permute.xlu0 %7183 }
0x51e8   :  { %7208 = vst.msk [vmem:[%s10161_s15] sm:$0xff] %vm7207_vm14, %v7204_v36  ;;  %v7178_v34 = vsel %vm7166_vm15, %v7169_v33, %v8577_v30  ;;  %8580 = vrsqrt.f32 %v6695_v35  ;;  %v7198_v11 = vsel %vm286_vm2, %v9720_v24, %v7184_v58 }
0x51e9   :  { %v7181_v56 = vadd.f32 0.001, %v7178_v34  ;;  %v7199_v15 = vsel %vm7075_vm11, %v7198_v11, %v7192_v60 }
0x51eb   :  { %v8579_v13 = vpop.eup %8578  ;;  %v7205_v10 = vsel %vm7203_vm13, %v7157_v17, %v7181_v56 }
0x51ec   :  { %7209 = vst.msk [vmem:[%s10161_s15 + $0x8] sm:$0xff] %vm7207_vm14, %v7205_v10  ;;  %v7179_v39 = vsel %vm7167_vm0, %v7170_v37, %v8579_v13 }
0x51ed   :  { %v7182_v43 = vadd.f32 0.001, %v7179_v39 }
0x51ef   :  { %v7206_v48 = vsel %vm7203_vm13, %v7162_v20, %v7182_v43 }
0x51f0   :  { %7210 = vst.msk [vmem:[%s10161_s15 + $0x10] sm:$0xff] %vm7207_vm14, %v7206_v48 }
0x51f5   :  { %v8581_v41 = vpop.eup %8580 }
0x51f6   :  { %v6697_v51 = vmul.f32 %v8581_v41, %v6689_v2 }
0x51f8   :  { %v6702_v55 = vmul.f32 %v6701_v14, %v6697_v51 }
0x51fa   :  { %v6707_v52 = vadd.f32 %v6706_v50, %v6702_v55 }
0x51fc   :  { %v6708_v53 = vmax.f32 %v6707_v52, 0.0 }
0x51fe   :  { %v6710_v54 = vadd.f32 %v6708_v53, %v9969_v38 }
0x5200   :  { %7195 = vrot.lane.b32.xlu1 %v6710_v54, %s8815_s30 }
0x5272   :  { %v7196_v62 = vpop.permute.xlu1 %7195 }
0x5273   :  { %v7201_v63 = vsel %vm7200_vm1, %v7199_v15, %v7196_v62 }
0x5274   :  { %7202 = vst [vmem:[%s10160_s14] sm:$0x3] %v7201_v63 }
0x5275   :  { %7219 = vsyncpa [#allocation3], 1 }
0x5276   :  { %7220 = vsyncpa [#allocation5], 1 }
0x5277   :  { %7221 = vsyncpa [#allocation8], 1 }
0x5278   :  { %7222 = vsyncpa [#allocation11], 1 }
0x5279   :  { %7223 = vsyncpa [#allocation14], 1 }
0x527a   :  { %7224 = vsyncpa [#allocation17], 1 }

</bundles_post_ra>
